<compile_context>
chip_gen: v7x
topology: tpu7x:2x2x1
jax: 0.10.0
libtpu: 0.0.40
codegen_flags: <defaults>
</compile_context>

<pallas_src>
import jax
import jax.numpy as jnp
import numpy as np
from jax import lax
from jax.experimental import pallas as pl
from jax.experimental.pallas import tpu as pltpu

LANE = 128


def round_up(v, m):
    return (v + m - 1) // m * m


def make_bottleneck_kernel(H, W, Cin, cp_mid, dilation):
    d = dilation
    Hp, Wp = H + 2 * d, W + 2 * d
    M = H * W

    def kernel(x_ref, w1_ref, s1_ref, b1_ref,
               w2_ref, s2_ref, b2_ref,
               w3_ref, s3_ref, b3_ref,
               o_ref, pad_ref):
        # ---- zero ONLY the d-wide halo ring of the bf16 pad scratch (the
        #      interior is fully overwritten below; re-zeroing every step keeps
        #      this correct even when the batch grid is split across cores). ---
        pad_ref[0:d, :, :] = jnp.zeros((d, Wp, cp_mid), jnp.bfloat16)
        pad_ref[d + H:Hp, :, :] = jnp.zeros((d, Wp, cp_mid), jnp.bfloat16)
        pad_ref[d:d + H, 0:d, :] = jnp.zeros((H, d, cp_mid), jnp.bfloat16)
        pad_ref[d:d + H, d + W:Wp, :] = jnp.zeros((H, d, cp_mid), jnp.bfloat16)

        x2d = x_ref[0]                                   # f32 (M, Cin), true Cin
        x_bf = x2d.astype(jnp.bfloat16)

        # ---- conv1: 1x1 conv == bf16 matmul over channels, BN affine + ReLU --
        y1 = jnp.dot(x_bf, w1_ref[...], preferred_element_type=jnp.float32)
        y1 = jnp.maximum(y1 * s1_ref[...] + b1_ref[...], 0.0)   # f32 (M, cp_mid)
        # single f32->bf16 cast; pad scratch holds bf16 from here on
        pad_ref[d:d + H, d:d + W, :] = y1.astype(jnp.bfloat16).reshape(H, W, cp_mid)

        # ---- conv2: 3x3 dilated conv as 9 accumulating MXU matmuls -----------
        acc = jnp.zeros((M, cp_mid), jnp.float32)
        for ky in range(3):
            for kx in range(3):
                t = ky * 3 + kx
                tap = pad_ref[ky * d:ky * d + H, kx * d:kx * d + W, :]
                acc = acc + jnp.dot(tap.reshape(M, cp_mid), w2_ref[t],
                                    preferred_element_type=jnp.float32)
        y2 = jnp.maximum(acc * s2_ref[...] + b2_ref[...], 0.0)  # f32 (M, cp_mid)

        # ---- conv3: 1x1 conv + BN affine + ReLU ------------------------------
        y3 = jnp.dot(y2.astype(jnp.bfloat16), w3_ref[...],
                     preferred_element_type=jnp.float32)
        y3 = jnp.maximum(y3 * s3_ref[...] + b3_ref[...], 0.0)   # f32 (M, Cin)

        # ---- residual add (f32), written at true Cin -------------------------
        o_ref[0] = y3 + x2d

    return kernel


def bottleneck_pallas(x_nchw, params, dilation):
    """x_nchw: (N, Cin, H, W) float32. Returns (N, Cin, H, W) float32."""
    N, Cin, H, W = x_nchw.shape
    M = H * W
    d = dilation
    cp_mid = params["w2"].shape[-1]

    # NHWC, flattened to (N, H*W, Cin) in HBM — no channel padding of activations.
    x = jnp.transpose(x_nchw, (0, 2, 3, 1)).astype(jnp.float32).reshape(N, M, Cin)

    kernel = make_bottleneck_kernel(H, W, Cin, cp_mid, d)

    def const_spec(shape):
        nd = len(shape)
        # Grid-constant operand: single-buffered (its block index never changes).
        return pl.BlockSpec(shape, lambda b, _nd=nd: (0,) * _nd,
                            pipeline_mode=pl.Buffered(1))

    grid_spec = pltpu.PrefetchScalarGridSpec(
        num_scalar_prefetch=0,
        grid=(N,),
        in_specs=[
            pl.BlockSpec((1, M, Cin), lambda b: (b, 0, 0)),
            const_spec(params["w1"].shape),
            const_spec(params["s1"].shape),
            const_spec(params["b1"].shape),
            const_spec(params["w2"].shape),
            const_spec(params["s2"].shape),
            const_spec(params["b2"].shape),
            const_spec(params["w3"].shape),
            const_spec(params["s3"].shape),
            const_spec(params["b3"].shape),
        ],
        out_specs=pl.BlockSpec((1, M, Cin), lambda b: (b, 0, 0)),
        scratch_shapes=[
            pltpu.VMEM((H + 2 * d, W + 2 * d, cp_mid), jnp.bfloat16),  # haloed y1
        ],
    )

    out_flat = pl.pallas_call(
        kernel,
        out_shape=jax.ShapeDtypeStruct((N, M, Cin), jnp.float32),
        grid_spec=grid_spec,
        compiler_params=pltpu.CompilerParams(
            dimension_semantics=("parallel",),
            vmem_limit_bytes=32 * 1024 * 1024,
        ),
    )(x, params["w1"], params["s1"], params["b1"],
      params["w2"], params["s2"], params["b2"],
      params["w3"], params["s3"], params["b3"])

    out_nhwc = out_flat.reshape(N, H, W, Cin)
    return jnp.transpose(out_nhwc, (0, 3, 1, 2))                  # back to NCHW


def fold_bn(gamma, beta, mean, var, eps=1e-5):
    scale = gamma / jnp.sqrt(var + eps)
    bias = beta - mean * scale
    return scale, bias


def make_params(key, in_channels, mid_channels):
    """Deterministic synthetic parameters (PyTorch conv weight shapes), converted
    to the matmul-friendly layouts used by the kernel. Only the *mid* channel
    dim is lane-padded; activations keep their true channel count."""
    k1, k2, k3 = jax.random.split(key, 3)
    # PyTorch conv weights: (out, in, kh, kw)
    w1_t = jax.random.normal(k1, (mid_channels, in_channels, 1, 1), jnp.float32) * 0.1
    w2_t = jax.random.normal(k2, (mid_channels, mid_channels, 3, 3), jnp.float32) * 0.1
    w3_t = jax.random.normal(k3, (in_channels, mid_channels, 1, 1), jnp.float32) * 0.1

    def bn_params(c, offset):
        idx = jnp.arange(c, dtype=jnp.float32)
        gamma = 1.0 + 0.05 * idx + offset
        beta = 0.02 * idx - offset
        mean = 0.01 * idx
        var = 1.0 + 0.03 * idx
        return fold_bn(gamma, beta, mean, var)

    s1, b1 = bn_params(mid_channels, 0.00)
    s2, b2 = bn_params(mid_channels, 0.01)
    s3, b3 = bn_params(in_channels, 0.02)

    cp_mid = round_up(mid_channels, LANE)
    pm = cp_mid - mid_channels

    # conv1 as (Cin, Cp_mid): K dim unpadded (matches unpadded x), N dim zero-padded.
    w1 = jnp.pad(jnp.transpose(w1_t[:, :, 0, 0], (1, 0)), ((0, 0), (0, pm)))
    w1 = w1.astype(jnp.bfloat16)
    # conv3 as (Cp_mid, Cin): padded rows are zero -> no contribution.
    w3 = jnp.pad(jnp.transpose(w3_t[:, :, 0, 0], (1, 0)), ((0, pm), (0, 0)))
    w3 = w3.astype(jnp.bfloat16)
    # conv2 pre-packed per tap: (9, Cp_mid, Cp_mid), tap index t = ky*3 + kx.
    w2_hwio = jnp.transpose(w2_t, (2, 3, 1, 0))                   # (3, 3, Cmid, Cmid)
    w2_hwio = jnp.pad(w2_hwio, ((0, 0), (0, 0), (0, pm), (0, pm)))
    w2 = w2_hwio.reshape(9, cp_mid, cp_mid).astype(jnp.bfloat16)

    def pad_vec(a, cols):
        # Padded BN scale/bias entries are zero => padded channels stay exactly 0.
        return jnp.pad(a, (0, cols - a.shape[0])).reshape(1, cols)

    params = {
        "w1": w1, "w2": w2, "w3": w3,
        "s1": pad_vec(s1, cp_mid), "b1": pad_vec(b1, cp_mid),
        "s2": pad_vec(s2, cp_mid), "b2": pad_vec(b2, cp_mid),
        "s3": s3.reshape(1, -1), "b3": b3.reshape(1, -1),
    }
    ref_data = {
        "w1_t": w1_t, "w2_t": w2_t, "w3_t": w3_t,
        "s1": s1, "b1": b1, "s2": s2, "b2": b2, "s3": s3, "b3": b3,
    }
    return params, ref_data


def bottleneck_reference(x_nchw, ref_data, dilation):
    """Pure-JAX reference (lax.conv). Conv operands are cast to bf16 (f32 accum),
    mirroring the kernel's MXU precision, so the check can stay tight."""
    x = jnp.transpose(x_nchw, (0, 2, 3, 1)).astype(jnp.float32)   # NHWC
    dn = ("NHWC", "HWIO", "NHWC")

    def conv(h, w_t, pad, dil):
        w = jnp.transpose(w_t, (2, 3, 1, 0))                      # HWIO
        return lax.conv_general_dilated(
            h.astype(jnp.bfloat16), w.astype(jnp.bfloat16),
            window_strides=(1, 1), padding=[(pad, pad), (pad, pad)],
            rhs_dilation=(dil, dil), dimension_numbers=dn,
            preferred_element_type=jnp.float32)

    h = conv(x, ref_data["w1_t"], 0, 1)
    h = jnp.maximum(h * ref_data["s1"] + ref_data["b1"], 0.0)
    h = conv(h, ref_data["w2_t"], dilation, dilation)
    h = jnp.maximum(h * ref_data["s2"] + ref_data["b2"], 0.0)
    h = conv(h, ref_data["w3_t"], 0, 1)
    h = jnp.maximum(h * ref_data["s3"] + ref_data["b3"], 0.0)
    out = h + x
    return jnp.transpose(out, (0, 3, 1, 2))


if __name__ == "__main__":
    N, Cin, Cmid, H, W = 2, 32, 16, 16, 16
    dilation = 2

    key = jax.random.PRNGKey(0)
    kx_, kp = jax.random.split(key)
    x = jax.random.normal(kx_, (N, Cin, H, W), jnp.float32)

    params, ref_data = make_params(kp, Cin, Cmid)

    out = jax.block_until_ready(bottleneck_pallas(x, params, dilation))
    ref = jax.block_until_ready(bottleneck_reference(x, ref_data, dilation))
    np.testing.assert_allclose(np.asarray(out), np.asarray(ref), rtol=1e-2, atol=1e-2)

    print("KERNEL_OK")
</pallas_src>

<mosaic_0001>
module attributes {stable_mosaic.version = 11 : i64} {
  func.func @kernel(%arg0: i32, %arg1: memref<1x256x32xf32, #tpu.memory_space<vmem>>, %arg2: memref<32x128xbf16, #tpu.memory_space<vmem>>, %arg3: memref<1x128xf32, #tpu.memory_space<vmem>>, %arg4: memref<1x128xf32, #tpu.memory_space<vmem>>, %arg5: memref<9x128x128xbf16, #tpu.memory_space<vmem>>, %arg6: memref<1x128xf32, #tpu.memory_space<vmem>>, %arg7: memref<1x128xf32, #tpu.memory_space<vmem>>, %arg8: memref<128x32xbf16, #tpu.memory_space<vmem>>, %arg9: memref<1x32xf32, #tpu.memory_space<vmem>>, %arg10: memref<1x32xf32, #tpu.memory_space<vmem>>, %arg11: memref<1x256x32xf32, #tpu.memory_space<vmem>>, %arg12: memref<20x20x128xbf16, #tpu.memory_space<vmem>>) attributes {dimension_semantics = [#tpu.dimension_semantics<parallel>], iteration_bounds = array<i64: 2>, scalar_prefetch = 0 : i64, scratch_operands = 1 : i64, tpu.core_type = #tpu.core_type<tc>, window_params = [{transform_indices = @transform_0, window_bounds = array<i64: 1, 256, 32>}, {pipeline_mode = #tpu.pipeline_mode<synchronous>, transform_indices = @transform_1, window_bounds = array<i64: 32, 128>}, {pipeline_mode = #tpu.pipeline_mode<synchronous>, transform_indices = @transform_2, window_bounds = array<i64: 1, 128>}, {pipeline_mode = #tpu.pipeline_mode<synchronous>, transform_indices = @transform_3, window_bounds = array<i64: 1, 128>}, {pipeline_mode = #tpu.pipeline_mode<synchronous>, transform_indices = @transform_4, window_bounds = array<i64: 9, 128, 128>}, {pipeline_mode = #tpu.pipeline_mode<synchronous>, transform_indices = @transform_5, window_bounds = array<i64: 1, 128>}, {pipeline_mode = #tpu.pipeline_mode<synchronous>, transform_indices = @transform_6, window_bounds = array<i64: 1, 128>}, {pipeline_mode = #tpu.pipeline_mode<synchronous>, transform_indices = @transform_7, window_bounds = array<i64: 128, 32>}, {pipeline_mode = #tpu.pipeline_mode<synchronous>, transform_indices = @transform_8, window_bounds = array<i64: 1, 32>}, {pipeline_mode = #tpu.pipeline_mode<synchronous>, transform_indices = @transform_9, window_bounds = array<i64: 1, 32>}, {transform_indices = @transform_10, window_bounds = array<i64: 1, 256, 32>}]} {
    %cst = arith.constant 0.000000e+00 : bf16
    %0 = vector.broadcast %cst : bf16 to vector<2x20x128xbf16>
    %c0 = arith.constant 0 : index
    %c0_0 = arith.constant 0 : index
    %c0_1 = arith.constant 0 : index
    %1 = vector.load %arg12[%c0, %c0_0, %c0_1] : memref<20x20x128xbf16, #tpu.memory_space<vmem>>, vector<2x20x128xbf16>
    tpu.vector_store %arg12[%c0, %c0_0, %c0_1], %0 {strides = array<i32>} : memref<20x20x128xbf16, #tpu.memory_space<vmem>>, vector<2x20x128xbf16>,
    %cst_2 = arith.constant 0.000000e+00 : bf16
    %2 = vector.broadcast %cst_2 : bf16 to vector<2x20x128xbf16>
    %c18 = arith.constant 18 : index
    %c0_3 = arith.constant 0 : index
    %c0_4 = arith.constant 0 : index
    %3 = vector.load %arg12[%c18, %c0_3, %c0_4] : memref<20x20x128xbf16, #tpu.memory_space<vmem>>, vector<2x20x128xbf16>
    tpu.vector_store %arg12[%c18, %c0_3, %c0_4], %2 {strides = array<i32>} : memref<20x20x128xbf16, #tpu.memory_space<vmem>>, vector<2x20x128xbf16>,
    %cst_5 = arith.constant 0.000000e+00 : bf16
    %4 = vector.broadcast %cst_5 : bf16 to vector<16x2x128xbf16>
    %c2 = arith.constant 2 : index
    %c0_6 = arith.constant 0 : index
    %c0_7 = arith.constant 0 : index
    %5 = vector.load %arg12[%c2, %c0_6, %c0_7] : memref<20x20x128xbf16, #tpu.memory_space<vmem>>, vector<16x2x128xbf16>
    tpu.vector_store %arg12[%c2, %c0_6, %c0_7], %4 {strides = array<i32>} : memref<20x20x128xbf16, #tpu.memory_space<vmem>>, vector<16x2x128xbf16>,
    %cst_8 = arith.constant 0.000000e+00 : bf16
    %6 = vector.broadcast %cst_8 : bf16 to vector<16x2x128xbf16>
    %c2_9 = arith.constant 2 : index
    %c18_10 = arith.constant 18 : index
    %c0_11 = arith.constant 0 : index
    %7 = vector.load %arg12[%c2_9, %c18_10, %c0_11] : memref<20x20x128xbf16, #tpu.memory_space<vmem>>, vector<16x2x128xbf16>
    tpu.vector_store %arg12[%c2_9, %c18_10, %c0_11], %6 {strides = array<i32>} : memref<20x20x128xbf16, #tpu.memory_space<vmem>>, vector<16x2x128xbf16>,
    %c0_12 = arith.constant 0 : index
    %c0_13 = arith.constant 0 : index
    %c0_14 = arith.constant 0 : index
    %8 = vector.load %arg1[%c0_12, %c0_13, %c0_14] : memref<1x256x32xf32, #tpu.memory_space<vmem>>, vector<1x256x32xf32>
    %9 = vector.shape_cast %8 : vector<1x256x32xf32> to vector<256x32xf32>
    %10 = arith.truncf %9 : vector<256x32xf32> to vector<256x32xbf16>
    %c0_15 = arith.constant 0 : index
    %c0_16 = arith.constant 0 : index
    %11 = vector.load %arg2[%c0_15, %c0_16] : memref<32x128xbf16, #tpu.memory_space<vmem>>, vector<32x128xbf16>
    %cst_17 = arith.constant dense<0.000000e+00> : vector<256x128xf32>
    %12 = tpu.matmul %10, %11, %cst_17 {dimension_numbers = #tpu.dot_dimension_numbers<[1], [0], [0], [1], [0, 0, 1, 1], [], []>} : vector<256x32xbf16>, vector<32x128xbf16>, vector<256x128xf32> -> vector<256x128xf32>
    %c0_18 = arith.constant 0 : index
    %c0_19 = arith.constant 0 : index
    %13 = vector.load %arg3[%c0_18, %c0_19] : memref<1x128xf32, #tpu.memory_space<vmem>>, vector<1x128xf32>
    %14 = vector.broadcast %13 : vector<1x128xf32> to vector<256x128xf32>
    %15 = arith.mulf %12, %14 : vector<256x128xf32>
    %c0_20 = arith.constant 0 : index
    %c0_21 = arith.constant 0 : index
    %16 = vector.load %arg4[%c0_20, %c0_21] : memref<1x128xf32, #tpu.memory_space<vmem>>, vector<1x128xf32>
    %17 = vector.broadcast %16 : vector<1x128xf32> to vector<256x128xf32>
    %18 = arith.addf %15, %17 : vector<256x128xf32>
    %cst_22 = arith.constant 0.000000e+00 : f32
    %19 = vector.broadcast %cst_22 : f32 to vector<256x128xf32>
    %20 = arith.maximumf %18, %19 : vector<256x128xf32>
    %21 = arith.truncf %20 : vector<256x128xf32> to vector<256x128xbf16>
    %22 = vector.shape_cast %21 : vector<256x128xbf16> to vector<16x16x128xbf16>
    %c2_23 = arith.constant 2 : index
    %c2_24 = arith.constant 2 : index
    %c0_25 = arith.constant 0 : index
    %23 = vector.load %arg12[%c2_23, %c2_24, %c0_25] : memref<20x20x128xbf16, #tpu.memory_space<vmem>>, vector<16x16x128xbf16>
    tpu.vector_store %arg12[%c2_23, %c2_24, %c0_25], %22 {strides = array<i32>} : memref<20x20x128xbf16, #tpu.memory_space<vmem>>, vector<16x16x128xbf16>,
    %cst_26 = arith.constant 0.000000e+00 : f32
    %24 = vector.broadcast %cst_26 : f32 to vector<256x128xf32>
    %c0_27 = arith.constant 0 : index
    %c0_28 = arith.constant 0 : index
    %c0_29 = arith.constant 0 : index
    %25 = vector.load %arg12[%c0_27, %c0_28, %c0_29] : memref<20x20x128xbf16, #tpu.memory_space<vmem>>, vector<16x16x128xbf16>
    %26 = vector.shape_cast %25 : vector<16x16x128xbf16> to vector<256x128xbf16>
    %c0_30 = arith.constant 0 : index
    %c0_31 = arith.constant 0 : index
    %c0_32 = arith.constant 0 : index
    %27 = vector.load %arg5[%c0_30, %c0_31, %c0_32] : memref<9x128x128xbf16, #tpu.memory_space<vmem>>, vector<1x128x128xbf16>
    %28 = vector.shape_cast %27 : vector<1x128x128xbf16> to vector<128x128xbf16>
    %cst_33 = arith.constant dense<0.000000e+00> : vector<256x128xf32>
    %29 = tpu.matmul %26, %28, %cst_33 {dimension_numbers = #tpu.dot_dimension_numbers<[1], [0], [0], [1], [0, 0, 1, 1], [], []>} : vector<256x128xbf16>, vector<128x128xbf16>, vector<256x128xf32> -> vector<256x128xf32>
    %30 = arith.addf %24, %29 : vector<256x128xf32>
    %c0_34 = arith.constant 0 : index
    %c2_35 = arith.constant 2 : index
    %c0_36 = arith.constant 0 : index
    %31 = vector.load %arg12[%c0_34, %c2_35, %c0_36] : memref<20x20x128xbf16, #tpu.memory_space<vmem>>, vector<16x16x128xbf16>
    %32 = vector.shape_cast %31 : vector<16x16x128xbf16> to vector<256x128xbf16>
    %c1 = arith.constant 1 : index
    %c0_37 = arith.constant 0 : index
    %c0_38 = arith.constant 0 : index
    %33 = vector.load %arg5[%c1, %c0_37, %c0_38] : memref<9x128x128xbf16, #tpu.memory_space<vmem>>, vector<1x128x128xbf16>
    %34 = vector.shape_cast %33 : vector<1x128x128xbf16> to vector<128x128xbf16>
    %cst_39 = arith.constant dense<0.000000e+00> : vector<256x128xf32>
    %35 = tpu.matmul %32, %34, %cst_39 {dimension_numbers = #tpu.dot_dimension_numbers<[1], [0], [0], [1], [0, 0, 1, 1], [], []>} : vector<256x128xbf16>, vector<128x128xbf16>, vector<256x128xf32> -> vector<256x128xf32>
    %36 = arith.addf %30, %35 : vector<256x128xf32>
    %c0_40 = arith.constant 0 : index
    %c4 = arith.constant 4 : index
    %c0_41 = arith.constant 0 : index
    %37 = vector.load %arg12[%c0_40, %c4, %c0_41] : memref<20x20x128xbf16, #tpu.memory_space<vmem>>, vector<16x16x128xbf16>
    %38 = vector.shape_cast %37 : vector<16x16x128xbf16> to vector<256x128xbf16>
    %c2_42 = arith.constant 2 : index
    %c0_43 = arith.constant 0 : index
    %c0_44 = arith.constant 0 : index
    %39 = vector.load %arg5[%c2_42, %c0_43, %c0_44] : memref<9x128x128xbf16, #tpu.memory_space<vmem>>, vector<1x128x128xbf16>
    %40 = vector.shape_cast %39 : vector<1x128x128xbf16> to vector<128x128xbf16>
    %cst_45 = arith.constant dense<0.000000e+00> : vector<256x128xf32>
    %41 = tpu.matmul %38, %40, %cst_45 {dimension_numbers = #tpu.dot_dimension_numbers<[1], [0], [0], [1], [0, 0, 1, 1], [], []>} : vector<256x128xbf16>, vector<128x128xbf16>, vector<256x128xf32> -> vector<256x128xf32>
    %42 = arith.addf %36, %41 : vector<256x128xf32>
    %c2_46 = arith.constant 2 : index
    %c0_47 = arith.constant 0 : index
    %c0_48 = arith.constant 0 : index
    %43 = vector.load %arg12[%c2_46, %c0_47, %c0_48] : memref<20x20x128xbf16, #tpu.memory_space<vmem>>, vector<16x16x128xbf16>
    %44 = vector.shape_cast %43 : vector<16x16x128xbf16> to vector<256x128xbf16>
    %c3 = arith.constant 3 : index
    %c0_49 = arith.constant 0 : index
    %c0_50 = arith.constant 0 : index
    %45 = vector.load %arg5[%c3, %c0_49, %c0_50] : memref<9x128x128xbf16, #tpu.memory_space<vmem>>, vector<1x128x128xbf16>
    %46 = vector.shape_cast %45 : vector<1x128x128xbf16> to vector<128x128xbf16>
    %cst_51 = arith.constant dense<0.000000e+00> : vector<256x128xf32>
    %47 = tpu.matmul %44, %46, %cst_51 {dimension_numbers = #tpu.dot_dimension_numbers<[1], [0], [0], [1], [0, 0, 1, 1], [], []>} : vector<256x128xbf16>, vector<128x128xbf16>, vector<256x128xf32> -> vector<256x128xf32>
    %48 = arith.addf %42, %47 : vector<256x128xf32>
    %c2_52 = arith.constant 2 : index
    %c2_53 = arith.constant 2 : index
    %c0_54 = arith.constant 0 : index
    %49 = vector.load %arg12[%c2_52, %c2_53, %c0_54] : memref<20x20x128xbf16, #tpu.memory_space<vmem>>, vector<16x16x128xbf16>
    %50 = vector.shape_cast %49 : vector<16x16x128xbf16> to vector<256x128xbf16>
    %c4_55 = arith.constant 4 : index
    %c0_56 = arith.constant 0 : index
    %c0_57 = arith.constant 0 : index
    %51 = vector.load %arg5[%c4_55, %c0_56, %c0_57] : memref<9x128x128xbf16, #tpu.memory_space<vmem>>, vector<1x128x128xbf16>
    %52 = vector.shape_cast %51 : vector<1x128x128xbf16> to vector<128x128xbf16>
    %cst_58 = arith.constant dense<0.000000e+00> : vector<256x128xf32>
    %53 = tpu.matmul %50, %52, %cst_58 {dimension_numbers = #tpu.dot_dimension_numbers<[1], [0], [0], [1], [0, 0, 1, 1], [], []>} : vector<256x128xbf16>, vector<128x128xbf16>, vector<256x128xf32> -> vector<256x128xf32>
    %54 = arith.addf %48, %53 : vector<256x128xf32>
    %c2_59 = arith.constant 2 : index
    %c4_60 = arith.constant 4 : index
    %c0_61 = arith.constant 0 : index
    %55 = vector.load %arg12[%c2_59, %c4_60, %c0_61] : memref<20x20x128xbf16, #tpu.memory_space<vmem>>, vector<16x16x128xbf16>
    %56 = vector.shape_cast %55 : vector<16x16x128xbf16> to vector<256x128xbf16>
    %c5 = arith.constant 5 : index
    %c0_62 = arith.constant 0 : index
    %c0_63 = arith.constant 0 : index
    %57 = vector.load %arg5[%c5, %c0_62, %c0_63] : memref<9x128x128xbf16, #tpu.memory_space<vmem>>, vector<1x128x128xbf16>
    %58 = vector.shape_cast %57 : vector<1x128x128xbf16> to vector<128x128xbf16>
    %cst_64 = arith.constant dense<0.000000e+00> : vector<256x128xf32>
    %59 = tpu.matmul %56, %58, %cst_64 {dimension_numbers = #tpu.dot_dimension_numbers<[1], [0], [0], [1], [0, 0, 1, 1], [], []>} : vector<256x128xbf16>, vector<128x128xbf16>, vector<256x128xf32> -> vector<256x128xf32>
    %60 = arith.addf %54, %59 : vector<256x128xf32>
    %c4_65 = arith.constant 4 : index
    %c0_66 = arith.constant 0 : index
    %c0_67 = arith.constant 0 : index
    %61 = vector.load %arg12[%c4_65, %c0_66, %c0_67] : memref<20x20x128xbf16, #tpu.memory_space<vmem>>, vector<16x16x128xbf16>
    %62 = vector.shape_cast %61 : vector<16x16x128xbf16> to vector<256x128xbf16>
    %c6 = arith.constant 6 : index
    %c0_68 = arith.constant 0 : index
    %c0_69 = arith.constant 0 : index
    %63 = vector.load %arg5[%c6, %c0_68, %c0_69] : memref<9x128x128xbf16, #tpu.memory_space<vmem>>, vector<1x128x128xbf16>
    %64 = vector.shape_cast %63 : vector<1x128x128xbf16> to vector<128x128xbf16>
    %cst_70 = arith.constant dense<0.000000e+00> : vector<256x128xf32>
    %65 = tpu.matmul %62, %64, %cst_70 {dimension_numbers = #tpu.dot_dimension_numbers<[1], [0], [0], [1], [0, 0, 1, 1], [], []>} : vector<256x128xbf16>, vector<128x128xbf16>, vector<256x128xf32> -> vector<256x128xf32>
    %66 = arith.addf %60, %65 : vector<256x128xf32>
    %c4_71 = arith.constant 4 : index
    %c2_72 = arith.constant 2 : index
    %c0_73 = arith.constant 0 : index
    %67 = vector.load %arg12[%c4_71, %c2_72, %c0_73] : memref<20x20x128xbf16, #tpu.memory_space<vmem>>, vector<16x16x128xbf16>
    %68 = vector.shape_cast %67 : vector<16x16x128xbf16> to vector<256x128xbf16>
    %c7 = arith.constant 7 : index
    %c0_74 = arith.constant 0 : index
    %c0_75 = arith.constant 0 : index
    %69 = vector.load %arg5[%c7, %c0_74, %c0_75] : memref<9x128x128xbf16, #tpu.memory_space<vmem>>, vector<1x128x128xbf16>
    %70 = vector.shape_cast %69 : vector<1x128x128xbf16> to vector<128x128xbf16>
    %cst_76 = arith.constant dense<0.000000e+00> : vector<256x128xf32>
    %71 = tpu.matmul %68, %70, %cst_76 {dimension_numbers = #tpu.dot_dimension_numbers<[1], [0], [0], [1], [0, 0, 1, 1], [], []>} : vector<256x128xbf16>, vector<128x128xbf16>, vector<256x128xf32> -> vector<256x128xf32>
    %72 = arith.addf %66, %71 : vector<256x128xf32>
    %c4_77 = arith.constant 4 : index
    %c4_78 = arith.constant 4 : index
    %c0_79 = arith.constant 0 : index
    %73 = vector.load %arg12[%c4_77, %c4_78, %c0_79] : memref<20x20x128xbf16, #tpu.memory_space<vmem>>, vector<16x16x128xbf16>
    %74 = vector.shape_cast %73 : vector<16x16x128xbf16> to vector<256x128xbf16>
    %c8 = arith.constant 8 : index
    %c0_80 = arith.constant 0 : index
    %c0_81 = arith.constant 0 : index
    %75 = vector.load %arg5[%c8, %c0_80, %c0_81] : memref<9x128x128xbf16, #tpu.memory_space<vmem>>, vector<1x128x128xbf16>
    %76 = vector.shape_cast %75 : vector<1x128x128xbf16> to vector<128x128xbf16>
    %cst_82 = arith.constant dense<0.000000e+00> : vector<256x128xf32>
    %77 = tpu.matmul %74, %76, %cst_82 {dimension_numbers = #tpu.dot_dimension_numbers<[1], [0], [0], [1], [0, 0, 1, 1], [], []>} : vector<256x128xbf16>, vector<128x128xbf16>, vector<256x128xf32> -> vector<256x128xf32>
    %78 = arith.addf %72, %77 : vector<256x128xf32>
    %c0_83 = arith.constant 0 : index
    %c0_84 = arith.constant 0 : index
    %79 = vector.load %arg6[%c0_83, %c0_84] : memref<1x128xf32, #tpu.memory_space<vmem>>, vector<1x128xf32>
    %80 = vector.broadcast %79 : vector<1x128xf32> to vector<256x128xf32>
    %81 = arith.mulf %78, %80 : vector<256x128xf32>
    %c0_85 = arith.constant 0 : index
    %c0_86 = arith.constant 0 : index
    %82 = vector.load %arg7[%c0_85, %c0_86] : memref<1x128xf32, #tpu.memory_space<vmem>>, vector<1x128xf32>
    %83 = vector.broadcast %82 : vector<1x128xf32> to vector<256x128xf32>
    %84 = arith.addf %81, %83 : vector<256x128xf32>
    %cst_87 = arith.constant 0.000000e+00 : f32
    %85 = vector.broadcast %cst_87 : f32 to vector<256x128xf32>
    %86 = arith.maximumf %84, %85 : vector<256x128xf32>
    %87 = arith.truncf %86 : vector<256x128xf32> to vector<256x128xbf16>
    %c0_88 = arith.constant 0 : index
    %c0_89 = arith.constant 0 : index
    %88 = vector.load %arg8[%c0_88, %c0_89] : memref<128x32xbf16, #tpu.memory_space<vmem>>, vector<128x32xbf16>
    %cst_90 = arith.constant dense<0.000000e+00> : vector<256x32xf32>
    %89 = tpu.matmul %87, %88, %cst_90 {dimension_numbers = #tpu.dot_dimension_numbers<[1], [0], [0], [1], [0, 0, 1, 1], [], []>} : vector<256x128xbf16>, vector<128x32xbf16>, vector<256x32xf32> -> vector<256x32xf32>
    %c0_91 = arith.constant 0 : index
    %c0_92 = arith.constant 0 : index
    %90 = vector.load %arg9[%c0_91, %c0_92] : memref<1x32xf32, #tpu.memory_space<vmem>>, vector<1x32xf32>
    %91 = vector.broadcast %90 : vector<1x32xf32> to vector<256x32xf32>
    %92 = arith.mulf %89, %91 : vector<256x32xf32>
    %c0_93 = arith.constant 0 : index
    %c0_94 = arith.constant 0 : index
    %93 = vector.load %arg10[%c0_93, %c0_94] : memref<1x32xf32, #tpu.memory_space<vmem>>, vector<1x32xf32>
    %94 = vector.broadcast %93 : vector<1x32xf32> to vector<256x32xf32>
    %95 = arith.addf %92, %94 : vector<256x32xf32>
    %cst_95 = arith.constant 0.000000e+00 : f32
    %96 = vector.broadcast %cst_95 : f32 to vector<256x32xf32>
    %97 = arith.maximumf %95, %96 : vector<256x32xf32>
    %98 = arith.addf %97, %9 : vector<256x32xf32>
    %c0_96 = arith.constant 0 : index
    %c0_97 = arith.constant 0 : index
    %c0_98 = arith.constant 0 : index
    %99 = vector.load %arg11[%c0_96, %c0_97, %c0_98] : memref<1x256x32xf32, #tpu.memory_space<vmem>>, vector<1x256x32xf32>
    %100 = vector.shape_cast %99 : vector<1x256x32xf32> to vector<256x32xf32>
    %101 = vector.shape_cast %98 : vector<256x32xf32> to vector<1x256x32xf32>
    tpu.vector_store %arg11[%c0_96, %c0_97, %c0_98], %101 {strides = array<i32>} : memref<1x256x32xf32, #tpu.memory_space<vmem>>, vector<1x256x32xf32>,
    return
  }
  func.func @transform_0(%arg0: i32) -> (i32, i32, i32) {
    %c0_i32 = arith.constant 0 : i32
    %c0_i32_0 = arith.constant 0 : i32
    %c0_i32_1 = arith.constant 0 : i32
    return %arg0, %c0_i32, %c0_i32_0 : i32, i32, i32
  }
  func.func @transform_1(%arg0: i32) -> (i32, i32) {
    %c0_i32 = arith.constant 0 : i32
    %c0_i32_0 = arith.constant 0 : i32
    %c0_i32_1 = arith.constant 0 : i32
    return %c0_i32, %c0_i32_0 : i32, i32
  }
  func.func @transform_2(%arg0: i32) -> (i32, i32) {
    %c0_i32 = arith.constant 0 : i32
    %c0_i32_0 = arith.constant 0 : i32
    %c0_i32_1 = arith.constant 0 : i32
    return %c0_i32, %c0_i32_0 : i32, i32
  }
  func.func @transform_3(%arg0: i32) -> (i32, i32) {
    %c0_i32 = arith.constant 0 : i32
    %c0_i32_0 = arith.constant 0 : i32
    %c0_i32_1 = arith.constant 0 : i32
    return %c0_i32, %c0_i32_0 : i32, i32
  }
  func.func @transform_4(%arg0: i32) -> (i32, i32, i32) {
    %c0_i32 = arith.constant 0 : i32
    %c0_i32_0 = arith.constant 0 : i32
    %c0_i32_1 = arith.constant 0 : i32
    %c0_i32_2 = arith.constant 0 : i32
    return %c0_i32, %c0_i32_0, %c0_i32_1 : i32, i32, i32
  }
  func.func @transform_5(%arg0: i32) -> (i32, i32) {
    %c0_i32 = arith.constant 0 : i32
    %c0_i32_0 = arith.constant 0 : i32
    %c0_i32_1 = arith.constant 0 : i32
    return %c0_i32, %c0_i32_0 : i32, i32
  }
  func.func @transform_6(%arg0: i32) -> (i32, i32) {
    %c0_i32 = arith.constant 0 : i32
    %c0_i32_0 = arith.constant 0 : i32
    %c0_i32_1 = arith.constant 0 : i32
    return %c0_i32, %c0_i32_0 : i32, i32
  }
  func.func @transform_7(%arg0: i32) -> (i32, i32) {
    %c0_i32 = arith.constant 0 : i32
    %c0_i32_0 = arith.constant 0 : i32
    %c0_i32_1 = arith.constant 0 : i32
    return %c0_i32, %c0_i32_0 : i32, i32
  }
  func.func @transform_8(%arg0: i32) -> (i32, i32) {
    %c0_i32 = arith.constant 0 : i32
    %c0_i32_0 = arith.constant 0 : i32
    %c0_i32_1 = arith.constant 0 : i32
    return %c0_i32, %c0_i32_0 : i32, i32
  }
  func.func @transform_9(%arg0: i32) -> (i32, i32) {
    %c0_i32 = arith.constant 0 : i32
    %c0_i32_0 = arith.constant 0 : i32
    %c0_i32_1 = arith.constant 0 : i32
    return %c0_i32, %c0_i32_0 : i32, i32
  }
  func.func @transform_10(%arg0: i32) -> (i32, i32, i32) {
    %c0_i32 = arith.constant 0 : i32
    %c0_i32_0 = arith.constant 0 : i32
    %c0_i32_1 = arith.constant 0 : i32
    return %arg0, %c0_i32, %c0_i32_0 : i32, i32, i32
  }
}

</mosaic_0001>

<bundles_post_ra>
// kernel: tpu_custom_call.1
= control target key start
LH: loop header
LB: loop body
LE: loop exit
PB: predicated region body
PF: predicated region fallthrough
CT: control target
= control target key end

     0   :  { %s7647_s13 = smov 0   ;;  %s9209_s0 = inlined_call_operand.vmem [shape: f32[2,256,32], index: 0, kind: input, shape index: {}]   ;;  %s9210_s1 = inlined_call_operand.vmem [shape: bf16[32,128], index: 1, kind: input, shape index: {}]   ;;  %s9211_s2 = inlined_call_operand.vmem [shape: f32[1,128], index: 2, kind: input, shape index: {}]   ;;  %s9212_s3 = inlined_call_operand.vmem [shape: f32[1,128], index: 3, kind: input, shape index: {}]   ;;  %s9213_s4 = inlined_call_operand.vmem [shape: bf16[9,128,128], index: 4, kind: input, shape index: {}]   ;;  %s9214_s5 = inlined_call_operand.vmem [shape: f32[1,128], index: 5, kind: input, shape index: {}]   ;;  %s9215_s6 = inlined_call_operand.vmem [shape: f32[1,128], index: 6, kind: input, shape index: {}]   ;;  %s9216_s7 = inlined_call_operand.vmem [shape: bf16[128,32], index: 7, kind: input, shape index: {}]   ;;  %s9217_s8 = inlined_call_operand.vmem [shape: f32[1,32], index: 8, kind: input, shape index: {}]   ;;  %s9218_s9 = inlined_call_operand.vmem [shape: f32[1,32], index: 9, kind: input, shape index: {}]   ;;  %s9219_s10 = inlined_call_operand.vmem [shape: f32[2,256,32], index: 10, kind: output, shape index: {}]  }
   0x1 LB: > { %s5798_s14 = sadd.s32 4294967295, %s7589_s13   ;;  %p5802_p0 = scmp.ge.s32.totalorder %s7589_s13, 1  ;;  %s7589_s13 = sphi %s7647_s13, %s20_s13  }
   0x2   : > { %p312_p1 = scmp.lt.s32.totalorder %s7589_s13, 3 }
   0x4   : > { %p313_p2 = pnand %p5802_p0, %p312_p1 }
   0x6   : > { %316 = sbr.rel (%p313_p2) target bundleno = 1054 (0x41e), region = 60 }
   0xd   : > { %v7402_v0 = vld [vmem:[%s9210_s1] sm:$0xff]   ;;  %p350_p3 = scmp.lt.s32.totalorder %s5798_s14, 1  ;;  %v7403_v1 = vld [vmem:[%s9210_s1 + $0x8] sm:$0xff]   ;;  %vm471_vm0 = vcmask 261120   ;;  %v7408_v23 = vld [vmem:[%s9213_s4 + $0x50] sm:$0xff]   ;;  %v7591_v60 = vmov 0  }
   0xe   : > { %6605 = vmatprep.subr.bf16.mxu0 %v7402_v0  ;;  %v7405_v2 = vld [vmem:[%s9213_s4 + $0xc0] sm:$0xff]   ;;  %v7407_v4 = vld [vmem:[%s9213_s4 + $0xc8] sm:$0xff]   ;;  %v7409_v55 = vld [vmem:[%s9213_s4 + $0xd0] sm:$0xff]   ;;  %361 = vst [vmem:[#allocation2] sm:$0xf] %v7591_v60  ;;  %vm1194_vm1 = vcmask 1042432  }
   0xf   : > { %s9233_s14 = smov (!%p350_p3, %s5798_s14), 1  ;;  %6606 = vmatpush3.bf16.msra.mxu0 %v7402_v0  ;;  %v7404_v3 = vld [vmem:[%s9213_s4 + $0x40] sm:$0xff]   ;;  %6785 = vmatprep.subr.bf16.mxu1 %v7405_v2  ;;  %v7406_v14 = vld [vmem:[%s9213_s4 + $0x48] sm:$0xff]   ;;  %v7410_v56 = vld [vmem:[%s9213_s4 + $0x58] sm:$0xff]   ;;  %362 = vst [vmem:[#allocation2 + $0x4] sm:$0xf] %v7591_v60 }
  0x10   : > { %6607 = vmatprep.subr.bf16.mxu0 %v7403_v1  ;;  %s6313_s21 = sshll.u32 %s9233_s14, 8  ;;  %6786 = vmatpush3.bf16.msra.mxu1 %v7405_v2  ;;  %v7411_v57 = vld [vmem:[%s9213_s4 + $0xd8] sm:$0xff]   ;;  %v7412_v58 = vld [vmem:[%s9213_s4 + $0x60] sm:$0xff]   ;;  %363 = vst [vmem:[#allocation2 + $0x8] sm:$0x3] %v7591_v60  ;;  %v7414_v61 = vld [vmem:[%s9213_s4 + $0x68] sm:$0xff]  }
  0x11   : > { %s7675_s26 = scalar_lea.vmem %s9209_s0, %s6313_s21  ;;  %6787 = vmatprep.subr.bf16.mxu1 %v7407_v4  ;;  %v7413_v59 = vld [vmem:[%s9213_s4 + $0xe0] sm:$0xff]   ;;  %364 = vst [vmem:[#allocation2 + $0xc] sm:$0xf] %v7591_v60  ;;  %365 = vst [vmem:[#allocation2 + $0x10] sm:$0xf] %v7591_v60  ;;  %v7415_v62 = vld [vmem:[%s9213_s4 + $0xe8] sm:$0xff]   ;;  %s9051_s27 = scalar_lea.vmem %s9219_s10, %s6313_s21 }
  0x12   : > { %v407_v5 = vld [vmem:[%s7675_s26] sm:$0xff]  ;;  %v408_v6 = vld [vmem:[%s7675_s26 + $0x8] sm:$0xff]  ;;  %v409_v7 = vld [vmem:[%s7675_s26 + $0x10] sm:$0xff]  ;;  %366 = vst [vmem:[#allocation2 + $0x14] sm:$0x3] %v7591_v60  ;;  %vm1195_vm2 = vcmask 1046532  }
  0x13   : > { %6608 = vmatpush3.bf16.msra.mxu0 %v7403_v1  ;;  %v439_v8 = vpack.c.bf16 %v408_v6, %v407_v5  ;;  %v410_v9 = vld [vmem:[%s7675_s26 + $0x18] sm:$0xff]  ;;  %v411_v10 = vld [vmem:[%s7675_s26 + $0x20] sm:$0xff]  ;;  %v412_v11 = vld [vmem:[%s7675_s26 + $0x28] sm:$0xff]  ;;  %368 = vst [vmem:[#allocation2 + $0xd8] sm:$0xf] %v7591_v60  ;;  %vm887_vm4 = vcmask 1040384  }
  0x14   : > { %v440_v12 = vpack.c.bf16 %v410_v9, %v409_v7  ;;  %v441_v13 = vpack.c.bf16 %v412_v11, %v411_v10  ;;  %6641 = vmatprep.subr.bf16.mxu0 %v7404_v3  ;;  %6788 = vmatpush3.bf16.msra.mxu1 %v7407_v4  ;;  %v413_v15 = vld [vmem:[%s7675_s26 + $0x30] sm:$0xff]  ;;  %v414_v16 = vld [vmem:[%s7675_s26 + $0x38] sm:$0xff]  ;;  %v415_v17 = vld [vmem:[%s7675_s26 + $0x40] sm:$0xff]  ;;  %369 = vst [vmem:[#allocation2 + $0xdc] sm:$0xf] %v7591_v60  ;;  %vm888_vm5 = vcmask 1044484  }
  0x15   : > { %6609 = vmatprep.mubr.msk.bf16.mxu0 %vm471_vm0, %v439_v8  ;;  %v416_v18 = vld [vmem:[%s7675_s26 + $0x48] sm:$0xff]  ;;  %v442_v19 = vpack.c.bf16 %v414_v16, %v413_v15  ;;  %v417_v21 = vld [vmem:[%s7675_s26 + $0x50] sm:$0xff]  ;;  %v418_v22 = vld [vmem:[%s7675_s26 + $0x58] sm:$0xff]  ;;  %6789 = vmatprep.subr.bf16.mxu1 %v7409_v55  ;;  %370 = vst [vmem:[#allocation2 + $0xe0] sm:$0x3] %v7591_v60  ;;  %vm1952_vm7 = vcmask 1041408  }
  0x16   : > { %6610 = vmatmul.mubr.msk.bf16.vlgmr.msra.gmra.mrb[0].mxu0 %vm471_vm0, %v440_v12  ;;  %v443_v20 = vpack.c.bf16 %v416_v18, %v415_v17  ;;  %v419_v24 = vld [vmem:[%s7675_s26 + $0x60] sm:$0xff]  ;;  %v420_v25 = vld [vmem:[%s7675_s26 + $0x68] sm:$0xff]  ;;  %v444_v26 = vpack.c.bf16 %v418_v22, %v417_v21  ;;  %v421_v28 = vld [vmem:[%s7675_s26 + $0x70] sm:$0xff]  ;;  %371 = vst [vmem:[#allocation2 + $0xe4] sm:$0xf] %v7591_v60  ;;  %vm1953_vm8 = vcmask 1045508  }
  0x17   : > { %6613 = vmatprep.mubr.msk.bf16.mxu0 %vm471_vm0, %v441_v13  ;;  %6642 = vmatpush3.bf16.msra.mxu0 %v7404_v3  ;;  %v445_v27 = vpack.c.bf16 %v420_v25, %v419_v24  ;;  %v422_v29 = vld [vmem:[%s7675_s26 + $0x78] sm:$0xff]  ;;  %v423_v30 = vld [vmem:[%s7675_s26 + $0x80] sm:$0xff]  ;;  %v424_v31 = vld [vmem:[%s7675_s26 + $0x88] sm:$0xff]  ;;  %372 = vst [vmem:[#allocation2 + $0xe8] sm:$0xf] %v7591_v60 }
  0x18   : > { %6643 = vmatprep.subr.bf16.mxu0 %v7406_v14  ;;  %v446_v32 = vpack.c.bf16 %v422_v29, %v421_v28  ;;  %v447_v33 = vpack.c.bf16 %v424_v31, %v423_v30  ;;  %v425_v34 = vld [vmem:[%s7675_s26 + $0x90] sm:$0xff]  ;;  %v426_v35 = vld [vmem:[%s7675_s26 + $0x98] sm:$0xff]  ;;  %v427_v36 = vld [vmem:[%s7675_s26 + $0xa0] sm:$0xff]  ;;  %6790 = vmatpush3.bf16.msra.mxu1 %v7409_v55  ;;  %373 = vst [vmem:[#allocation2 + $0xec] sm:$0x3] %v7591_v60 }
  0x19   : > { %v428_v37 = vld [vmem:[%s7675_s26 + $0xa8] sm:$0xff]  ;;  %v448_v38 = vpack.c.bf16 %v426_v35, %v425_v34  ;;  %v429_v40 = vld [vmem:[%s7675_s26 + $0xb0] sm:$0xff]  ;;  %v430_v41 = vld [vmem:[%s7675_s26 + $0xb8] sm:$0xff]  ;;  %6791 = vmatprep.subr.bf16.mxu1 %v7411_v57  ;;  %375 = vst [vmem:[#allocation2 + $0x18] sm:$0x1] %v7591_v60 }
  0x1a   : > { %v449_v39 = vpack.c.bf16 %v428_v37, %v427_v36  ;;  %v431_v42 = vld [vmem:[%s7675_s26 + $0xc0] sm:$0xff]  ;;  %v432_v43 = vld [vmem:[%s7675_s26 + $0xc8] sm:$0xff]  ;;  %v450_v44 = vpack.c.bf16 %v430_v41, %v429_v40  ;;  %v433_v46 = vld [vmem:[%s7675_s26 + $0xd0] sm:$0xff]  ;;  %376 = vst [vmem:[#allocation2 + $0x24] sm:$0x1] %v7591_v60 }
  0x1b   : > { %6644 = vmatpush3.bf16.msra.mxu0 %v7406_v14  ;;  %v451_v45 = vpack.c.bf16 %v432_v43, %v431_v42  ;;  %v434_v47 = vld [vmem:[%s7675_s26 + $0xd8] sm:$0xff]  ;;  %v435_v48 = vld [vmem:[%s7675_s26 + $0xe0] sm:$0xff]  ;;  %v436_v49 = vld [vmem:[%s7675_s26 + $0xe8] sm:$0xff]  ;;  %377 = vst [vmem:[#allocation2 + $0x30] sm:$0x1] %v7591_v60 }
  0x1c   : > { %6645 = vmatprep.subr.bf16.mxu0 %v7408_v23  ;;  %v452_v50 = vpack.c.bf16 %v434_v47, %v433_v46  ;;  %v453_v51 = vpack.c.bf16 %v436_v49, %v435_v48  ;;  %v437_v52 = vld [vmem:[%s7675_s26 + $0xf0] sm:$0xff]  ;;  %v438_v53 = vld [vmem:[%s7675_s26 + $0xf8] sm:$0xff]  ;;  %6792 = vmatpush3.bf16.msra.mxu1 %v7411_v57  ;;  %378 = vst [vmem:[#allocation2 + $0x3c] sm:$0x1] %v7591_v60  ;;  %379 = vst [vmem:[#allocation2 + $0x48] sm:$0x1] %v7591_v60 }
  0x1d   : > { %v454_v54 = vpack.c.bf16 %v438_v53, %v437_v52  ;;  %380 = vst [vmem:[#allocation2 + $0x54] sm:$0x1] %v7591_v60  ;;  %381 = vst [vmem:[#allocation2 + $0x60] sm:$0x1] %v7591_v60  ;;  %6793 = vmatprep.subr.bf16.mxu1 %v7413_v59  ;;  %v7416_v63 = vld [vmem:[%s9213_s4 + $0x70] sm:$0xff]   ;;  %v7418_v7 = vld [vmem:[%s9213_s4 + $0x78] sm:$0xff]  }
  0x1e   : > { %6614 = vmatmul.mubr.msk.bf16.gmra.mrb[4].mxu0 %vm471_vm0, %v442_v19  ;;  %382 = vst [vmem:[#allocation2 + $0x6c] sm:$0x1] %v7591_v60  ;;  %383 = vst [vmem:[#allocation2 + $0x78] sm:$0x1] %v7591_v60  ;;  %v1067_v0 = vld [vmem:[#allocation2 + $0x4] sm:$0xf] }
  0x1f   : > { %6617 = vmatprep.mubr.msk.bf16.mxu0 %vm471_vm0, %v443_v20  ;;  %6646 = vmatpush3.bf16.msra.mxu0 %v7408_v23  ;;  %384 = vst [vmem:[#allocation2 + $0x84] sm:$0x1] %v7591_v60  ;;  %385 = vst [vmem:[#allocation2 + $0x90] sm:$0x1] %v7591_v60  ;;  %v7417_v1 = vld [vmem:[%s9213_s4 + $0xf0] sm:$0xff]   ;;  %v1199_v2 = vrot.slane %v1067_v0, 5 }
  0x20   : > { %6647 = vmatprep.subr.bf16.mxu0 %v7410_v56  ;;  %386 = vst [vmem:[#allocation2 + $0x9c] sm:$0x1] %v7591_v60  ;;  %387 = vst [vmem:[#allocation2 + $0xa8] sm:$0x1] %v7591_v60  ;;  %6794 = vmatpush3.bf16.msra.mxu1 %v7413_v59  ;;  %v1069_v3 = vld [vmem:[#allocation2 + $0x10] sm:$0xf] }
  0x21   : > { %388 = vst [vmem:[#allocation2 + $0xb4] sm:$0x1] %v7591_v60  ;;  %389 = vst [vmem:[#allocation2 + $0xc0] sm:$0x1] %v7591_v60  ;;  %6795 = vmatprep.subr.bf16.mxu1 %v7415_v62  ;;  %v1114_v4 = vld [vmem:[#allocation2] sm:$0xe] }
  0x22   : > { %390 = vst [vmem:[#allocation2 + $0xcc] sm:$0x1] %v7591_v60  ;;  %391 = vst [vmem:[#allocation2 + $0x20] sm:$0x2] %v7591_v60  ;;  %v1115_v5 = vld [vmem:[#allocation2 + $0x8] sm:$0x1] }
  0x23   : > { %6648 = vmatpush3.bf16.msra.mxu0 %v7410_v56  ;;  %392 = vst [vmem:[#allocation2 + $0x2c] sm:$0x2] %v7591_v60  ;;  %393 = vst [vmem:[#allocation2 + $0x38] sm:$0x2] %v7591_v60  ;;  %v1206_v6 = vrot.slane %v1069_v3, 5  ;;  %v5859_v8 = vrot.slane %v1114_v4, 9 }
  0x24   : > { %6649 = vmatprep.subr.bf16.mxu0 %v7412_v58  ;;  %394 = vst [vmem:[#allocation2 + $0x44] sm:$0x2] %v7591_v60  ;;  %395 = vst [vmem:[#allocation2 + $0x50] sm:$0x2] %v7591_v60  ;;  %6796 = vmatpush3.bf16.msra.mxu1 %v7415_v62  ;;  %v1201_v9 = vrot.slane %v1199_v2, 4  ;;  %v1202_v11 = vrot.slane %v1115_v5, 5 }
  0x25   : > { %396 = vst [vmem:[#allocation2 + $0x5c] sm:$0x2] %v7591_v60  ;;  %397 = vst [vmem:[#allocation2 + $0x68] sm:$0x2] %v7591_v60  ;;  %6797 = vmatprep.subr.bf16.mxu1 %v7417_v1  ;;  %v1116_v12 = vld [vmem:[#allocation2 + $0xc] sm:$0xe] }
  0x26   : > { %6618 = vmatmul.mubr.msk.bf16.gmra.mrb[8].mxu0 %vm471_vm0, %v444_v26  ;;  %398 = vst [vmem:[#allocation2 + $0x74] sm:$0x2] %v7591_v60  ;;  %399 = vst [vmem:[#allocation2 + $0x80] sm:$0x2] %v7591_v60  ;;  %v1117_v13 = vld [vmem:[#allocation2 + $0x14] sm:$0x1] }
  0x27   : > { %6621 = vmatprep.mubr.msk.bf16.mxu0 %vm471_vm0, %v445_v27  ;;  %400 = vst [vmem:[#allocation2 + $0x8c] sm:$0x2] %v7591_v60  ;;  %401 = vst [vmem:[#allocation2 + $0x98] sm:$0x2] %v7591_v60  ;;  %6650 = vmatpush3.bf16.msra.mxu0 %v7412_v58  ;;  %v1208_v14 = vrot.slane %v1206_v6, 4  ;;  %v7419_v15 = vld [vmem:[%s9213_s4 + $0xf8] sm:$0xff]  }
  0x28   : > { %402 = vst [vmem:[#allocation2 + $0xa4] sm:$0x2] %v7591_v60  ;;  %403 = vst [vmem:[#allocation2 + $0xb0] sm:$0x2] %v7591_v60  ;;  %6651 = vmatprep.subr.bf16.mxu0 %v7414_v61  ;;  %6798 = vmatpush3.bf16.msra.mxu1 %v7417_v1  ;;  %v5860_v17 = vrot.slane %v1116_v12, 9  ;;  %v1209_v18 = vrot.slane %v1117_v13, 5 }
  0x29   : > { %404 = vst [vmem:[#allocation2 + $0xbc] sm:$0x2] %v7591_v60  ;;  %405 = vst [vmem:[#allocation2 + $0xc8] sm:$0x2] %v7591_v60  ;;  %6799 = vmatprep.subr.bf16.mxu1 %v7419_v15  ;;  %v7782_v24 = vld [vmem:[%s9213_s4 + $0x100] sm:$0xff]   ;;  %v7436_v26 = vld [vmem:[%s9213_s4 + $0x8] sm:$0xff]  }
  0x2a   : > { %406 = vst [vmem:[#allocation2 + $0xd4] sm:$0x2] %v7591_v60  ;;  %vm7764_vm3 = vmor %vm1194_vm1, %vm1195_vm2  ;;  %v7432_v25 = vld [vmem:[%s9213_s4] sm:$0xff]   ;;  %v7437_v27 = vld [vmem:[%s9213_s4 + $0x10] sm:$0xff]  }
  0x2b   : > { %6652 = vmatpush3.bf16.msra.mxu0 %v7414_v61  ;;  %v1200_v16 = vsel %vm7764_vm3, %v5859_v8, %v1199_v2  ;;  %v1203_v19 = vsel %vm7764_vm3, %v1201_v9, %v1202_v11  ;;  %v1207_v21 = vsel %vm7764_vm3, %v5860_v17, %v1206_v6  ;;  %v1210_v22 = vsel %vm7764_vm3, %v1208_v14, %v1209_v18  ;;  %v7441_v28 = vld [vmem:[%s9213_s4 + $0x18] sm:$0xff]   ;;  %v7442_v29 = vld [vmem:[%s9213_s4 + $0x20] sm:$0xff]   ;;  %v7446_v30 = vld [vmem:[%s9213_s4 + $0x28] sm:$0xff]  }
  0x2c   : > { %6653 = vmatprep.subr.bf16.mxu0 %v7416_v63  ;;  %v5891_v20 = vcombine.low %v1200_v16, %v1203_v19  ;;  %6800 = vmatpush3.bf16.msra.mxu1 %v7419_v15  ;;  %v5892_v23 = vcombine.low %v1207_v21, %v1210_v22  ;;  %v7447_v31 = vld [vmem:[%s9213_s4 + $0x30] sm:$0xff]   ;;  %v7817_v35 = vld [vmem:[%s9212_s3] ss:$0 sm:$0xff]  ;;  %vm7831_vm6 = vmor %vm887_vm4, %vm888_vm5 }
  0x2d   : > { %6833 = vmatprep.subr.bf16.mxu1 %v7782_v24  ;;  %v7466_v49 = vld [vmem:[%s9213_s4 + $0x80] sm:$0xff]   ;;  %vm8253_vm9 = vmor %vm1952_vm7, %vm1953_vm8 }
  0x2e   : > { %6622 = vmatmul.mubr.msk.bf16.gmra.mrb[12].mxu0 %vm471_vm0, %v446_v32  ;;  %v7451_v32 = vld [vmem:[%s9213_s4 + $0x38] sm:$0xff]  }
  0x2f   : > { %6625 = vmatprep.mubr.msk.bf16.mxu0 %vm471_vm0, %v447_v33  ;;  %6654 = vmatpush3.bf16.msra.mxu0 %v7416_v63  ;;  %v7812_v33 = vld [vmem:[%s9211_s2] ss:$0 sm:$0xff] }
  0x30   : > { %6655 = vmatprep.subr.bf16.mxu0 %v7418_v7 }
  0x33   : > { %6656 = vmatpush3.bf16.msra.mxu0 %v7418_v7 }
  0x34   : > { %6689 = vmatprep.subr.bf16.mxu0 %v7432_v25 }
  0x36   : > { %6626 = vmatmul.mubr.msk.bf16.gmra.mrb[16].mxu0 %vm471_vm0, %v448_v38 }
  0x37   : > { %6629 = vmatprep.mubr.msk.bf16.mxu0 %vm471_vm0, %v449_v39 }
  0x3e   : > { %6630 = vmatmul.mubr.msk.bf16.gmra.mrb[20].mxu0 %vm471_vm0, %v450_v44 }
  0x3f   : > { %6633 = vmatprep.mubr.msk.bf16.mxu0 %vm471_vm0, %v451_v45 }
  0x46   : > { %6634 = vmatmul.mubr.msk.bf16.gmra.mrb[24].mxu0 %vm471_vm0, %v452_v50 }
  0x47   : > { %6637 = vmatprep.mubr.msk.bf16.mxu0 %vm471_vm0, %v453_v51 }
  0x4e   : > { %6638 = vmatmul.mubr.msk.bf16.gmra.mrb[28].mxu0 %vm471_vm0, %v454_v54 }
  0x4f   : > { %6657 = vmatprep.mubr.bf16.mxu0 %v5891_v20 }
  0x56   : > { %6658 = vmatmul.mubr.bf16.vlgmr.msra.gmra.mrb[32].mxu0 %v5892_v23 }
  0x57   : > { %6690 = vmatpush3.bf16.msra.mxu0 %v7432_v25 }
  0x58   : > { %6691 = vmatprep.subr.bf16.mxu0 %v7436_v26 }
  0x5b   : > { %6692 = vmatpush3.bf16.msra.mxu0 %v7436_v26 }
  0x5c   : > { %6693 = vmatprep.subr.bf16.mxu0 %v7437_v27 }
  0x5f   : > { %6694 = vmatpush3.bf16.msra.mxu0 %v7437_v27 }
  0x60   : > { %6695 = vmatprep.subr.bf16.mxu0 %v7441_v28 }
  0x63   : > { %6696 = vmatpush3.bf16.msra.mxu0 %v7441_v28 }
  0x64   : > { %6697 = vmatprep.subr.bf16.mxu0 %v7442_v29 }
  0x67   : > { %6698 = vmatpush3.bf16.msra.mxu0 %v7442_v29 }
  0x68   : > { %6699 = vmatprep.subr.bf16.mxu0 %v7446_v30 }
  0x6b   : > { %6700 = vmatpush3.bf16.msra.mxu0 %v7446_v30 }
  0x6c   : > { %6701 = vmatprep.subr.bf16.mxu0 %v7447_v31 }
  0x6f   : > { %6702 = vmatpush3.bf16.msra.mxu0 %v7447_v31 }
  0x70   : > { %6703 = vmatprep.subr.bf16.mxu0 %v7451_v32 }
  0x73   : > { %6704 = vmatpush3.bf16.msra.mxu0 %v7451_v32 }
  0x74   : > { %6737 = vmatprep.subr.bf16.mxu0 %v7466_v49  ;;  %v7424_v49 = vld [vmem:[%s9213_s4 + $0x108] sm:$0xff]  }
  0xe9   : > { %v6611_v34 = vpop.f32.mrb[0].mxu0 }
  0xea   : > { %v690_v36 = vmul.f32 %v6611_v34, %v7812_v33  ;;  %v554_v37 = vpop.f32.mrb[1].mxu0 }
  0xeb   : > { %v688_v38 = vmul.f32 %v7812_v33, %v554_v37  ;;  %v6612_v39 = vpop.f32.mrb[2].mxu0 }
  0xec   : > { %v729_v40 = vadd.f32 %v7817_v35, %v690_v36  ;;  %v691_v41 = vmul.f32 %v6612_v39, %v7812_v33  ;;  %v557_v42 = vpop.f32.mrb[3].mxu0 }
  0xed   : > { %v727_v43 = vadd.f32 %v7817_v35, %v688_v38  ;;  %v689_v44 = vmul.f32 %v7812_v33, %v557_v42 }
  0xee   : > { %v761_v45 = vmax.f32 %v729_v40, 0.0  ;;  %v730_v46 = vadd.f32 %v7817_v35, %v691_v41 }
  0xef   : > { %v759_v47 = vmax.f32 %v727_v43, 0.0  ;;  %v728_v48 = vadd.f32 %v7817_v35, %v689_v44 }
  0xf0   : > { %v6317_v50 = vpack.c.bf16 %v761_v45, %v761_v45  ;;  %v762_v51 = vmax.f32 %v730_v46, 0.0 }
  0xf1   : > { %v6315_v52 = vpack.c.bf16 %v759_v47, %v759_v47  ;;  %v760_v53 = vmax.f32 %v728_v48, 0.0  ;;  %v6615_v54 = vpop.f32.mrb[4].mxu0 }
  0xf2   : > { %v895_v55 = vrot.slane %v6317_v50, 7  ;;  %v6318_v56 = vpack.c.bf16 %v762_v51, %v762_v51  ;;  %v694_v57 = vmul.f32 %v6615_v54, %v7812_v33  ;;  %v570_v58 = vpop.f32.mrb[5].mxu0 }
  0xf3   : > { %v890_v59 = vrot.slane %v6315_v52, 7  ;;  %v6316_v61 = vpack.c.bf16 %v760_v53, %v760_v53  ;;  %v692_v62 = vmul.f32 %v7812_v33, %v570_v58  ;;  %v6616_v63 = vpop.f32.mrb[6].mxu0 }
  0xf4   : > { %v896_v0 = vrot.slane %v895_v55, 4  ;;  %1021 = vst [vmem:[#allocation2 + $0x24] sm:$0xe] %v895_v55  ;;  %v897_v1 = vrot.slane %v6318_v56, 7  ;;  %v733_v2 = vadd.f32 %v7817_v35, %v694_v57  ;;  %v695_v3 = vmul.f32 %v6616_v63, %v7812_v33  ;;  %v573_v4 = vpop.f32.mrb[7].mxu0 }
  0xf5   : > { %v891_v5 = vrot.slane %v890_v59, 4  ;;  %1018 = vst [vmem:[#allocation2 + $0x18] sm:$0xe] %v890_v59  ;;  %v892_v6 = vrot.slane %v6316_v61, 7  ;;  %v731_v7 = vadd.f32 %v7817_v35, %v692_v62  ;;  %v693_v8 = vmul.f32 %v7812_v33, %v573_v4 }
  0xf6   : > { %v898_v9 = vsel %vm7831_vm6, %v896_v0, %v897_v1  ;;  %v899_v11 = vrot.slane %v897_v1, 4  ;;  %v765_v12 = vmax.f32 %v733_v2, 0.0  ;;  %v734_v13 = vadd.f32 %v7817_v35, %v695_v3 }
  0xf7   : > { %1022 = vst [vmem:[#allocation2 + $0x28] sm:$0xf] %v898_v9  ;;  %v893_v14 = vsel %vm7831_vm6, %v891_v5, %v892_v6  ;;  %v894_v15 = vrot.slane %v892_v6, 4  ;;  %v763_v16 = vmax.f32 %v731_v7, 0.0  ;;  %v732_v17 = vadd.f32 %v7817_v35, %v693_v8 }
  0xf8   : > { %1023 = vst [vmem:[#allocation2 + $0x2c] sm:$0x1] %v899_v11  ;;  %1019 = vst [vmem:[#allocation2 + $0x1c] sm:$0xf] %v893_v14  ;;  %v6321_v18 = vpack.c.bf16 %v765_v12, %v765_v12  ;;  %v766_v19 = vmax.f32 %v734_v13, 0.0 }
  0xf9   : > { %1020 = vst [vmem:[#allocation2 + $0x20] sm:$0x1] %v894_v15  ;;  %v6319_v20 = vpack.c.bf16 %v763_v16, %v763_v16  ;;  %v764_v21 = vmax.f32 %v732_v17, 0.0  ;;  %v6619_v22 = vpop.f32.mrb[8].mxu0 }
  0xfa   : > { %v905_v23 = vrot.slane %v6321_v18, 7  ;;  %v6322_v25 = vpack.c.bf16 %v766_v19, %v766_v19  ;;  %v698_v26 = vmul.f32 %v6619_v22, %v7812_v33  ;;  %v586_v27 = vpop.f32.mrb[9].mxu0  ;;  %v7427_v19 = vld [vmem:[%s9213_s4 + $0x110] sm:$0xff]  }
  0xfb   : > { %v900_v28 = vrot.slane %v6319_v20, 7  ;;  %v6320_v29 = vpack.c.bf16 %v764_v21, %v764_v21  ;;  %v696_v30 = vmul.f32 %v7812_v33, %v586_v27  ;;  %v6620_v31 = vpop.f32.mrb[10].mxu0  ;;  %v7855_v48 = vld [vmem:[#allocation2 + $0x24] sm:$0xe] }
  0xfc   : > { %v906_v32 = vrot.slane %v905_v23, 4  ;;  %1027 = vst [vmem:[#allocation2 + $0x3c] sm:$0xe] %v905_v23  ;;  %v907_v34 = vrot.slane %v6322_v25, 7  ;;  %v737_v36 = vadd.f32 %v7817_v35, %v698_v26  ;;  %v699_v37 = vmul.f32 %v6620_v31, %v7812_v33  ;;  %v589_v38 = vpop.f32.mrb[11].mxu0 }
  0xfd   : > { %v901_v39 = vrot.slane %v900_v28, 4  ;;  %1024 = vst [vmem:[#allocation2 + $0x30] sm:$0xe] %v900_v28  ;;  %v902_v40 = vrot.slane %v6320_v29, 7  ;;  %v735_v41 = vadd.f32 %v7817_v35, %v696_v30  ;;  %v697_v42 = vmul.f32 %v7812_v33, %v589_v38  ;;  %v1118_v43 = vld [vmem:[#allocation2 + $0x18] sm:$0xe] }
  0xfe   : > { %v908_v44 = vsel %vm7831_vm6, %v906_v32, %v907_v34  ;;  %v909_v45 = vrot.slane %v907_v34, 4  ;;  %v769_v46 = vmax.f32 %v737_v36, 0.0  ;;  %v738_v47 = vadd.f32 %v7817_v35, %v699_v37  ;;  %v7422_v55 = vld [vmem:[#allocation2 + $0x24] sm:$0xff]  }
  0xff   : > { %1028 = vst [vmem:[#allocation2 + $0x40] sm:$0xf] %v908_v44  ;;  %v903_v50 = vsel %vm7831_vm6, %v901_v39, %v902_v40  ;;  %v904_v51 = vrot.slane %v902_v40, 4  ;;  %v767_v52 = vmax.f32 %v735_v41, 0.0  ;;  %v736_v53 = vadd.f32 %v7817_v35, %v697_v42  ;;  %v7420_v54 = vld [vmem:[#allocation2 + $0x18] sm:$0xff]  }
 0x100   : > { %1029 = vst [vmem:[#allocation2 + $0x44] sm:$0x1] %v909_v45  ;;  %1025 = vst [vmem:[#allocation2 + $0x34] sm:$0xf] %v903_v50  ;;  %v6325_v56 = vpack.c.bf16 %v769_v46, %v769_v46  ;;  %v770_v57 = vmax.f32 %v738_v47, 0.0  ;;  %v5861_v61 = vrot.slane %v1118_v43, 9  ;;  %6801 = vmatprep.mubr.bf16.mxu1 %v7420_v54 }
 0x101   : > { %v7863_v58 = vld [vmem:[#allocation2 + $0x1c] sm:$0xf]  ;;  %v7865_v59 = vld [vmem:[#allocation2 + $0x20] sm:$0x1]  ;;  %1026 = vst [vmem:[#allocation2 + $0x38] sm:$0x1] %v904_v51  ;;  %v6323_v62 = vpack.c.bf16 %v767_v52, %v767_v52  ;;  %6802 = vmatmul.mubr.bf16.vlgmr.msra.gmra.mrb[0].mxu1 %v7422_v55 }
 0x102   : > { %v768_v63 = vmax.f32 %v736_v53, 0.0  ;;  %v6623_v0 = vpop.f32.mrb[12].mxu0  ;;  %v1213_v1 = vrot.slane %v7863_v58, 5  ;;  %v1216_v2 = vrot.slane %v7865_v59, 5  ;;  %v915_v3 = vrot.slane %v6325_v56, 7  ;;  %6834 = vmatpush3.bf16.msra.mxu1 %v7782_v24  ;;  %v7430_v43 = vld [vmem:[%s9213_s4 + $0x118] sm:$0xff]  }
 0x103   : > { %v6326_v4 = vpack.c.bf16 %v770_v57, %v770_v57  ;;  %v702_v5 = vmul.f32 %v6623_v0, %v7812_v33  ;;  %v602_v6 = vpop.f32.mrb[13].mxu0  ;;  %v5862_v7 = vrot.slane %v7855_v48, 9  ;;  %v910_v8 = vrot.slane %v6323_v62, 7  ;;  %6835 = vmatprep.subr.bf16.mxu1 %v7424_v49  ;;  %v7884_v23 = vld [vmem:[#allocation2 + $0x28] sm:$0xf] }
 0x104   : > { %v6324_v9 = vpack.c.bf16 %v768_v63, %v768_v63  ;;  %v700_v11 = vmul.f32 %v7812_v33, %v602_v6  ;;  %v6624_v12 = vpop.f32.mrb[14].mxu0  ;;  %v7875_v13 = vsel %vm7764_vm3, %v5861_v61, %v1213_v1  ;;  %v916_v14 = vrot.slane %v915_v3, 4  ;;  %1033 = vst [vmem:[#allocation2 + $0x54] sm:$0xe] %v915_v3  ;;  %v1121_v25 = vld [vmem:[#allocation2 + $0x2c] sm:$0x1] }
 0x105   : > { %v917_v15 = vrot.slane %v6326_v4, 7  ;;  %v741_v16 = vadd.f32 %v7817_v35, %v702_v5  ;;  %v703_v17 = vmul.f32 %v6624_v12, %v7812_v33  ;;  %v605_v18 = vpop.f32.mrb[15].mxu0  ;;  %v911_v20 = vrot.slane %v910_v8, 4  ;;  %1030 = vst [vmem:[#allocation2 + $0x48] sm:$0xe] %v910_v8  ;;  %v7434_v3 = vld [vmem:[%s9213_s4 + $0x120] sm:$0xff]  }
 0x106   : > { %v912_v24 = vrot.slane %v6324_v9, 7  ;;  %v739_v21 = vadd.f32 %v7817_v35, %v700_v11  ;;  %v701_v22 = vmul.f32 %v7812_v33, %v605_v18  ;;  %v7889_v30 = vld [vmem:[#allocation2 + $0x30] sm:$0xe]  ;;  %6836 = vmatpush3.bf16.msra.mxu1 %v7424_v49  ;;  %v1215_v40 = vrot.slane %v1213_v1, 4  ;;  %v7425_v42 = vld [vmem:[#allocation2 + $0x3c] sm:$0xff]  }
 0x107   : > { %v918_v26 = vsel %vm7831_vm6, %v916_v14, %v917_v15  ;;  %v919_v27 = vrot.slane %v917_v15, 4  ;;  %v773_v28 = vmax.f32 %v741_v16, 0.0  ;;  %v742_v29 = vadd.f32 %v7817_v35, %v703_v17  ;;  %v7423_v37 = vld [vmem:[#allocation2 + $0x30] sm:$0xff]   ;;  %6837 = vmatprep.subr.bf16.mxu1 %v7427_v19  ;;  %v7917_v15 = vld [vmem:[#allocation2 + $0x40] sm:$0xf] }
 0x108   : > { %1034 = vst [vmem:[#allocation2 + $0x58] sm:$0xf] %v918_v26  ;;  %v913_v31 = vsel %vm7831_vm6, %v911_v20, %v912_v24  ;;  %v914_v32 = vrot.slane %v912_v24, 4  ;;  %v771_v34 = vmax.f32 %v739_v21, 0.0  ;;  %v740_v36 = vadd.f32 %v7817_v35, %v701_v22  ;;  %6805 = vmatprep.mubr.bf16.mxu1 %v7423_v37  ;;  %v7912_v8 = vld [vmem:[#allocation2 + $0x34] sm:$0xf] }
 0x109   : > { %1035 = vst [vmem:[#allocation2 + $0x5c] sm:$0x1] %v919_v27  ;;  %1031 = vst [vmem:[#allocation2 + $0x4c] sm:$0xf] %v913_v31  ;;  %v6329_v38 = vpack.c.bf16 %v773_v28, %v773_v28  ;;  %v774_v39 = vmax.f32 %v742_v29, 0.0  ;;  %v1220_v41 = vrot.slane %v7884_v23, 5  ;;  %v1217_v51 = vsel %vm7764_vm3, %v1215_v40, %v1216_v2  ;;  %6806 = vmatmul.mubr.bf16.gmra.mrb[4].mxu1 %v7425_v42 }
 0x10a   : > { %1032 = vst [vmem:[#allocation2 + $0x50] sm:$0x1] %v914_v32  ;;  %v6327_v44 = vpack.c.bf16 %v771_v34, %v771_v34  ;;  %v772_v45 = vmax.f32 %v740_v36, 0.0  ;;  %v1223_v46 = vrot.slane %v1121_v25, 5  ;;  %v6627_v47 = vpop.f32.mrb[16].mxu0  ;;  %v5863_v48 = vrot.slane %v7889_v30, 9  ;;  %6838 = vmatpush3.bf16.msra.mxu1 %v7427_v19 }
 0x10b   : > { %v925_v49 = vrot.slane %v6329_v38, 7  ;;  %v6330_v50 = vpack.c.bf16 %v774_v39, %v774_v39  ;;  %v1221_v52 = vsel %vm7764_vm3, %v5862_v7, %v1220_v41  ;;  %v618_v53 = vpop.f32.mrb[17].mxu0  ;;  %v5893_v56 = vcombine.low %v7875_v13, %v1217_v51  ;;  %v1124_v2 = vld [vmem:[#allocation2 + $0x3c] sm:$0xe]  ;;  %6839 = vmatprep.subr.bf16.mxu1 %v7430_v43  ;;  %v1123_v9 = vld [vmem:[#allocation2 + $0x38] sm:$0x1] }
 0x10c   : > { %v920_v54 = vrot.slane %v6327_v44, 7  ;;  %v6328_v55 = vpack.c.bf16 %v772_v45, %v772_v45  ;;  %v1222_v57 = vrot.slane %v1220_v41, 4  ;;  %v6628_v59 = vpop.f32.mrb[18].mxu0  ;;  %v706_v63 = vmul.f32 %v6627_v47, %v7812_v33  ;;  %v7439_v24 = vld [vmem:[%s9213_s4 + $0x128] sm:$0xff]   ;;  %v1125_v27 = vld [vmem:[#allocation2 + $0x44] sm:$0x1] }
 0x10d   : > { %v926_v61 = vrot.slane %v925_v49, 4  ;;  %1039 = vst [vmem:[#allocation2 + $0x6c] sm:$0xe] %v925_v49  ;;  %v927_v62 = vrot.slane %v6330_v50, 7  ;;  %v704_v0 = vmul.f32 %v7812_v33, %v618_v53  ;;  %v621_v1 = vpop.f32.mrb[19].mxu0  ;;  %6661 = vmatprep.mubr.bf16.mxu0 %v5893_v56  ;;  %v707_v7 = vmul.f32 %v6628_v59, %v7812_v33  ;;  %v7444_v47 = vld [vmem:[%s9213_s4 + $0x130] sm:$0xff]  }
 0x10e   : > { %v921_v4 = vrot.slane %v920_v54, 4  ;;  %1036 = vst [vmem:[#allocation2 + $0x60] sm:$0xe] %v920_v54  ;;  %v922_v5 = vrot.slane %v6328_v55, 7  ;;  %v1224_v6 = vsel %vm7764_vm3, %v1222_v57, %v1223_v46  ;;  %v745_v14 = vadd.f32 %v7817_v35, %v706_v63  ;;  %6840 = vmatpush3.bf16.msra.mxu1 %v7430_v43  ;;  %v1126_v56 = vld [vmem:[#allocation2 + $0x48] sm:$0xe] }
 0x10f   : > { %v928_v11 = vsel %vm7831_vm6, %v926_v61, %v927_v62  ;;  %v929_v12 = vrot.slane %v927_v62, 4  ;;  %v5894_v13 = vcombine.low %v1221_v52, %v1224_v6  ;;  %v743_v18 = vadd.f32 %v7817_v35, %v704_v0  ;;  %v7428_v28 = vld [vmem:[#allocation2 + $0x54] sm:$0xff]   ;;  %6841 = vmatprep.subr.bf16.mxu1 %v7434_v3 }
 0x110   : > { %1040 = vst [vmem:[#allocation2 + $0x70] sm:$0xf] %v928_v11  ;;  %v923_v16 = vsel %vm7831_vm6, %v921_v4, %v922_v5  ;;  %v924_v17 = vrot.slane %v922_v5, 4  ;;  %v746_v19 = vadd.f32 %v7817_v35, %v707_v7  ;;  %v7426_v20 = vld [vmem:[#allocation2 + $0x48] sm:$0xff]   ;;  %v777_v21 = vmax.f32 %v745_v14, 0.0  ;;  %v7449_v5 = vld [vmem:[%s9213_s4 + $0x138] sm:$0xff]  }
 0x111   : > { %1041 = vst [vmem:[#allocation2 + $0x74] sm:$0x1] %v929_v12  ;;  %1037 = vst [vmem:[#allocation2 + $0x64] sm:$0xf] %v923_v16  ;;  %6662 = vmatmul.mubr.bf16.gmra.mrb[36].mxu0 %v5894_v13  ;;  %v705_v22 = vmul.f32 %v7812_v33, %v621_v1  ;;  %v1227_v25 = vrot.slane %v7912_v8, 5  ;;  %v1230_v26 = vrot.slane %v1123_v9, 5  ;;  %6809 = vmatprep.mubr.bf16.mxu1 %v7426_v20 }
 0x112   : > { %1038 = vst [vmem:[#allocation2 + $0x68] sm:$0x1] %v924_v17  ;;  %v775_v29 = vmax.f32 %v743_v18, 0.0  ;;  %v778_v31 = vmax.f32 %v746_v19, 0.0  ;;  %v5864_v32 = vrot.slane %v1124_v2, 9  ;;  %v1234_v34 = vrot.slane %v7917_v15, 5  ;;  %6810 = vmatmul.mubr.bf16.gmra.mrb[8].mxu1 %v7428_v28 }
 0x113   : > { %v6631_v36 = vpop.f32.mrb[20].mxu0  ;;  %v6333_v37 = vpack.c.bf16 %v777_v21, %v777_v21  ;;  %v744_v38 = vadd.f32 %v7817_v35, %v705_v22  ;;  %v1228_v39 = vsel %vm7764_vm3, %v5863_v48, %v1227_v25  ;;  %v1229_v40 = vrot.slane %v1227_v25, 4  ;;  %6842 = vmatpush3.bf16.msra.mxu1 %v7434_v3  ;;  %v7945_v63 = vld [vmem:[#allocation2 + $0x4c] sm:$0xf]  ;;  %v7955_v12 = vld [vmem:[#allocation2 + $0x58] sm:$0xf] }
 0x114   : > { %v634_v41 = vpop.f32.mrb[21].mxu0  ;;  %v6331_v42 = vpack.c.bf16 %v775_v29, %v775_v29  ;;  %v6334_v43 = vpack.c.bf16 %v778_v31, %v778_v31  ;;  %v1235_v44 = vsel %vm7764_vm3, %v5864_v32, %v1234_v34  ;;  %v1236_v45 = vrot.slane %v1234_v34, 4  ;;  %6843 = vmatprep.subr.bf16.mxu1 %v7439_v24  ;;  %v1128_v13 = vld [vmem:[#allocation2 + $0x54] sm:$0xe]  ;;  %v1127_v18 = vld [vmem:[#allocation2 + $0x50] sm:$0x1] }
 0x115   : > { %v6632_v46 = vpop.f32.mrb[22].mxu0  ;;  %v935_v49 = vrot.slane %v6333_v37, 7  ;;  %v776_v30 = vmax.f32 %v744_v38, 0.0  ;;  %v1231_v48 = vsel %vm7764_vm3, %v1229_v40, %v1230_v26  ;;  %v1237_v50 = vrot.slane %v1125_v27, 5  ;;  %v1129_v27 = vld [vmem:[#allocation2 + $0x5c] sm:$0x1] }
 0x116   : > { %v637_v51 = vpop.f32.mrb[23].mxu0  ;;  %v930_v52 = vrot.slane %v6331_v42, 7  ;;  %v937_v53 = vrot.slane %v6334_v43, 7  ;;  %v5895_v54 = vcombine.low %v1228_v39, %v1231_v48  ;;  %v710_v55 = vmul.f32 %v6631_v36, %v7812_v33  ;;  %v7968_v42 = vld [vmem:[%s9213_s4 + $0x140] sm:$0xff]  }
 0x117   : > { %v936_v57 = vrot.slane %v935_v49, 4  ;;  %1045 = vst [vmem:[#allocation2 + $0x84] sm:$0xe] %v935_v49  ;;  %v6332_v59 = vpack.c.bf16 %v776_v30, %v776_v30  ;;  %v1238_v61 = vsel %vm7764_vm3, %v1236_v45, %v1237_v50  ;;  %v708_v62 = vmul.f32 %v7812_v33, %v634_v41  ;;  %6844 = vmatpush3.bf16.msra.mxu1 %v7439_v24  ;;  %v7431_v14 = vld [vmem:[#allocation2 + $0x6c] sm:$0xff]  }
 0x118   : > { %v931_v0 = vrot.slane %v930_v52, 4  ;;  %1042 = vst [vmem:[#allocation2 + $0x78] sm:$0xe] %v930_v52  ;;  %v939_v1 = vrot.slane %v937_v53, 4  ;;  %6665 = vmatprep.mubr.bf16.mxu0 %v5895_v54  ;;  %v5896_v2 = vcombine.low %v1235_v44, %v1238_v61  ;;  %v749_v3 = vadd.f32 %v7817_v35, %v710_v55  ;;  %v7429_v4 = vld [vmem:[#allocation2 + $0x60] sm:$0xff]   ;;  %6845 = vmatprep.subr.bf16.mxu1 %v7444_v47 }
 0x119   : > { %v938_v6 = vsel %vm7831_vm6, %v936_v57, %v937_v53  ;;  %v932_v7 = vrot.slane %v6332_v59, 7  ;;  %v747_v9 = vadd.f32 %v7817_v35, %v708_v62  ;;  %v711_v11 = vmul.f32 %v6632_v46, %v7812_v33  ;;  %v6635_v24 = vpop.f32.mrb[24].mxu0  ;;  %6813 = vmatprep.mubr.bf16.mxu1 %v7429_v4  ;;  %v1130_v54 = vld [vmem:[#allocation2 + $0x60] sm:$0xe]  ;;  %v1132_v61 = vld [vmem:[#allocation2 + $0x6c] sm:$0xe] }
 0x11a   : > { %1046 = vst [vmem:[#allocation2 + $0x88] sm:$0xf] %v938_v6  ;;  %1047 = vst [vmem:[#allocation2 + $0x8c] sm:$0x1] %v939_v1  ;;  %6666 = vmatmul.mubr.bf16.gmra.mrb[40].mxu0 %v5896_v2  ;;  %v781_v16 = vmax.f32 %v749_v3, 0.0  ;;  %v709_v17 = vmul.f32 %v7812_v33, %v637_v51  ;;  %v5865_v19 = vrot.slane %v1126_v56, 9  ;;  %6814 = vmatmul.mubr.bf16.gmra.mrb[12].mxu1 %v7431_v14 }
 0x11b   : > { %v1241_v20 = vrot.slane %v7945_v63, 5  ;;  %v933_v21 = vsel %vm7831_vm6, %v931_v0, %v932_v7  ;;  %v934_v22 = vrot.slane %v932_v7, 4  ;;  %v779_v25 = vmax.f32 %v747_v9, 0.0  ;;  %v650_v28 = vpop.f32.mrb[25].mxu0  ;;  %6846 = vmatpush3.bf16.msra.mxu1 %v7444_v47  ;;  %v7981_v3 = vld [vmem:[#allocation2 + $0x64] sm:$0xf] }
 0x11c   : > { %v750_v26 = vadd.f32 %v7817_v35, %v711_v11  ;;  %1043 = vst [vmem:[#allocation2 + $0x7c] sm:$0xf] %v933_v21  ;;  %v6337_v29 = vpack.c.bf16 %v781_v16, %v781_v16  ;;  %v748_v31 = vadd.f32 %v7817_v35, %v709_v17  ;;  %v6636_v36 = vpop.f32.mrb[26].mxu0  ;;  %v1244_v39 = vrot.slane %v1127_v18, 5  ;;  %6847 = vmatprep.subr.bf16.mxu1 %v7449_v5  ;;  %v1131_v4 = vld [vmem:[#allocation2 + $0x68] sm:$0x1] }
 0x11d   : > { %v1242_v32 = vsel %vm7764_vm3, %v5865_v19, %v1241_v20  ;;  %v1243_v34 = vrot.slane %v1241_v20, 4  ;;  %1044 = vst [vmem:[#allocation2 + $0x80] sm:$0x1] %v934_v22  ;;  %v6335_v37 = vpack.c.bf16 %v779_v25, %v779_v25  ;;  %v5866_v40 = vrot.slane %v1128_v13, 9  ;;  %v653_v41 = vpop.f32.mrb[27].mxu0 }
 0x11e   : > { %v782_v38 = vmax.f32 %v750_v26, 0.0  ;;  %v945_v43 = vrot.slane %v6337_v29, 7  ;;  %v780_v44 = vmax.f32 %v748_v31, 0.0  ;;  %v1248_v45 = vrot.slane %v7955_v12, 5  ;;  %v7990_v20 = vld [vmem:[#allocation2 + $0x70] sm:$0xf] }
 0x11f   : > { %v1251_v46 = vrot.slane %v1129_v27, 5  ;;  %v940_v49 = vrot.slane %v6335_v37, 7  ;;  %v1245_v47 = vsel %vm7764_vm3, %v1243_v34, %v1244_v39  ;;  %v714_v48 = vmul.f32 %v6635_v24, %v7812_v33  ;;  %6848 = vmatpush3.bf16.msra.mxu1 %v7449_v5 }
 0x120   : > { %v6338_v30 = vpack.c.bf16 %v782_v38, %v782_v38  ;;  %v946_v50 = vrot.slane %v945_v43, 4  ;;  %1051 = vst [vmem:[#allocation2 + $0x9c] sm:$0xe] %v945_v43  ;;  %v6336_v51 = vpack.c.bf16 %v780_v44, %v780_v44  ;;  %v5897_v52 = vcombine.low %v1242_v32, %v1245_v47  ;;  %6881 = vmatprep.subr.bf16.mxu1 %v7968_v42 }
 0x121   : > { %v1249_v53 = vsel %vm7764_vm3, %v5866_v40, %v1248_v45  ;;  %v941_v55 = vrot.slane %v940_v49, 4  ;;  %1048 = vst [vmem:[#allocation2 + $0x90] sm:$0xe] %v940_v49  ;;  %v1250_v57 = vrot.slane %v1248_v45, 4  ;;  %v753_v59 = vadd.f32 %v7817_v35, %v714_v48  ;;  %v6639_v5 = vpop.f32.mrb[28].mxu0  ;;  %v7435_v21 = vld [vmem:[#allocation2 + $0x84] sm:$0xff]  }
 0x122   : > { %v947_v56 = vrot.slane %v6338_v30, 7  ;;  %v942_v62 = vrot.slane %v6336_v51, 7  ;;  %6669 = vmatprep.mubr.bf16.mxu0 %v5897_v52  ;;  %v712_v0 = vmul.f32 %v7812_v33, %v650_v28  ;;  %v715_v1 = vmul.f32 %v6636_v36, %v7812_v33  ;;  %v666_v13 = vpop.f32.mrb[29].mxu0  ;;  %v1133_v28 = vld [vmem:[#allocation2 + $0x74] sm:$0x1] }
 0x123   : > { %v713_v2 = vmul.f32 %v7812_v33, %v653_v41  ;;  %v1252_v9 = vsel %vm7764_vm3, %v1250_v57, %v1251_v46  ;;  %v785_v11 = vmax.f32 %v753_v59, 0.0  ;;  %v7433_v14 = vld [vmem:[#allocation2 + $0x78] sm:$0xff]   ;;  %v6640_v24 = vpop.f32.mrb[30].mxu0  ;;  %v5867_v27 = vrot.slane %v1130_v54, 9 }
 0x124   : > { %v948_v6 = vsel %vm7831_vm6, %v946_v50, %v947_v56  ;;  %v949_v7 = vrot.slane %v947_v56, 4  ;;  %v943_v16 = vsel %vm7831_vm6, %v941_v55, %v942_v62  ;;  %v944_v17 = vrot.slane %v942_v62, 4  ;;  %6817 = vmatprep.mubr.bf16.mxu1 %v7433_v14  ;;  %v669_v29 = vpop.f32.mrb[31].mxu0  ;;  %v8004_v59 = vld [vmem:[#allocation2 + $0x7c] sm:$0xf] }
 0x125   : > { %1052 = vst [vmem:[#allocation2 + $0xa0] sm:$0xf] %v948_v6  ;;  %v5898_v18 = vcombine.low %v1249_v53, %v1252_v9  ;;  %v751_v19 = vadd.f32 %v7817_v35, %v712_v0  ;;  %1049 = vst [vmem:[#allocation2 + $0x94] sm:$0xf] %v943_v16  ;;  %v6341_v22 = vpack.c.bf16 %v785_v11, %v785_v11  ;;  %v1255_v32 = vrot.slane %v7981_v3, 5 }
 0x126   : > { %1053 = vst [vmem:[#allocation2 + $0xa4] sm:$0x1] %v949_v7  ;;  %v754_v25 = vadd.f32 %v7817_v35, %v715_v1  ;;  %v752_v26 = vadd.f32 %v7817_v35, %v713_v2  ;;  %1050 = vst [vmem:[#allocation2 + $0x98] sm:$0x1] %v944_v17  ;;  %v1258_v34 = vrot.slane %v1131_v4, 5  ;;  %v5868_v36 = vrot.slane %v1132_v61, 9  ;;  %6818 = vmatmul.mubr.bf16.gmra.mrb[16].mxu1 %v7435_v21 }
 0x127   : > { %6670 = vmatmul.mubr.bf16.gmra.mrb[44].mxu0 %v5898_v18  ;;  %v783_v31 = vmax.f32 %v751_v19, 0.0  ;;  %v955_v37 = vrot.slane %v6341_v22, 7  ;;  %v1262_v40 = vrot.slane %v7990_v20, 5  ;;  %v1256_v43 = vsel %vm7764_vm3, %v5867_v27, %v1255_v32  ;;  %v1134_v53 = vld [vmem:[#allocation2 + $0x78] sm:$0xe] }
 0x128   : > { %v786_v38 = vmax.f32 %v754_v25, 0.0  ;;  %v784_v39 = vmax.f32 %v752_v26, 0.0  ;;  %v1257_v44 = vrot.slane %v1255_v32, 4  ;;  %v1265_v45 = vrot.slane %v1133_v28, 5  ;;  %v1135_v2 = vld [vmem:[#allocation2 + $0x80] sm:$0x1] }
 0x129   : > { %v6339_v41 = vpack.c.bf16 %v783_v31, %v783_v31  ;;  %v956_v46 = vrot.slane %v955_v37, 4  ;;  %1057 = vst [vmem:[#allocation2 + $0xb4] sm:$0xe] %v955_v37  ;;  %v1263_v47 = vsel %vm7764_vm3, %v5868_v36, %v1262_v40  ;;  %v1264_v51 = vrot.slane %v1262_v40, 4  ;;  %v1136_v11 = vld [vmem:[#allocation2 + $0x84] sm:$0xe] }
 0x12a   : > { %v6342_v49 = vpack.c.bf16 %v786_v38, %v786_v38  ;;  %v6340_v30 = vpack.c.bf16 %v784_v39, %v784_v39  ;;  %v1259_v50 = vsel %vm7764_vm3, %v1257_v44, %v1258_v34  ;;  %v718_v52 = vmul.f32 %v6639_v5, %v7812_v33  ;;  %v8016_v19 = vld [vmem:[#allocation2 + $0x88] sm:$0xf]  ;;  %v1137_v26 = vld [vmem:[#allocation2 + $0x8c] sm:$0x1] }
 0x12b   : > { %v950_v48 = vrot.slane %v6339_v41, 7  ;;  %v5899_v56 = vcombine.low %v1256_v43, %v1259_v50  ;;  %v716_v57 = vmul.f32 %v7812_v33, %v666_v13  ;;  %v1266_v62 = vsel %vm7764_vm3, %v1264_v51, %v1265_v45  ;;  %v1138_v43 = vld [vmem:[#allocation2 + $0x90] sm:$0xe] }
 0x12c   : > { %v957_v54 = vrot.slane %v6342_v49, 7  ;;  %v952_v55 = vrot.slane %v6340_v30, 7  ;;  %v757_v0 = vadd.f32 %v7817_v35, %v718_v52  ;;  %v719_v1 = vmul.f32 %v6640_v24, %v7812_v33  ;;  %v7438_v4 = vld [vmem:[#allocation2 + $0x90] sm:$0xff]   ;;  %v7440_v13 = vld [vmem:[#allocation2 + $0x9c] sm:$0xff]  }
 0x12d   : > { %v951_v61 = vrot.slane %v950_v48, 4  ;;  %1054 = vst [vmem:[#allocation2 + $0xa8] sm:$0xe] %v950_v48  ;;  %6673 = vmatprep.mubr.bf16.mxu0 %v5899_v56  ;;  %v5900_v9 = vcombine.low %v1263_v47, %v1266_v62  ;;  %v755_v17 = vadd.f32 %v7817_v35, %v716_v57  ;;  %6821 = vmatprep.mubr.bf16.mxu1 %v7438_v4  ;;  %v5869_v21 = vrot.slane %v1134_v53, 9  ;;  %v8024_v41 = vld [vmem:[#allocation2 + $0x94] sm:$0xf] }
 0x12e   : > { %v958_v5 = vsel %vm7831_vm6, %v956_v46, %v957_v54  ;;  %v959_v6 = vrot.slane %v957_v54, 4  ;;  %v954_v7 = vrot.slane %v952_v55, 4  ;;  %v789_v16 = vmax.f32 %v757_v0, 0.0  ;;  %6822 = vmatmul.mubr.bf16.gmra.mrb[20].mxu1 %v7440_v13  ;;  %v1139_v49 = vld [vmem:[#allocation2 + $0x98] sm:$0x1] }
 0x12f   : > { %1058 = vst [vmem:[#allocation2 + $0xb8] sm:$0xf] %v958_v5  ;;  %v953_v14 = vsel %vm7831_vm6, %v951_v61, %v952_v55  ;;  %v758_v18 = vadd.f32 %v7817_v35, %v719_v1  ;;  %6674 = vmatmul.mubr.bf16.gmra.mrb[48].mxu0 %v5900_v9  ;;  %v717_v24 = vmul.f32 %v7812_v33, %v669_v29  ;;  %v1269_v22 = vrot.slane %v8004_v59, 5  ;;  %v8030_v51 = vld [vmem:[#allocation2 + $0xa0] sm:$0xf] }
 0x130   : > { %1059 = vst [vmem:[#allocation2 + $0xbc] sm:$0x1] %v959_v6  ;;  %1055 = vst [vmem:[#allocation2 + $0xac] sm:$0xf] %v953_v14  ;;  %v1272_v25 = vrot.slane %v1135_v2, 5  ;;  %v6345_v27 = vpack.c.bf16 %v789_v16, %v789_v16  ;;  %v787_v28 = vmax.f32 %v755_v17, 0.0 }
 0x131   : > { %1056 = vst [vmem:[#allocation2 + $0xb0] sm:$0x1] %v954_v7  ;;  %v790_v31 = vmax.f32 %v758_v18, 0.0  ;;  %v5870_v32 = vrot.slane %v1136_v11, 9  ;;  %v756_v34 = vadd.f32 %v7817_v35, %v717_v24  ;;  %v1270_v36 = vsel %vm7764_vm3, %v5869_v21, %v1269_v22  ;;  %v1141_v56 = vld [vmem:[#allocation2 + $0xa4] sm:$0x1] }
 0x132   : > { %v1271_v37 = vrot.slane %v1269_v22, 4  ;;  %v1276_v38 = vrot.slane %v8016_v19, 5  ;;  %v965_v39 = vrot.slane %v6345_v27, 7  ;;  %v6343_v33 = vpack.c.bf16 %v787_v28, %v787_v28  ;;  %v1140_v1 = vld [vmem:[#allocation2 + $0x9c] sm:$0xe] }
 0x133   : > { %v6346_v29 = vpack.c.bf16 %v790_v31, %v790_v31  ;;  %v1279_v40 = vrot.slane %v1137_v26, 5  ;;  %v788_v44 = vmax.f32 %v756_v34, 0.0  ;;  %v5871_v54 = vrot.slane %v1138_v43, 9  ;;  %v8049_v26 = vld [vmem:[#allocation2 + $0x1c] sm:$0xf] }
 0x134   : > { %v1273_v45 = vsel %vm7764_vm3, %v1271_v37, %v1272_v25  ;;  %v1277_v35 = vsel %vm7764_vm3, %v5870_v32, %v1276_v38  ;;  %v1278_v46 = vrot.slane %v1276_v38, 4  ;;  %v966_v30 = vrot.slane %v965_v39, 4  ;;  %1063 = vst [vmem:[#allocation2 + $0xcc] sm:$0xe] %v965_v39  ;;  %v1142_v16 = vld [vmem:[#allocation2 + $0xa8] sm:$0xe] }
 0x135   : > { %v960_v47 = vrot.slane %v6343_v33, 7  ;;  %v967_v48 = vrot.slane %v6346_v29, 7  ;;  %v5901_v50 = vcombine.low %v1270_v36, %v1273_v45  ;;  %v6344_v52 = vpack.c.bf16 %v788_v44, %v788_v44  ;;  %v2777_v32 = vld [vmem:[#allocation2 + $0x20] sm:$0x1]  ;;  %v8055_v29 = vld [vmem:[#allocation2 + $0x28] sm:$0xf] }
 0x136   : > { %v1280_v53 = vsel %vm7764_vm3, %v1278_v46, %v1279_v40  ;;  %v1283_v55 = vrot.slane %v8024_v41, 5  ;;  %v1286_v6 = vrot.slane %v1139_v49, 5  ;;  %v7445_v7 = vld [vmem:[#allocation2 + $0xb4] sm:$0xff]   ;;  %v1290_v13 = vrot.slane %v8030_v51, 5 }
 0x137   : > { %v961_v57 = vrot.slane %v960_v47, 4  ;;  %1060 = vst [vmem:[#allocation2 + $0xc0] sm:$0xe] %v960_v47  ;;  %v968_v61 = vsel %vm7831_vm6, %v966_v30, %v967_v48  ;;  %v969_v62 = vrot.slane %v967_v48, 4  ;;  %6677 = vmatprep.mubr.bf16.mxu0 %v5901_v50  ;;  %v5902_v0 = vcombine.low %v1277_v35, %v1280_v53  ;;  %v7443_v2 = vld [vmem:[#allocation2 + $0xa8] sm:$0xff]  }
 0x138   : > { %1064 = vst [vmem:[#allocation2 + $0xd0] sm:$0xf] %v968_v61  ;;  %v962_v4 = vrot.slane %v6344_v52, 7  ;;  %v1285_v5 = vrot.slane %v1283_v55, 4  ;;  %v8037_v9 = vld [vmem:[#allocation2 + $0xac] sm:$0xf]  ;;  %v1284_v11 = vsel %vm7764_vm3, %v5871_v54, %v1283_v55  ;;  %6825 = vmatprep.mubr.bf16.mxu1 %v7443_v2 }
 0x139   : > { %1065 = vst [vmem:[#allocation2 + $0xd4] sm:$0x1] %v969_v62  ;;  %6678 = vmatmul.mubr.bf16.gmra.mrb[52].mxu0 %v5902_v0  ;;  %v1293_v14 = vrot.slane %v1141_v56, 5  ;;  %v1143_v17 = vld [vmem:[#allocation2 + $0xb0] sm:$0x1]  ;;  %6826 = vmatmul.mubr.bf16.gmra.mrb[24].mxu1 %v7445_v7  ;;  %v1297_v22 = vrot.slane %v8037_v9, 5 }
 0x13a   : > { %v963_v18 = vsel %vm7831_vm6, %v961_v57, %v962_v4  ;;  %v964_v24 = vrot.slane %v962_v4, 4  ;;  %v1287_v21 = vsel %vm7764_vm3, %v1285_v5, %v1286_v6  ;;  %v8047_v25 = vld [vmem:[#allocation2 + $0xb8] sm:$0xf]  ;;  %v1292_v28 = vrot.slane %v1290_v13, 4  ;;  %v1145_v39 = vld [vmem:[#allocation2 + $0xbc] sm:$0x1] }
 0x13b   : > { %1061 = vst [vmem:[#allocation2 + $0xc4] sm:$0xf] %v963_v18  ;;  %v5903_v27 = vcombine.low %v1284_v11, %v1287_v21  ;;  %v1300_v31 = vrot.slane %v1143_v17, 5  ;;  %v5872_v34 = vrot.slane %v1140_v1, 9  ;;  %v5873_v60 = vrot.slane %v1142_v16, 9 }
 0x13c   : > { %1062 = vst [vmem:[#allocation2 + $0xc8] sm:$0x1] %v964_v24  ;;  %v1299_v36 = vrot.slane %v1297_v22, 4  ;;  %v1304_v37 = vrot.slane %v8047_v25, 5  ;;  %v1294_v38 = vsel %vm7764_vm3, %v1292_v28, %v1293_v14  ;;  %v2873_v33 = vrot.slane %v8049_v26, 5 }
 0x13d   : > { %6681 = vmatprep.mubr.bf16.mxu0 %v5903_v27  ;;  %v1291_v40 = vsel %vm7764_vm3, %v5872_v34, %v1290_v13  ;;  %v1298_v43 = vsel %vm7764_vm3, %v5873_v60, %v1297_v22  ;;  %v2775_v45 = vld [vmem:[#allocation2 + $0x18] sm:$0xe]  ;;  %v2876_v30 = vrot.slane %v2777_v32, 5  ;;  %v8063_v47 = vld [vmem:[#allocation2 + $0x34] sm:$0xf]  ;;  %v1307_v52 = vrot.slane %v1145_v39, 5 }
 0x13e   : > { %v1301_v44 = vsel %vm7764_vm3, %v1299_v36, %v1300_v31  ;;  %v5904_v35 = vcombine.low %v1291_v40, %v1294_v38  ;;  %v2875_v49 = vrot.slane %v2873_v33, 4  ;;  %v1144_v48 = vld [vmem:[#allocation2 + $0xb4] sm:$0xe]  ;;  %v1306_v50 = vrot.slane %v1304_v37, 4  ;;  %v2780_v56 = vld [vmem:[#allocation2 + $0x2c] sm:$0x1] }
 0x13f   : > { %v5905_v46 = vcombine.low %v1298_v43, %v1301_v44  ;;  %v2880_v53 = vrot.slane %v8055_v29, 5  ;;  %v6035_v54 = vrot.slane %v2775_v45, 9  ;;  %v2783_v61 = vld [vmem:[#allocation2 + $0x38] sm:$0x1]  ;;  %v2887_v62 = vrot.slane %v8063_v47, 5  ;;  %v7450_v1 = vld [vmem:[#allocation2 + $0xcc] sm:$0xff]  }
 0x140   : > { %v2877_v55 = vsel %vm7764_vm3, %v2875_v49, %v2876_v30  ;;  %v5874_v0 = vrot.slane %v1144_v48, 9  ;;  %v1066_v4 = vld [vmem:[#allocation2] sm:$0xf]  ;;  %v1308_v5 = vsel %vm7764_vm3, %v1306_v50, %v1307_v52  ;;  %v2883_v11 = vrot.slane %v2780_v56, 5  ;;  %v2778_v13 = vld [vmem:[#allocation2 + $0x24] sm:$0xe] }
 0x141   : > { %6682 = vmatmul.mubr.bf16.gmra.mrb[56].mxu0 %v5904_v35  ;;  %v2874_v2 = vsel %vm7764_vm3, %v6035_v54, %v2873_v33  ;;  %v2882_v7 = vrot.slane %v2880_v53, 4  ;;  %v2889_v14 = vrot.slane %v2887_v62, 4  ;;  %v2890_v16 = vrot.slane %v2783_v61, 5  ;;  %v8073_v17 = vld [vmem:[#allocation2 + $0x40] sm:$0xf]  ;;  %v7458_v45 = vld [vmem:[%s9213_s4 + $0x148] sm:$0xff]  }
 0x142   : > { %6685 = vmatprep.mubr.bf16.mxu0 %v5905_v46  ;;  %v7448_v57 = vld [vmem:[#allocation2 + $0xc0] sm:$0xff]   ;;  %v6067_v6 = vcombine.low %v2874_v2, %v2877_v55  ;;  %v1305_v18 = vsel %vm7764_vm3, %v5874_v0, %v1304_v37  ;;  %v2781_v22 = vld [vmem:[#allocation2 + $0x30] sm:$0xe]  ;;  %v8080_v27 = vld [vmem:[#allocation2 + $0x4c] sm:$0xf]  ;;  %v6036_v31 = vrot.slane %v2778_v13, 9 }
 0x143   : > { %6829 = vmatprep.mubr.bf16.mxu1 %v7448_v57  ;;  %v8077_v24 = vld [vmem:[#allocation2 + $0x4] sm:$0xf]  ;;  %v5906_v28 = vcombine.low %v1305_v18, %v1308_v5  ;;  %v2884_v32 = vsel %vm7764_vm3, %v2882_v7, %v2883_v11  ;;  %v2894_v34 = vrot.slane %v8073_v17, 5  ;;  %v6037_v60 = vrot.slane %v2781_v22, 9  ;;  %v1068_v39 = vld [vmem:[#allocation2 + $0xc] sm:$0xf] }
 0x144   : > { %6830 = vmatmul.mubr.bf16.gmra.mrb[28].mxu1 %v7450_v1  ;;  %v5915_v21 = vcombine.low %v1066_v4, %v8077_v24  ;;  %v2891_v36 = vsel %vm7764_vm3, %v2889_v14, %v2890_v16  ;;  %v2786_v37 = vld [vmem:[#allocation2 + $0x44] sm:$0x1]  ;;  %v2901_v38 = vrot.slane %v8080_v27, 5  ;;  %v2881_v33 = vsel %vm7764_vm3, %v6036_v31, %v2880_v53  ;;  %v2789_v40 = vld [vmem:[#allocation2 + $0x50] sm:$0x1]  ;;  %v7464_v16 = vld [vmem:[%s9213_s4 + $0x158] sm:$0xff]  }
 0x145   : > { %6849 = vmatprep.mubr.bf16.mxu1 %v6067_v6  ;;  %v6068_v43 = vcombine.low %v2881_v33, %v2884_v32  ;;  %v2888_v44 = vsel %vm7764_vm3, %v6037_v60, %v2887_v62  ;;  %v2896_v46 = vrot.slane %v2894_v34, 4  ;;  %v2897_v49 = vrot.slane %v2786_v37, 5  ;;  %v8095_v30 = vld [vmem:[#allocation2 + $0x10] sm:$0xf]  ;;  %v2784_v50 = vld [vmem:[#allocation2 + $0x3c] sm:$0xe] }
 0x146   : > { %v6069_v35 = vcombine.low %v2888_v44, %v2891_v36  ;;  %v5916_v48 = vcombine.low %v1068_v39, %v8095_v30  ;;  %v2903_v52 = vrot.slane %v2901_v38, 4  ;;  %v2904_v53 = vrot.slane %v2789_v40, 5  ;;  %v8098_v54 = vld [vmem:[#allocation2 + $0x58] sm:$0xf]  ;;  %v2787_v55 = vld [vmem:[#allocation2 + $0x48] sm:$0xe] }
 0x147   : > { %v8101_v56 = vld [vmem:[#allocation2 + $0x64] sm:$0xf]  ;;  %v1070_v57 = vld [vmem:[#allocation2 + $0x18] sm:$0xf]  ;;  %v7461_v61 = vld [vmem:[%s9213_s4 + $0x150] sm:$0xff]   ;;  %v6038_v0 = vrot.slane %v2784_v50, 9  ;;  %v2898_v1 = vsel %vm7764_vm3, %v2896_v46, %v2897_v49 }
 0x148   : > { %v5917_v62 = vcombine.low %v1070_v57, %v7863_v58  ;;  %v2908_v2 = vrot.slane %v8098_v54, 5  ;;  %v6039_v4 = vrot.slane %v2787_v55, 9  ;;  %v2905_v5 = vsel %vm7764_vm3, %v2903_v52, %v2904_v53  ;;  %v2792_v6 = vld [vmem:[#allocation2 + $0x5c] sm:$0x1]  ;;  %v2795_v11 = vld [vmem:[#allocation2 + $0x68] sm:$0x1] }
 0x149   : > { %6686 = vmatmul.mubr.bf16.gmra.mrb[60].mxu0 %v5906_v28  ;;  %v2915_v7 = vrot.slane %v8101_v56, 5  ;;  %v2895_v58 = vsel %vm7764_vm3, %v6038_v0, %v2894_v34  ;;  %v7534_v18 = vld [vmem:[%s9213_s4 + $0x80] sm:$0xff]   ;;  %v2911_v28 = vrot.slane %v2792_v6, 5  ;;  %v7471_v31 = vld [vmem:[%s9213_s4 + $0x90] sm:$0xff]   ;;  %v2918_v60 = vrot.slane %v2795_v11, 5 }
 0x14a   : > { %6705 = vmatprep.mubr.bf16.mxu0 %v5915_v21  ;;  %v6070_v13 = vcombine.low %v2895_v58, %v2898_v1  ;;  %v2902_v14 = vsel %vm7764_vm3, %v6039_v4, %v2901_v38  ;;  %v2910_v22 = vrot.slane %v2908_v2, 4  ;;  %v2790_v32 = vld [vmem:[#allocation2 + $0x54] sm:$0xe]  ;;  %v8129_v36 = vld [vmem:[#allocation2 + $0x70] sm:$0xf] }
 0x14b   : > { %v6071_v21 = vcombine.low %v2902_v14, %v2905_v5  ;;  %v2917_v34 = vrot.slane %v2915_v7, 4  ;;  %v1072_v37 = vld [vmem:[#allocation2 + $0x24] sm:$0xf]  ;;  %v2793_v38 = vld [vmem:[#allocation2 + $0x60] sm:$0xe]  ;;  %v2922_v46 = vrot.slane %v8129_v36, 5 }
 0x14c   : > { %6850 = vmatmul.mubr.bf16.vlgmr.msra.gmra.mrb[0].mxu1 %v6068_v43  ;;  %v8131_v39 = vld [vmem:[#allocation2 + $0x7c] sm:$0xf]  ;;  %v5918_v33 = vcombine.low %v1072_v37, %v7884_v23  ;;  %v1074_v40 = vld [vmem:[#allocation2 + $0x30] sm:$0xf]  ;;  %v7468_v43 = vld [vmem:[%s9213_s4 + $0x160] sm:$0xff]   ;;  %v6041_v49 = vrot.slane %v2793_v38, 9 }
 0x14d   : > { %6882 = vmatpush3.bf16.msra.mxu1 %v7968_v42  ;;  %6853 = vmatprep.mubr.bf16.mxu1 %v6069_v35  ;;  %v7469_v42 = vld [vmem:[%s9213_s4 + $0x88] sm:$0xff]   ;;  %v5919_v44 = vcombine.low %v1074_v40, %v7912_v8  ;;  %v2912_v35 = vsel %vm7764_vm3, %v2910_v22, %v2911_v28  ;;  %v7474_v23 = vld [vmem:[%s9213_s4 + $0x98] sm:$0xff]   ;;  %v2798_v50 = vld [vmem:[#allocation2 + $0x74] sm:$0x1]  ;;  %v2929_v52 = vrot.slane %v8131_v39, 5  ;;  %v2924_v0 = vrot.slane %v2922_v46, 4 }
 0x14e   : > { %6883 = vmatprep.subr.bf16.mxu1 %v7458_v45  ;;  %v2801_v53 = vld [vmem:[#allocation2 + $0x80] sm:$0x1]  ;;  %v2916_v57 = vsel %vm7764_vm3, %v6041_v49, %v2915_v7  ;;  %v2925_v1 = vrot.slane %v2798_v50, 5  ;;  %v8157_v6 = vld [vmem:[#allocation2 + $0x88] sm:$0xf]  ;;  %v7482_v40 = vld [vmem:[%s9213_s4 + $0x178] sm:$0xff]  }
 0x14f   : > { %v2931_v4 = vrot.slane %v2929_v52, 4  ;;  %v2932_v5 = vrot.slane %v2801_v53, 5  ;;  %v1076_v7 = vld [vmem:[#allocation2 + $0x3c] sm:$0xf]  ;;  %v2799_v58 = vld [vmem:[#allocation2 + $0x78] sm:$0xe] }
 0x150   : > { %v8159_v11 = vld [vmem:[#allocation2 + $0x94] sm:$0xf]  ;;  %v1078_v14 = vld [vmem:[#allocation2 + $0x48] sm:$0xf]  ;;  %v2926_v22 = vsel %vm7764_vm3, %v2924_v0, %v2925_v1  ;;  %v2936_v28 = vrot.slane %v8157_v6, 5 }
 0x151   : > { %6706 = vmatmul.mubr.bf16.vlgmr.msra.gmra.mrb[32].mxu0 %v5916_v48  ;;  %6884 = vmatpush3.bf16.msra.mxu1 %v7458_v45  ;;  %v6040_v45 = vrot.slane %v2790_v32, 9  ;;  %v2919_v48 = vsel %vm7764_vm3, %v2917_v34, %v2918_v60  ;;  %v2933_v32 = vsel %vm7764_vm3, %v2931_v4, %v2932_v5  ;;  %v2804_v34 = vld [vmem:[#allocation2 + $0x8c] sm:$0x1]  ;;  %v2943_v60 = vrot.slane %v8159_v11, 5  ;;  %v2807_v37 = vld [vmem:[#allocation2 + $0x98] sm:$0x1] }
 0x152   : > { %6709 = vmatprep.mubr.bf16.mxu0 %v5917_v62  ;;  %6885 = vmatprep.subr.bf16.mxu1 %v7461_v61  ;;  %v6073_v62 = vcombine.low %v2916_v57, %v2919_v48  ;;  %v2946_v49 = vrot.slane %v2807_v37, 5  ;;  %v8185_v48 = vld [vmem:[#allocation2 + $0xa0] sm:$0xf]  ;;  %v1080_v50 = vld [vmem:[#allocation2 + $0x54] sm:$0xf] }
 0x153   : > { %6738 = vmatpush3.bf16.msra.mxu0 %v7534_v18  ;;  %v2909_v8 = vsel %vm7764_vm3, %v6040_v45, %v2908_v2  ;;  %v7476_v2 = vld [vmem:[%s9213_s4 + $0xa0] sm:$0xff]   ;;  %v5921_v18 = vcombine.low %v1078_v14, %v7945_v63  ;;  %v2939_v45 = vrot.slane %v2804_v34, 5  ;;  %v5922_v53 = vcombine.low %v1080_v50, %v7955_v12  ;;  %v7483_v12 = vld [vmem:[%s9213_s4 + $0xb8] sm:$0xff]   ;;  %v2811_v34 = vld [vmem:[#allocation2 + $0xa8] sm:$0xe] }
 0x154   : > { %6739 = vmatprep.subr.bf16.mxu0 %v7469_v42  ;;  %6854 = vmatmul.mubr.bf16.gmra.mrb[4].mxu1 %v6070_v13  ;;  %v6072_v55 = vcombine.low %v2909_v8, %v2912_v35  ;;  %v5920_v13 = vcombine.low %v1076_v7, %v7917_v15  ;;  %v7479_v15 = vld [vmem:[%s9213_s4 + $0xa8] sm:$0xff]   ;;  %v7481_v35 = vld [vmem:[%s9213_s4 + $0xb0] sm:$0xff]   ;;  %v8193_v57 = vld [vmem:[%s9213_s4 + $0x180] sm:$0xff]   ;;  %v2950_v1 = vrot.slane %v8185_v48, 5 }
 0x155   : > { %6857 = vmatprep.mubr.bf16.mxu1 %v6071_v21  ;;  %6886 = vmatpush3.bf16.msra.mxu1 %v7461_v61  ;;  %v7473_v61 = vld [vmem:[%s9213_s4 + $0x168] sm:$0xff]   ;;  %v2810_v4 = vld [vmem:[#allocation2 + $0xa4] sm:$0x1]  ;;  %v2813_v7 = vld [vmem:[#allocation2 + $0xb0] sm:$0x1] }
 0x156   : > { %6887 = vmatprep.subr.bf16.mxu1 %v7464_v16  ;;  %v8187_v8 = vld [vmem:[#allocation2 + $0xac] sm:$0xf]  ;;  %v1086_v37 = vld [vmem:[#allocation2 + $0x78] sm:$0xf] }
 0x157   : > { %6740 = vmatpush3.bf16.msra.mxu0 %v7469_v42  ;;  %v2796_v42 = vld [vmem:[#allocation2 + $0x6c] sm:$0xe]  ;;  %v2957_v5 = vrot.slane %v8187_v8, 5 }
 0x158   : > { %6741 = vmatprep.subr.bf16.mxu0 %v7471_v31  ;;  %v6042_v21 = vrot.slane %v2796_v42, 9 }
 0x159   : > { %6710 = vmatmul.mubr.bf16.gmra.mrb[36].mxu0 %v5918_v33  ;;  %6888 = vmatpush3.bf16.msra.mxu1 %v7464_v16  ;;  %v7478_v16 = vld [vmem:[%s9213_s4 + $0x170] sm:$0xff]  }
 0x15a   : > { %6713 = vmatprep.mubr.bf16.mxu0 %v5919_v44  ;;  %6889 = vmatprep.subr.bf16.mxu1 %v7468_v43  ;;  %v2923_v63 = vsel %vm7764_vm3, %v6042_v21, %v2922_v46  ;;  %v2938_v44 = vrot.slane %v2936_v28, 4  ;;  %v2802_v46 = vld [vmem:[#allocation2 + $0x84] sm:$0xe] }
 0x15b   : > { %6742 = vmatpush3.bf16.msra.mxu0 %v7471_v31  ;;  %v6043_v31 = vrot.slane %v2799_v58, 9  ;;  %v6074_v38 = vcombine.low %v2923_v63, %v2926_v22  ;;  %v8213_v21 = vld [vmem:[%s9213_s4 + $0x200] sm:$0xff]   ;;  %v2808_v22 = vld [vmem:[#allocation2 + $0x9c] sm:$0xe] }
 0x15c   : > { %6743 = vmatprep.subr.bf16.mxu0 %v7474_v23  ;;  %6858 = vmatmul.mubr.bf16.gmra.mrb[8].mxu1 %v6072_v55  ;;  %v1082_v55 = vld [vmem:[#allocation2 + $0x60] sm:$0xf]  ;;  %v2940_v0 = vsel %vm7764_vm3, %v2938_v44, %v2939_v45  ;;  %v6047_v44 = vrot.slane %v2811_v34, 9 }
 0x15d   : > { %6861 = vmatprep.mubr.bf16.mxu1 %v6073_v62  ;;  %6890 = vmatpush3.bf16.msra.mxu1 %v7468_v43  ;;  %v2930_v33 = vsel %vm7764_vm3, %v6043_v31, %v2929_v52  ;;  %v2805_v52 = vld [vmem:[#allocation2 + $0x90] sm:$0xe]  ;;  %v6044_v62 = vrot.slane %v2802_v46, 9  ;;  %v8215_v31 = vld [vmem:[#allocation2 + $0xb8] sm:$0xf] }
 0x15e   : > { %6891 = vmatprep.subr.bf16.mxu1 %v7473_v61  ;;  %v6075_v43 = vcombine.low %v2930_v33, %v2933_v32  ;;  %v1084_v32 = vld [vmem:[#allocation2 + $0x6c] sm:$0xf]  ;;  %v6046_v33 = vrot.slane %v2808_v22, 9  ;;  %v2819_v46 = vld [vmem:[#allocation2 + $0xc8] sm:$0x1] }
 0x15f   : > { %6744 = vmatpush3.bf16.msra.mxu0 %v7474_v23  ;;  %v2945_v23 = vrot.slane %v2943_v60, 4  ;;  %v5924_v63 = vcombine.low %v1084_v32, %v7990_v20 }
 0x160   : > { %6745 = vmatprep.subr.bf16.mxu0 %v7476_v2 }
 0x161   : > { %6714 = vmatmul.mubr.bf16.gmra.mrb[40].mxu0 %v5920_v13  ;;  %6892 = vmatpush3.bf16.msra.mxu1 %v7473_v61  ;;  %v5923_v61 = vcombine.low %v1082_v55, %v7981_v3  ;;  %v2947_v42 = vsel %vm7764_vm3, %v2945_v23, %v2946_v49  ;;  %v2937_v3 = vsel %vm7764_vm3, %v6044_v62, %v2936_v28  ;;  %v2959_v28 = vrot.slane %v2957_v5, 4  ;;  %v2814_v55 = vld [vmem:[#allocation2 + $0xb4] sm:$0xe] }
 0x162   : > { %6717 = vmatprep.mubr.bf16.mxu0 %v5921_v18  ;;  %6893 = vmatprep.subr.bf16.mxu1 %v7478_v16  ;;  %v6076_v58 = vcombine.low %v2937_v3, %v2940_v0  ;;  %v2953_v18 = vrot.slane %v2810_v4, 5  ;;  %v2958_v49 = vsel %vm7764_vm3, %v6047_v44, %v2957_v5  ;;  %v2974_v62 = vrot.slane %v2819_v46, 5  ;;  %v8232_v0 = vld [vmem:[#allocation2 + $0xd0] sm:$0xf]  ;;  %v3305_v44 = vld [vmem:[#allocation2 + $0x18] sm:$0xc] }
 0x163   : > { %6746 = vmatpush3.bf16.msra.mxu0 %v7476_v2  ;;  %v6045_v2 = vrot.slane %v2805_v52, 9  ;;  %v6048_v3 = vrot.slane %v2814_v55, 9  ;;  %v3308_v55 = vld [vmem:[#allocation2 + $0x2c] sm:$0x3] }
 0x164   : > { %6747 = vmatprep.subr.bf16.mxu0 %v7479_v15  ;;  %6862 = vmatmul.mubr.bf16.gmra.mrb[12].mxu1 %v6074_v38  ;;  %v5925_v38 = vcombine.low %v1086_v37, %v8004_v59  ;;  %v2951_v59 = vsel %vm7764_vm3, %v6046_v33, %v2950_v1  ;;  %v1889_v37 = vld [vmem:[#allocation2 + $0x8] sm:$0x3] }
 0x165   : > { %6865 = vmatprep.mubr.bf16.mxu1 %v6075_v43  ;;  %6894 = vmatpush3.bf16.msra.mxu1 %v7478_v16  ;;  %v2944_v13 = vsel %vm7764_vm3, %v6045_v2, %v2943_v60  ;;  %v2952_v16 = vrot.slane %v2950_v1, 4  ;;  %v8217_v60 = vld [vmem:[#allocation2 + $0xc4] sm:$0xf]  ;;  %v2964_v43 = vrot.slane %v8215_v31, 5  ;;  %v2817_v2 = vld [vmem:[#allocation2 + $0xc0] sm:$0xe] }
 0x166   : > { %6895 = vmatprep.subr.bf16.mxu1 %v7482_v40  ;;  %v6077_v14 = vcombine.low %v2944_v13, %v2947_v42  ;;  %v2971_v20 = vrot.slane %v8217_v60, 5  ;;  %v1090_v1 = vld [vmem:[#allocation2 + $0x90] sm:$0xf] }
 0x167   : > { %6748 = vmatpush3.bf16.msra.mxu0 %v7479_v15  ;;  %v2960_v15 = vrot.slane %v2813_v7, 5  ;;  %v2966_v52 = vrot.slane %v2964_v43, 4  ;;  %v5927_v4 = vcombine.low %v1090_v1, %v8024_v41  ;;  %v2978_v7 = vrot.slane %v8232_v0, 5  ;;  %v3306_v41 = vld [vmem:[#allocation2 + $0x20] sm:$0x3] }
 0x168   : > { %6749 = vmatprep.subr.bf16.mxu0 %v7481_v35 }
 0x169   : > { %6718 = vmatmul.mubr.bf16.gmra.mrb[44].mxu0 %v5922_v53  ;;  %6896 = vmatpush3.bf16.msra.mxu1 %v7482_v40  ;;  %v2954_v40 = vsel %vm7764_vm3, %v2952_v16, %v2953_v18  ;;  %v2961_v45 = vsel %vm7764_vm3, %v2959_v28, %v2960_v15  ;;  %v3371_v16 = vrot.slane %v8049_v26, 6  ;;  %v1957_v28 = vrot.slane %v8077_v24, 6  ;;  %v2820_v26 = vld [vmem:[#allocation2 + $0xcc] sm:$0xe] }
 0x16a   : > { %6721 = vmatprep.mubr.bf16.mxu0 %v5923_v61  ;;  %6929 = vmatprep.subr.bf16.mxu1 %v8193_v57  ;;  %v6078_v23 = vcombine.low %v2951_v59, %v2954_v40  ;;  %v6079_v50 = vcombine.low %v2958_v49, %v2961_v45  ;;  %v2973_v61 = vrot.slane %v2971_v20, 4  ;;  %v2980_v32 = vrot.slane %v2978_v7, 4 }
 0x16b   : > { %6750 = vmatpush3.bf16.msra.mxu0 %v7481_v35  ;;  %v2816_v35 = vld [vmem:[#allocation2 + $0xbc] sm:$0x1]  ;;  %v3373_v33 = vrot.slane %v3371_v16, 4  ;;  %v3374_v40 = vrot.slane %v3306_v41, 6  ;;  %v1960_v59 = vrot.slane %v1889_v37, 6  ;;  %v6050_v46 = vrot.slane %v2820_v26, 9 }
 0x16c   : > { %6751 = vmatprep.subr.bf16.mxu0 %v7483_v12  ;;  %6866 = vmatmul.mubr.bf16.gmra.mrb[16].mxu1 %v6076_v58  ;;  %v2967_v53 = vrot.slane %v2816_v35, 5  ;;  %v6049_v58 = vrot.slane %v2817_v2, 9  ;;  %v2975_v13 = vsel %vm7764_vm3, %v2973_v61, %v2974_v62  ;;  %v1891_v62 = vld [vmem:[#allocation2 + $0x14] sm:$0x3]  ;;  %v3310_v2 = vld [vmem:[#allocation2 + $0x38] sm:$0x3] }
 0x16d   : > { %6869 = vmatprep.mubr.bf16.mxu1 %v6077_v14  ;;  %v2822_v14 = vld [vmem:[#allocation2 + $0xd4] sm:$0x1]  ;;  %v2979_v61 = vsel %vm7764_vm3, %v6050_v46, %v2978_v7  ;;  %v3381_v7 = vrot.slane %v3308_v55, 6  ;;  %v3388_v41 = vrot.slane %v3310_v2, 6 }
 0x16e   : > { %v2968_v5 = vsel %vm7764_vm3, %v2966_v52, %v2967_v53  ;;  %v2972_v22 = vsel %vm7764_vm3, %v6049_v58, %v2971_v20  ;;  %v2981_v34 = vrot.slane %v2822_v14, 5  ;;  %v1959_v20 = vrot.slane %v1957_v28, 4  ;;  %v1890_v53 = vld [vmem:[#allocation2 + $0xc] sm:$0xc]  ;;  %v3307_v58 = vld [vmem:[#allocation2 + $0x24] sm:$0xc] }
 0x16f   : > { %6752 = vmatpush3.bf16.msra.mxu0 %v7483_v12  ;;  %v1088_v12 = vld [vmem:[#allocation2 + $0x84] sm:$0xf]  ;;  %v6081_v15 = vcombine.low %v2972_v22, %v2975_v13  ;;  %v6091_v52 = vrot.slane %v3305_v44, 10  ;;  %v7535_v14 = vld [vmem:[#allocation2 + $0x1c] sm:$0xf] }
 0x170   : > { %7025 = vmatprep.subr.bf16.mxu0 %v8213_v21  ;;  %v5926_v42 = vcombine.low %v1088_v12, %v8016_v19  ;;  %v2965_v19 = vsel %vm7764_vm3, %v6048_v3, %v2964_v43  ;;  %v1094_v43 = vld [vmem:[#allocation2 + $0xa8] sm:$0xf]  ;;  %v1964_v12 = vrot.slane %v8095_v30, 6  ;;  %v1893_v3 = vld [vmem:[#allocation2 + $0x20] sm:$0x3]  ;;  %v1971_v30 = vrot.slane %v7535_v14, 6 }
 0x171   : > { %6722 = vmatmul.mubr.bf16.gmra.mrb[48].mxu0 %v5924_v63  ;;  %v6080_v18 = vcombine.low %v2965_v19, %v2968_v5  ;;  %v1888_v63 = vld [vmem:[#allocation2] sm:$0xc]  ;;  %v5929_v24 = vcombine.low %v1094_v43, %v8037_v9  ;;  %v3385_v9 = vrot.slane %v8063_v47, 6  ;;  %v1096_v47 = vld [vmem:[#allocation2 + $0xb4] sm:$0xf]  ;;  %v1974_v37 = vrot.slane %v1893_v3, 6 }
 0x172   : > { %6725 = vmatprep.mubr.bf16.mxu0 %v5925_v38  ;;  %v1092_v38 = vld [vmem:[#allocation2 + $0x9c] sm:$0xf]  ;;  %v5939_v35 = vrot.slane %v1888_v63, 10  ;;  %v1966_v22 = vrot.slane %v1964_v12, 4  ;;  %v3312_v63 = vld [vmem:[#allocation2 + $0x44] sm:$0x3] }
 0x173   : > { %v5928_v45 = vcombine.low %v1092_v38, %v8030_v51  ;;  %v3375_v51 = vsel %vm8253_vm9, %v3373_v33, %v3374_v40  ;;  %v3387_v19 = vrot.slane %v3385_v9, 4  ;;  %v6092_v38 = vrot.slane %v3307_v58, 10  ;;  %v3314_v40 = vld [vmem:[#allocation2 + $0x50] sm:$0x3]  ;;  %v1894_v3 = vld [vmem:[#allocation2 + $0x24] sm:$0xc] }
 0x174   : > { %6870 = vmatmul.mubr.bf16.gmra.mrb[20].mxu1 %v6078_v23  ;;  %v2982_v23 = vsel %vm7764_vm3, %v2980_v32, %v2981_v34  ;;  %v1958_v1 = vsel %vm8253_vm9, %v5939_v35, %v1957_v28  ;;  %v3309_v28 = vld [vmem:[#allocation2 + $0x30] sm:$0xc]  ;;  %v5930_v32 = vcombine.low %v1096_v47, %v8047_v25  ;;  %v1892_v34 = vld [vmem:[#allocation2 + $0x18] sm:$0xc]  ;;  %v3392_v33 = vrot.slane %v8073_v17, 6 }
 0x175   : > { %6873 = vmatprep.mubr.bf16.mxu1 %v6079_v50  ;;  %v3378_v50 = vrot.slane %v8055_v29, 6  ;;  %v3372_v29 = vsel %vm8253_vm9, %v6091_v52, %v3371_v16  ;;  %v5940_v16 = vrot.slane %v1890_v53, 10  ;;  %v1973_v43 = vrot.slane %v1971_v30, 4  ;;  %v8283_v17 = vld [vmem:[#allocation2 + $0x28] sm:$0xf] }
 0x176   : > { %v6123_v5 = vcombine.low %v3372_v29, %v3375_v51  ;;  %v6093_v44 = vrot.slane %v3309_v28, 10  ;;  %v3399_v35 = vrot.slane %v8080_v27, 6  ;;  %v1895_v52 = vld [vmem:[#allocation2 + $0x2c] sm:$0x3]  ;;  %v8288_v27 = vld [vmem:[#allocation2 + $0x34] sm:$0xf] }
 0x177   : > { %v3380_v13 = vrot.slane %v3378_v50, 4  ;;  %v1965_v25 = vsel %vm8253_vm9, %v5940_v16, %v1964_v12  ;;  %v1985_v51 = vrot.slane %v8288_v27, 6  ;;  %v7485_v53 = vld [vmem:[%s9213_s4 + $0x188] sm:$0xff]   ;;  %v5941_v55 = vrot.slane %v1892_v34, 10  ;;  %v1896_v14 = vld [vmem:[#allocation2 + $0x30] sm:$0xc] }
 0x178   : > { %v3395_v12 = vrot.slane %v3312_v63, 6  ;;  %v3401_v29 = vrot.slane %v3399_v35, 4  ;;  %v3313_v58 = vld [vmem:[#allocation2 + $0x48] sm:$0xc]  ;;  %v5942_v34 = vrot.slane %v1894_v3, 10 }
 0x179   : > { %6726 = vmatmul.mubr.bf16.gmra.mrb[52].mxu0 %v5926_v42  ;;  %v6082_v42 = vcombine.low %v2979_v61, %v2982_v23  ;;  %v3382_v26 = vsel %vm8253_vm9, %v3380_v13, %v3381_v7  ;;  %v3386_v23 = vsel %vm8253_vm9, %v6093_v44, %v3385_v9  ;;  %v3311_v9 = vld [vmem:[#allocation2 + $0x3c] sm:$0xc]  ;;  %v7490_v13 = vld [vmem:[%s9213_s4 + $0x208] sm:$0xff]   ;;  %v1972_v7 = vsel %vm8253_vm9, %v5941_v55, %v1971_v30  ;;  %v3315_v55 = vld [vmem:[#allocation2 + $0x54] sm:$0xc] }
 0x17a   : > { %6729 = vmatprep.mubr.bf16.mxu0 %v5927_v4  ;;  %v1961_v4 = vsel %vm8253_vm9, %v1959_v20, %v1960_v59  ;;  %v3379_v59 = vsel %vm8253_vm9, %v6092_v38, %v3378_v50  ;;  %v1897_v50 = vld [vmem:[#allocation2 + $0x38] sm:$0x3]  ;;  %v6094_v16 = vrot.slane %v3311_v9, 10  ;;  %v6095_v28 = vrot.slane %v3313_v58, 10  ;;  %v3318_v38 = vld [vmem:[#allocation2 + $0x68] sm:$0x3] }
 0x17b   : > { %v6124_v46 = vcombine.low %v3379_v59, %v3382_v26  ;;  %v3413_v30 = vrot.slane %v8101_v56, 6  ;;  %v5943_v26 = vrot.slane %v1896_v14, 10  ;;  %v3317_v9 = vld [vmem:[#allocation2 + $0x60] sm:$0xc]  ;;  %v6096_v27 = vrot.slane %v3315_v55, 10  ;;  %v7495_v55 = vld [vmem:[%s9213_s4 + $0x1b0] sm:$0xff]  }
 0x17c   : > { %6874 = vmatmul.mubr.bf16.gmra.mrb[24].mxu1 %v6080_v18  ;;  %v5971_v18 = vcombine.low %v1958_v1, %v1961_v4  ;;  %v3402_v1 = vrot.slane %v3314_v40, 6  ;;  %v7486_v4 = vld [vmem:[%s9213_s4 + $0x190] sm:$0xff]   ;;  %v3400_v44 = vsel %vm8253_vm9, %v6095_v28, %v3399_v35  ;;  %v1903_v14 = vld [vmem:[#allocation2 + $0x5c] sm:$0x3]  ;;  %v1905_v28 = vld [vmem:[#allocation2 + $0x68] sm:$0x3] }
 0x17d   : > { %6877 = vmatprep.mubr.bf16.mxu1 %v6081_v15  ;;  %v1967_v15 = vrot.slane %v1891_v62, 6  ;;  %v3394_v62 = vrot.slane %v3392_v33, 4  ;;  %v3321_v56 = vld [vmem:[#allocation2 + $0x78] sm:$0xc] }
 0x17f   : > { %v1968_v20 = vsel %vm8253_vm9, %v1966_v22, %v1967_v15  ;;  %v3396_v22 = vsel %vm8253_vm9, %v3394_v62, %v3395_v12  ;;  %v3406_v15 = vrot.slane %v8098_v54, 6  ;;  %v7489_v62 = vld [vmem:[%s9213_s4 + $0x1a0] sm:$0xff]  }
 0x180   : > { %v5972_v2 = vcombine.low %v1965_v25, %v1968_v20  ;;  %v7487_v25 = vld [vmem:[%s9213_s4 + $0x198] sm:$0xff]   ;;  %v8329_v20 = vld [vmem:[#allocation2 + $0x40] sm:$0xf] }
 0x181   : > { %6730 = vmatmul.mubr.bf16.gmra.mrb[56].mxu0 %v5928_v45  ;;  %v3389_v45 = vsel %vm8253_vm9, %v3387_v19, %v3388_v41  ;;  %v1987_v19 = vrot.slane %v1985_v51, 4  ;;  %v1988_v41 = vrot.slane %v1897_v50, 6  ;;  %v1992_v59 = vrot.slane %v8329_v20, 6 }
 0x182   : > { %6733 = vmatprep.mubr.bf16.mxu0 %v5929_v24  ;;  %v1978_v24 = vrot.slane %v8283_v17, 6  ;;  %v6125_v61 = vcombine.low %v3386_v23, %v3389_v45  ;;  %v8323_v45 = vld [vmem:[#allocation2 + $0x44] sm:$0x3]  ;;  %v3408_v23 = vrot.slane %v3406_v15, 4  ;;  %v3416_v50 = vrot.slane %v3318_v38, 6 }
 0x183   : > { %v1989_v40 = vsel %vm8253_vm9, %v1987_v19, %v1988_v41  ;;  %v1995_v3 = vrot.slane %v8323_v45, 6  ;;  %v1994_v17 = vrot.slane %v1992_v59, 4  ;;  %v3320_v19 = vld [vmem:[#allocation2 + $0x74] sm:$0x3]  ;;  %v3427_v41 = vrot.slane %v8131_v39, 6 }
 0x184   : > { %6878 = vmatmul.mubr.bf16.gmra.mrb[28].mxu1 %v6082_v42  ;;  %v1975_v42 = vsel %vm8253_vm9, %v1973_v43, %v1974_v37  ;;  %v1980_v47 = vrot.slane %v1978_v24, 4  ;;  %v3393_v37 = vsel %vm8253_vm9, %v6094_v16, %v3392_v33  ;;  %v1979_v12 = vsel %vm8253_vm9, %v5942_v34, %v1978_v24  ;;  %v1900_v24 = vld [vmem:[#allocation2 + $0x48] sm:$0xc]  ;;  %v8382_v16 = vld [vmem:[#allocation2 + $0x58] sm:$0xf]  ;;  %v8388_v34 = vld [vmem:[%s9213_s4 + $0x220] sm:$0xff]  }
 0x185   : > { %6897 = vmatprep.mubr.bf16.mxu1 %v6123_v5  ;;  %v1981_v5 = vrot.slane %v1895_v52, 6  ;;  %v6126_v43 = vcombine.low %v3393_v37, %v3396_v22  ;;  %v8339_v52 = vld [vmem:[%s9213_s4 + $0x210] sm:$0xff]   ;;  %v2006_v22 = vrot.slane %v8382_v16, 6  ;;  %v3423_v45 = vrot.slane %v3320_v19, 6  ;;  %v1906_v16 = vld [vmem:[#allocation2 + $0x6c] sm:$0xc] }
 0x187   : > { %v1982_v63 = vsel %vm8253_vm9, %v1980_v47, %v1981_v5  ;;  %v3420_v5 = vrot.slane %v8129_v36, 6  ;;  %v7498_v36 = vld [vmem:[%s9213_s4 + $0x1b8] sm:$0xff]  }
 0x189   : > { %6734 = vmatmul.mubr.bf16.gmra.mrb[60].mxu0 %v5930_v32  ;;  %v3403_v32 = vsel %vm8253_vm9, %v3401_v29, %v3402_v1  ;;  %v5974_v29 = vcombine.low %v1979_v12, %v1982_v63  ;;  %v2009_v12 = vrot.slane %v1903_v14, 6 }
 0x18a   : > { %6753 = vmatprep.mubr.bf16.mxu0 %v5971_v18  ;;  %v5973_v18 = vcombine.low %v1972_v7, %v1975_v42  ;;  %v6127_v33 = vcombine.low %v3400_v44, %v3403_v32  ;;  %v1898_v42 = vld [vmem:[#allocation2 + $0x3c] sm:$0xc]  ;;  %v3322_v32 = vld [vmem:[#allocation2 + $0x80] sm:$0x3]  ;;  %v3422_v44 = vrot.slane %v3420_v5, 4 }
 0x18b   : > { %v5944_v63 = vrot.slane %v1898_v42, 10 }
 0x18c   : > { %6898 = vmatmul.mubr.bf16.vlgmr.msra.gmra.mrb[0].mxu1 %v6124_v46  ;;  %v8332_v46 = vld [vmem:[#allocation2 + $0x50] sm:$0x3] }
 0x18d   : > { %6930 = vmatpush3.bf16.msra.mxu1 %v8193_v57  ;;  %6901 = vmatprep.mubr.bf16.mxu1 %v6125_v61  ;;  %v3316_v57 = vld [vmem:[#allocation2 + $0x5c] sm:$0x3]  ;;  %v3415_v61 = vrot.slane %v3413_v30, 4  ;;  %v2002_v47 = vrot.slane %v8332_v46, 6  ;;  %v1904_v46 = vld [vmem:[#allocation2 + $0x60] sm:$0xc] }
 0x18e   : > { %6931 = vmatprep.subr.bf16.mxu1 %v7485_v53  ;;  %v3409_v35 = vrot.slane %v3316_v57, 6  ;;  %v7492_v57 = vld [vmem:[%s9213_s4 + $0x1a8] sm:$0xff]  }
 0x18f   : > { %v3417_v7 = vsel %vm8253_vm9, %v3415_v61, %v3416_v50  ;;  %v1993_v61 = vsel %vm8253_vm9, %v5944_v63, %v1992_v59  ;;  %v2008_v50 = vrot.slane %v2006_v22, 4  ;;  %v8454_v63 = vld [vmem:[#allocation2 + $0x7c] sm:$0xf] }
 0x190   : > { %v2027_v39 = vrot.slane %v8454_v63, 6  ;;  %v3462_v63 = vrot.slane %v8215_v31, 6 }
 0x191   : > { %6754 = vmatmul.mubr.bf16.vlgmr.msra.gmra.mrb[32].mxu0 %v5972_v2  ;;  %6932 = vmatpush3.bf16.msra.mxu1 %v7485_v53  ;;  %v8341_v53 = vld [vmem:[#allocation2 + $0x4c] sm:$0xf]  ;;  %v1986_v2 = vsel %vm8253_vm9, %v5943_v26, %v1985_v51  ;;  %v3410_v51 = vsel %vm8253_vm9, %v3408_v23, %v3409_v35  ;;  %v3429_v23 = vrot.slane %v3427_v41, 4  ;;  %v3430_v35 = vrot.slane %v3322_v32, 6 }
 0x192   : > { %6757 = vmatprep.mubr.bf16.mxu0 %v5973_v18  ;;  %6933 = vmatprep.subr.bf16.mxu1 %v7486_v4  ;;  %v5975_v1 = vcombine.low %v1986_v2, %v1989_v40  ;;  %v3407_v18 = vsel %vm8253_vm9, %v6096_v27, %v3406_v15  ;;  %v8394_v15 = vld [vmem:[#allocation2 + $0x64] sm:$0xf]  ;;  %v3319_v26 = vld [vmem:[#allocation2 + $0x6c] sm:$0xc]  ;;  %v1996_v40 = vsel %vm8253_vm9, %v1994_v17, %v1995_v3  ;;  %v3441_v17 = vrot.slane %v8159_v11, 6 }
 0x193   : > { %7026 = vmatpush3.bf16.msra.mxu0 %v8213_v21  ;;  %v1999_v21 = vrot.slane %v8341_v53, 6  ;;  %v6128_v37 = vcombine.low %v3407_v18, %v3410_v51  ;;  %v2013_v38 = vrot.slane %v8394_v15, 6  ;;  %v5976_v2 = vcombine.low %v1993_v61, %v1996_v40  ;;  %v8430_v53 = vld [vmem:[%s9213_s4 + $0x228] sm:$0xff]   ;;  %v1907_v18 = vld [vmem:[#allocation2 + $0x74] sm:$0x3]  ;;  %v8481_v15 = vld [vmem:[%s9213_s4 + $0x1c0] sm:$0xff]  }
 0x194   : > { %7027 = vmatprep.subr.bf16.mxu0 %v7490_v13  ;;  %6902 = vmatmul.mubr.bf16.gmra.mrb[4].mxu1 %v6126_v43  ;;  %v6098_v59 = vrot.slane %v3319_v26, 10  ;;  %v3431_v3 = vsel %vm8253_vm9, %v3429_v23, %v3430_v35  ;;  %v2010_v27 = vsel %vm8253_vm9, %v2008_v50, %v2009_v12  ;;  %v5947_v51 = vrot.slane %v1904_v46, 10  ;;  %v3323_v40 = vld [vmem:[#allocation2 + $0x84] sm:$0xc]  ;;  %v1908_v23 = vld [vmem:[#allocation2 + $0x78] sm:$0xc] }
 0x195   : > { %6905 = vmatprep.mubr.bf16.mxu1 %v6127_v33  ;;  %6934 = vmatpush3.bf16.msra.mxu1 %v7486_v4  ;;  %v8368_v4 = vld [vmem:[%s9213_s4 + $0x218] sm:$0xff]   ;;  %v2001_v58 = vrot.slane %v1999_v21, 4  ;;  %v1902_v33 = vld [vmem:[#allocation2 + $0x54] sm:$0xc]  ;;  %v6100_v35 = vrot.slane %v3323_v40, 10  ;;  %v3448_v61 = vrot.slane %v8185_v48, 6 }
 0x196   : > { %6935 = vmatprep.subr.bf16.mxu1 %v7487_v25  ;;  %v8492_v50 = vld [vmem:[%s9213_s4 + $0x238] sm:$0xff]   ;;  %v1912_v40 = vld [vmem:[#allocation2 + $0x90] sm:$0xc] }
 0x197   : > { %7028 = vmatpush3.bf16.msra.mxu0 %v7490_v13  ;;  %v6097_v13 = vrot.slane %v3317_v9, 10  ;;  %v2015_v9 = vrot.slane %v2013_v38, 4 }
 0x198   : > { %7029 = vmatprep.subr.bf16.mxu0 %v8339_v52 }
 0x199   : > { %6758 = vmatmul.mubr.bf16.gmra.mrb[36].mxu0 %v5974_v29  ;;  %6936 = vmatpush3.bf16.msra.mxu1 %v7487_v25  ;;  %v3414_v54 = vsel %vm8253_vm9, %v6097_v13, %v3413_v30  ;;  %v5945_v30 = vrot.slane %v1900_v24, 10  ;;  %v2003_v25 = vsel %vm8253_vm9, %v2001_v58, %v2002_v47  ;;  %v2016_v29 = vrot.slane %v1905_v28, 6  ;;  %v3324_v47 = vld [vmem:[#allocation2 + $0x8c] sm:$0x3]  ;;  %v3326_v13 = vld [vmem:[#allocation2 + $0x98] sm:$0x3] }
 0x19a   : > { %6761 = vmatprep.mubr.bf16.mxu0 %v5975_v1  ;;  %6937 = vmatprep.subr.bf16.mxu1 %v7489_v62  ;;  %v6129_v43 = vcombine.low %v3414_v54, %v3417_v7  ;;  %v3424_v1 = vsel %vm8253_vm9, %v3422_v44, %v3423_v45  ;;  %v5946_v24 = vrot.slane %v1902_v33, 10  ;;  %v3421_v58 = vsel %vm8253_vm9, %v6098_v59, %v3420_v5  ;;  %v8447_v28 = vld [vmem:[#allocation2 + $0x70] sm:$0xf] }
 0x19b   : > { %7030 = vmatpush3.bf16.msra.mxu0 %v8339_v52  ;;  %v2000_v42 = vsel %vm8253_vm9, %v5945_v30, %v1999_v21  ;;  %v6099_v21 = vrot.slane %v3321_v56, 10  ;;  %v2017_v7 = vsel %vm8253_vm9, %v2015_v9, %v2016_v29  ;;  %v6130_v14 = vcombine.low %v3421_v58, %v3424_v1  ;;  %v8463_v54 = vld [vmem:[%s9213_s4 + $0x230] sm:$0xff]  }
 0x19c   : > { %7031 = vmatprep.subr.bf16.mxu0 %v8368_v4  ;;  %6906 = vmatmul.mubr.bf16.gmra.mrb[8].mxu1 %v6128_v37  ;;  %v5977_v20 = vcombine.low %v2000_v42, %v2003_v25  ;;  %v2020_v32 = vrot.slane %v8447_v28, 6  ;;  %v3437_v37 = vrot.slane %v3324_v47, 6  ;;  %v2007_v26 = vsel %vm8253_vm9, %v5946_v24, %v2006_v22  ;;  %v3325_v30 = vld [vmem:[#allocation2 + $0x90] sm:$0xc]  ;;  %v3328_v42 = vld [vmem:[#allocation2 + $0xa4] sm:$0x3] }
 0x19d   : > { %6909 = vmatprep.mubr.bf16.mxu1 %v6129_v43  ;;  %6938 = vmatpush3.bf16.msra.mxu1 %v7489_v62  ;;  %v3434_v62 = vrot.slane %v8157_v6, 6  ;;  %v3428_v19 = vsel %vm8253_vm9, %v6099_v21, %v3427_v41  ;;  %v3443_v43 = vrot.slane %v3441_v17, 4  ;;  %v3444_v44 = vrot.slane %v3326_v13, 6  ;;  %v3330_v1 = vld [vmem:[#allocation2 + $0xb0] sm:$0x3] }
 0x19e   : > { %6939 = vmatprep.subr.bf16.mxu1 %v7492_v57  ;;  %v6131_v5 = vcombine.low %v3428_v19, %v3431_v3  ;;  %v5978_v45 = vcombine.low %v2007_v26, %v2010_v27  ;;  %v2014_v56 = vsel %vm8253_vm9, %v5947_v51, %v2013_v38  ;;  %v2022_v22 = vrot.slane %v2020_v32, 4  ;;  %v1911_v6 = vld [vmem:[#allocation2 + $0x8c] sm:$0x3]  ;;  %v1913_v27 = vld [vmem:[#allocation2 + $0x98] sm:$0x3] }
 0x19f   : > { %7032 = vmatpush3.bf16.msra.mxu0 %v8368_v4  ;;  %v3436_v41 = vrot.slane %v3434_v62, 4  ;;  %v5979_v25 = vcombine.low %v2014_v56, %v2017_v7  ;;  %v2023_v33 = vrot.slane %v1907_v18, 6  ;;  %v2029_v38 = vrot.slane %v2027_v39, 4  ;;  %v7545_v13 = vld [vmem:[#allocation2 + $0x94] sm:$0xf] }
 0x1a0   : > { %7033 = vmatprep.subr.bf16.mxu0 %v8388_v34  ;;  %v6101_v12 = vrot.slane %v3325_v30, 10  ;;  %v3455_v9 = vrot.slane %v8187_v8, 6  ;;  %v5948_v29 = vrot.slane %v1906_v16, 10  ;;  %v3435_v48 = vsel %vm8253_vm9, %v6100_v35, %v3434_v62  ;;  %v3327_v7 = vld [vmem:[#allocation2 + $0x9c] sm:$0xc] }
 0x1a1   : > { %6762 = vmatmul.mubr.bf16.gmra.mrb[40].mxu0 %v5976_v2  ;;  %6940 = vmatpush3.bf16.msra.mxu1 %v7492_v57  ;;  %v1909_v57 = vld [vmem:[#allocation2 + $0x80] sm:$0x3]  ;;  %v3445_v2 = vsel %vm8253_vm9, %v3443_v43, %v3444_v44  ;;  %v2024_v21 = vsel %vm8253_vm9, %v2022_v22, %v2023_v33  ;;  %v5949_v3 = vrot.slane %v1908_v23, 10  ;;  %v3450_v51 = vrot.slane %v3448_v61, 4  ;;  %v1910_v26 = vld [vmem:[#allocation2 + $0x84] sm:$0xc] }
 0x1a2   : > { %6765 = vmatprep.mubr.bf16.mxu0 %v5977_v20  ;;  %6941 = vmatprep.subr.bf16.mxu1 %v7495_v55  ;;  %v2030_v46 = vrot.slane %v1909_v57, 6  ;;  %v8501_v20 = vld [vmem:[#allocation2 + $0x88] sm:$0xf]  ;;  %v3442_v8 = vsel %vm8253_vm9, %v6101_v12, %v3441_v17  ;;  %v3451_v58 = vrot.slane %v3328_v42, 6  ;;  %v2041_v11 = vrot.slane %v7545_v13, 6 }
 0x1a3   : > { %7034 = vmatpush3.bf16.msra.mxu0 %v8388_v34  ;;  %v2034_v59 = vrot.slane %v8501_v20, 6  ;;  %v6133_v24 = vcombine.low %v3442_v8, %v3445_v2  ;;  %v3458_v17 = vrot.slane %v3330_v1, 6  ;;  %v2021_v19 = vsel %vm8253_vm9, %v5948_v29, %v2020_v32  ;;  %v3329_v57 = vld [vmem:[#allocation2 + $0xa8] sm:$0xc]  ;;  %v3332_v56 = vld [vmem:[#allocation2 + $0xbc] sm:$0x3] }
 0x1a4   : > { %7035 = vmatprep.subr.bf16.mxu0 %v8430_v53  ;;  %6910 = vmatmul.mubr.bf16.gmra.mrb[12].mxu1 %v6130_v14  ;;  %v2031_v62 = vsel %vm8253_vm9, %v2029_v38, %v2030_v46  ;;  %v3457_v14 = vrot.slane %v3455_v9, 4  ;;  %v2028_v18 = vsel %vm8253_vm9, %v5949_v3, %v2027_v39  ;;  %v2044_v43 = vrot.slane %v1913_v27, 6  ;;  %v3334_v33 = vld [vmem:[#allocation2 + $0xc8] sm:$0x3]  ;;  %v1915_v23 = vld [vmem:[#allocation2 + $0xa4] sm:$0x3] }
 0x1a5   : > { %6913 = vmatprep.mubr.bf16.mxu1 %v6131_v5  ;;  %6942 = vmatpush3.bf16.msra.mxu1 %v7495_v55  ;;  %v3438_v55 = vsel %vm8253_vm9, %v3436_v41, %v3437_v37  ;;  %v2037_v5 = vrot.slane %v1911_v6, 6  ;;  %v5980_v41 = vcombine.low %v2021_v19, %v2024_v21  ;;  %v5981_v37 = vcombine.low %v2028_v18, %v2031_v62  ;;  %v7546_v38 = vld [vmem:[#allocation2 + $0xa0] sm:$0xf]  ;;  %v1917_v42 = vld [vmem:[#allocation2 + $0xb0] sm:$0x3] }
 0x1a6   : > { %6943 = vmatprep.subr.bf16.mxu1 %v7498_v36  ;;  %v6132_v47 = vcombine.low %v3435_v48, %v3438_v55  ;;  %v6102_v28 = vrot.slane %v3327_v7, 10  ;;  %v3452_v32 = vsel %vm8253_vm9, %v3450_v51, %v3451_v58  ;;  %v2043_v44 = vrot.slane %v2041_v11, 4  ;;  %v7547_v55 = vld [vmem:[#allocation2 + $0xac] sm:$0xf]  ;;  %v3331_v1 = vld [vmem:[#allocation2 + $0xb4] sm:$0xc] }
 0x1a7   : > { %7036 = vmatpush3.bf16.msra.mxu0 %v8430_v53  ;;  %v6103_v39 = vrot.slane %v3329_v57, 10  ;;  %v3469_v30 = vrot.slane %v8217_v60, 6  ;;  %v2048_v35 = vrot.slane %v7546_v38, 6  ;;  %v2055_v12 = vrot.slane %v7547_v55, 6  ;;  %v1914_v8 = vld [vmem:[#allocation2 + $0x9c] sm:$0xc] }
 0x1a8   : > { %7037 = vmatprep.subr.bf16.mxu0 %v8463_v54  ;;  %v3449_v22 = vsel %vm8253_vm9, %v6102_v28, %v3448_v61  ;;  %v5951_v2 = vrot.slane %v1912_v40, 10  ;;  %v3464_v29 = vrot.slane %v3462_v63, 4  ;;  %v3465_v48 = vrot.slane %v3332_v56, 6  ;;  %v3333_v6 = vld [vmem:[#allocation2 + $0xc0] sm:$0xc] }
 0x1a9   : > { %6766 = vmatmul.mubr.bf16.gmra.mrb[44].mxu0 %v5978_v45  ;;  %6944 = vmatpush3.bf16.msra.mxu1 %v7498_v36  ;;  %v2036_v36 = vrot.slane %v2034_v59, 4  ;;  %v3459_v45 = vsel %vm8253_vm9, %v3457_v14, %v3458_v17  ;;  %v6134_v46 = vcombine.low %v3449_v22, %v3452_v32  ;;  %v3456_v31 = vsel %vm8253_vm9, %v6103_v39, %v3455_v9  ;;  %v1916_v27 = vld [vmem:[#allocation2 + $0xa8] sm:$0xc]  ;;  %v3336_v19 = vld [vmem:[#allocation2 + $0xd4] sm:$0x3] }
 0x1aa   : > { %6769 = vmatprep.mubr.bf16.mxu0 %v5979_v25  ;;  %6977 = vmatprep.subr.bf16.mxu1 %v8481_v15  ;;  %v5950_v25 = vrot.slane %v1910_v26, 10  ;;  %v6135_v60 = vcombine.low %v3456_v31, %v3459_v45  ;;  %v2045_v61 = vsel %vm8253_vm9, %v2043_v44, %v2044_v43  ;;  %v3471_v21 = vrot.slane %v3469_v30, 4  ;;  %v8549_v57 = vld [vmem:[#allocation2 + $0x34] sm:$0xf]  ;;  %v7548_v43 = vld [vmem:[#allocation2 + $0xb8] sm:$0xf] }
 0x1ab   : > { %7038 = vmatpush3.bf16.msra.mxu0 %v8463_v54  ;;  %v2038_v16 = vsel %vm8253_vm9, %v2036_v36, %v2037_v5  ;;  %v3472_v9 = vrot.slane %v3334_v33, 6  ;;  %v2050_v62 = vrot.slane %v2048_v35, 4  ;;  %v2057_v51 = vrot.slane %v2055_v12, 4  ;;  %v1919_v39 = vld [vmem:[#allocation2 + $0xbc] sm:$0x3] }
 0x1ac   : > { %7039 = vmatprep.subr.bf16.mxu0 %v8492_v50  ;;  %6914 = vmatmul.mubr.bf16.gmra.mrb[16].mxu1 %v6132_v47  ;;  %v2035_v20 = vsel %vm8253_vm9, %v5950_v25, %v2034_v59  ;;  %v2042_v47 = vsel %vm8253_vm9, %v5951_v2, %v2041_v11  ;;  %v2058_v58 = vrot.slane %v1917_v42, 6  ;;  %v6104_v13 = vrot.slane %v3331_v1, 10  ;;  %v3335_v45 = vld [vmem:[#allocation2 + $0xcc] sm:$0xc]  ;;  %v1918_v38 = vld [vmem:[#allocation2 + $0xb4] sm:$0xc] }
 0x1ad   : > { %6917 = vmatprep.mubr.bf16.mxu1 %v6133_v24  ;;  %v5982_v3 = vcombine.low %v2035_v20, %v2038_v16  ;;  %v2051_v24 = vrot.slane %v1915_v23, 6  ;;  %v5983_v59 = vcombine.low %v2042_v47, %v2045_v61  ;;  %v3466_v7 = vsel %vm8253_vm9, %v3464_v29, %v3465_v48  ;;  %v4721_v16 = vld [vmem:[#allocation2 + $0x38] sm:$0x3]  ;;  %v8568_v42 = vld [vmem:[#allocation2 + $0x4c] sm:$0xf]  ;;  %v7499_v61 = vld [vmem:[#allocation2 + $0x30] sm:$0xff]  }
 0x1ae   : > { %v3476_v14 = vrot.slane %v8232_v0, 6  ;;  %v6105_v17 = vrot.slane %v3333_v6, 10  ;;  %v3473_v11 = vsel %vm8253_vm9, %v3471_v21, %v3472_v9  ;;  %v5952_v18 = vrot.slane %v1914_v8, 10  ;;  %v4725_v6 = vld [vmem:[#allocation2 + $0x50] sm:$0x3] }
 0x1af   : > { %7040 = vmatpush3.bf16.msra.mxu0 %v8492_v50  ;;  %v5953_v36 = vrot.slane %v1916_v27, 10  ;;  %v3463_v5 = vsel %vm8253_vm9, %v6104_v13, %v3462_v63  ;;  %v2059_v0 = vsel %vm8253_vm9, %v2057_v51, %v2058_v58  ;;  %v2062_v28 = vrot.slane %v7548_v43, 6 }
 0x1b0   : > { %v3470_v26 = vsel %vm8253_vm9, %v6105_v17, %v3469_v30  ;;  %v3478_v32 = vrot.slane %v3476_v14, 4  ;;  %v3479_v44 = vrot.slane %v3336_v19, 6  ;;  %v4786_v63 = vrot.slane %v8549_v57, 6  ;;  %v4724_v17 = vld [vmem:[#allocation2 + $0x48] sm:$0xc]  ;;  %v7502_v19 = vld [vmem:[#allocation2 + $0x3c] sm:$0xff]  }
 0x1b1   : > { %6770 = vmatmul.mubr.bf16.gmra.mrb[48].mxu0 %v5980_v41  ;;  %v2052_v41 = vsel %vm8253_vm9, %v2050_v62, %v2051_v24  ;;  %v6137_v40 = vcombine.low %v3470_v26, %v3473_v11  ;;  %v2049_v56 = vsel %vm8253_vm9, %v5952_v18, %v2048_v35  ;;  %v2056_v25 = vsel %vm8253_vm9, %v5953_v36, %v2055_v12  ;;  %v4720_v35 = vld [vmem:[#allocation2 + $0x30] sm:$0xc]  ;;  %v8582_v11 = vld [vmem:[#allocation2 + $0x64] sm:$0xf]  ;;  %v7504_v18 = vld [vmem:[%s9213_s4 + $0x1c8] sm:$0xff]  }
 0x1b2   : > { %6773 = vmatprep.mubr.bf16.mxu0 %v5981_v37  ;;  %v6136_v37 = vcombine.low %v3463_v5, %v3466_v7  ;;  %v5984_v22 = vcombine.low %v2049_v56, %v2052_v41  ;;  %v5985_v30 = vcombine.low %v2056_v25, %v2059_v0  ;;  %v2064_v33 = vrot.slane %v2062_v28, 4  ;;  %v7503_v41 = vld [vmem:[#allocation2 + $0x48] sm:$0xff]  }
 0x1b3   : > { %v6106_v31 = vrot.slane %v3335_v45, 10  ;;  %v3480_v23 = vsel %vm8253_vm9, %v3478_v32, %v3479_v44  ;;  %v4788_v55 = vrot.slane %v4786_v63, 4  ;;  %v4789_v2 = vrot.slane %v4721_v16, 6  ;;  %v4729_v32 = vld [vmem:[#allocation2 + $0x68] sm:$0x3] }
 0x1b4   : > { %6918 = vmatmul.mubr.bf16.gmra.mrb[20].mxu1 %v6134_v46  ;;  %v2065_v46 = vrot.slane %v1919_v39, 6  ;;  %v5954_v48 = vrot.slane %v1918_v38, 10  ;;  %v6243_v21 = vrot.slane %v4720_v35, 10  ;;  %v4800_v47 = vrot.slane %v8568_v42, 6  ;;  %v4726_v16 = vld [vmem:[#allocation2 + $0x54] sm:$0xc] }
 0x1b5   : > { %6921 = vmatprep.mubr.bf16.mxu1 %v6135_v60  ;;  %v8564_v60 = vld [vmem:[#allocation2 + $0x40] sm:$0xf]  ;;  %v3477_v12 = vsel %vm8253_vm9, %v6106_v31, %v3476_v14  ;;  %v4790_v9 = vsel %vm8253_vm9, %v4788_v55, %v4789_v2  ;;  %v4803_v7 = vrot.slane %v4725_v6, 6  ;;  %v8580_v14 = vld [vmem:[#allocation2 + $0x58] sm:$0xf]  ;;  %v4814_v43 = vrot.slane %v8582_v11, 6 }
 0x1b6   : > { %v6138_v29 = vcombine.low %v3477_v12, %v3480_v23  ;;  %v2066_v20 = vsel %vm8253_vm9, %v2064_v33, %v2065_v46  ;;  %v4793_v1 = vrot.slane %v8564_v60, 6  ;;  %v2063_v8 = vsel %vm8253_vm9, %v5954_v48, %v2062_v28  ;;  %v8601_v33 = vld [vmem:[#allocation2 + $0x70] sm:$0xf]  ;;  %v8603_v46 = vld [vmem:[#allocation2 + $0x7c] sm:$0xf]  ;;  %v7505_v31 = vld [vmem:[#allocation2 + $0x54] sm:$0xff]  }
 0x1b7   : > { %v5986_v62 = vcombine.low %v2063_v8, %v2066_v20  ;;  %v4787_v24 = vsel %vm8253_vm9, %v6243_v21, %v4786_v63  ;;  %v4802_v13 = vrot.slane %v4800_v47, 4  ;;  %v4807_v0 = vrot.slane %v8580_v14, 6  ;;  %v7507_v63 = vld [vmem:[%s9213_s4 + $0x1d0] sm:$0xff]   ;;  %v7510_v23 = vld [vmem:[%s9213_s4 + $0x1d8] sm:$0xff]   ;;  %v7506_v2 = vld [vmem:[#allocation2 + $0x60] sm:$0xff]  }
 0x1b8   : > { %v6275_v27 = vcombine.low %v4787_v24, %v4790_v9  ;;  %v4795_v51 = vrot.slane %v4793_v1, 4  ;;  %v6246_v38 = vrot.slane %v4726_v16, 10  ;;  %v4821_v35 = vrot.slane %v8601_v33, 6  ;;  %v4731_v48 = vld [vmem:[#allocation2 + $0x74] sm:$0x3] }
 0x1b9   : > { %6774 = vmatmul.mubr.bf16.gmra.mrb[52].mxu0 %v5982_v3  ;;  %v4723_v3 = vld [vmem:[#allocation2 + $0x44] sm:$0x3]  ;;  %v4804_v26 = vsel %vm8253_vm9, %v4802_v13, %v4803_v7  ;;  %v4809_v56 = vrot.slane %v4807_v0, 4  ;;  %v4828_v20 = vrot.slane %v8603_v46, 6  ;;  %v4824_v6 = vrot.slane %v4731_v48, 6  ;;  %v7508_v13 = vld [vmem:[#allocation2 + $0x6c] sm:$0xff]  }
 0x1ba   : > { %6777 = vmatprep.mubr.bf16.mxu0 %v5983_v59  ;;  %v4796_v58 = vrot.slane %v4723_v3, 6  ;;  %v4722_v59 = vld [vmem:[#allocation2 + $0x3c] sm:$0xc]  ;;  %v7513_v3 = vld [vmem:[%s9213_s4 + $0x1e0] sm:$0xff]   ;;  %v4823_v8 = vrot.slane %v4821_v35, 4  ;;  %v7516_v7 = vld [vmem:[%s9213_s4 + $0x1e8] sm:$0xff]  }
 0x1bb   : > { %v6244_v36 = vrot.slane %v4722_v59, 10  ;;  %v4830_v24 = vrot.slane %v4828_v20, 4  ;;  %v8623_v59 = vld [vmem:[#allocation2 + $0x94] sm:$0xf]  ;;  %v8641_v16 = vld [vmem:[#allocation2 + $0xa0] sm:$0xf] }
 0x1bc   : > { %6922 = vmatmul.mubr.bf16.gmra.mrb[24].mxu1 %v6136_v37  ;;  %v4797_v5 = vsel %vm8253_vm9, %v4795_v51, %v4796_v58  ;;  %v6245_v37 = vrot.slane %v4724_v17, 10  ;;  %v8621_v51 = vld [vmem:[#allocation2 + $0x88] sm:$0xf]  ;;  %v4732_v58 = vld [vmem:[#allocation2 + $0x78] sm:$0xc] }
 0x1bd   : > { %6925 = vmatprep.mubr.bf16.mxu1 %v6137_v40  ;;  %v4727_v40 = vld [vmem:[#allocation2 + $0x5c] sm:$0x3]  ;;  %v4794_v28 = vsel %vm8253_vm9, %v6244_v36, %v4793_v1  ;;  %v4733_v1 = vld [vmem:[#allocation2 + $0x80] sm:$0x3]  ;;  %v4835_v36 = vrot.slane %v8621_v51, 6 }
 0x1be   : > { %v6276_v44 = vcombine.low %v4794_v28, %v4797_v5  ;;  %v4801_v39 = vsel %vm8253_vm9, %v6245_v37, %v4800_v47  ;;  %v4810_v25 = vrot.slane %v4727_v40, 6  ;;  %v6249_v5 = vrot.slane %v4732_v58, 10  ;;  %v4737_v40 = vld [vmem:[#allocation2 + $0x98] sm:$0x3] }
 0x1bf   : > { %v6277_v45 = vcombine.low %v4801_v39, %v4804_v26  ;;  %v4842_v37 = vrot.slane %v8623_v59, 6  ;;  %v4837_v39 = vrot.slane %v4835_v36, 4  ;;  %v7517_v58 = vld [vmem:[#allocation2 + $0xb4] sm:$0xff]  }
 0x1c0   : > { %v4811_v55 = vsel %vm8253_vm9, %v4809_v56, %v4810_v25  ;;  %v4829_v28 = vsel %vm8253_vm9, %v6249_v5, %v4828_v20  ;;  %v4845_v25 = vrot.slane %v4737_v40, 6 }
 0x1c1   : > { %6778 = vmatmul.mubr.bf16.gmra.mrb[56].mxu0 %v5984_v22  ;;  %v4816_v22 = vrot.slane %v4814_v43, 4  ;;  %v4844_v56 = vrot.slane %v4842_v37, 4 }
 0x1c2   : > { %6781 = vmatprep.mubr.bf16.mxu0 %v5985_v30  ;;  %v4817_v30 = vrot.slane %v4729_v32, 6  ;;  %v7519_v32 = vld [vmem:[%s9213_s4 + $0x1f0] sm:$0xff]  }
 0x1c4   : > { %6926 = vmatmul.mubr.bf16.gmra.mrb[28].mxu1 %v6138_v29  ;;  %v4818_v29 = vsel %vm8253_vm9, %v4816_v22, %v4817_v30  ;;  %v4736_v22 = vld [vmem:[#allocation2 + $0x90] sm:$0xc]  ;;  %v7511_v30 = vld [vmem:[#allocation2 + $0x84] sm:$0xff]  }
 0x1c5   : > { %6945 = vmatprep.mubr.bf16.mxu1 %v7499_v61  ;;  %v4808_v61 = vsel %vm8253_vm9, %v6246_v38, %v4807_v0  ;;  %v4735_v0 = vld [vmem:[#allocation2 + $0x8c] sm:$0x3]  ;;  %v7512_v38 = vld [vmem:[#allocation2 + $0x90] sm:$0xff]  }
 0x1c6   : > { %v6278_v21 = vcombine.low %v4808_v61, %v4811_v55  ;;  %v4849_v55 = vrot.slane %v8641_v16, 6 }
 0x1c9   : > { %6782 = vmatmul.mubr.bf16.gmra.mrb[60].mxu0 %v5986_v62  ;;  %v4730_v62 = vld [vmem:[#allocation2 + $0x6c] sm:$0xc] }
 0x1ca   : > { %7041 = vmatprep.mubr.bf16.mxu0 %v6275_v27  ;;  %v4831_v27 = vrot.slane %v4733_v1, 6  ;;  %v6248_v17 = vrot.slane %v4730_v62, 10  ;;  %v4851_v1 = vrot.slane %v4849_v55, 4  ;;  %v7515_v62 = vld [vmem:[#allocation2 + $0xa8] sm:$0xff]  }
 0x1cc   : > { %6946 = vmatmul.mubr.bf16.vlgmr.msra.gmra.mrb[0].mxu1 %v7502_v19  ;;  %v4825_v19 = vsel %vm8253_vm9, %v4823_v8, %v4824_v6  ;;  %v4822_v26 = vsel %vm8253_vm9, %v6248_v17, %v4821_v35  ;;  %v4846_v35 = vsel %vm8253_vm9, %v4844_v56, %v4845_v25  ;;  %v7521_v17 = vld [vmem:[#allocation2 + $0xd8] sm:$0xff]  }
 0x1cd   : > { %6978 = vmatpush3.bf16.msra.mxu1 %v8481_v15  ;;  %6949 = vmatprep.mubr.bf16.mxu1 %v7503_v41  ;;  %v4728_v15 = vld [vmem:[#allocation2 + $0x60] sm:$0xc]  ;;  %v4832_v41 = vsel %vm8253_vm9, %v4830_v24, %v4831_v27 }
 0x1ce   : > { %6979 = vmatprep.subr.bf16.mxu1 %v7504_v18  ;;  %v6247_v12 = vrot.slane %v4728_v15, 10  ;;  %v7522_v15 = vld [vmem:[%s9213_s4 + $0x1f8] sm:$0xff]  }
 0x1d0   : > { %v4815_v9 = vsel %vm8253_vm9, %v6247_v12, %v4814_v43  ;;  %v6280_v43 = vcombine.low %v4822_v26, %v4825_v19  ;;  %v4739_v12 = vld [vmem:[#allocation2 + $0xa4] sm:$0x3]  ;;  %v4192_v19 = vld [vmem:[#allocation2 + $0x38] sm:$0x1] }
 0x1d1   : > { %7042 = vmatmul.mubr.bf16.vlgmr.msra.gmra.mrb[64].mxu0 %v6276_v44  ;;  %6980 = vmatpush3.bf16.msra.mxu1 %v7504_v18  ;;  %v6279_v47 = vcombine.low %v4815_v9, %v4818_v29  ;;  %v7509_v18 = vld [vmem:[#allocation2 + $0x78] sm:$0xff]   ;;  %v6281_v44 = vcombine.low %v4829_v28, %v4832_v41  ;;  %v4291_v5 = vrot.slane %v4192_v19, 5  ;;  %v4190_v41 = vld [vmem:[#allocation2 + $0x30] sm:$0xe]  ;;  %v4302_v28 = vrot.slane %v8568_v42, 5 }
 0x1d2   : > { %7045 = vmatprep.mubr.bf16.mxu0 %v6277_v45  ;;  %6981 = vmatprep.subr.bf16.mxu1 %v7507_v63  ;;  %v4734_v45 = vld [vmem:[#allocation2 + $0x84] sm:$0xc]  ;;  %v4738_v9 = vld [vmem:[#allocation2 + $0x9c] sm:$0xc]  ;;  %v6187_v26 = vrot.slane %v4190_v41, 9 }
 0x1d3   : > { %v6252_v8 = vrot.slane %v4738_v9, 10  ;;  %v4304_v56 = vrot.slane %v4302_v28, 4 }
 0x1d4   : > { %6950 = vmatmul.mubr.bf16.gmra.mrb[4].mxu1 %v7505_v31  ;;  %v6250_v31 = vrot.slane %v4734_v45, 10  ;;  %v4193_v45 = vld [vmem:[#allocation2 + $0x3c] sm:$0xe] }
 0x1d5   : > { %6953 = vmatprep.mubr.bf16.mxu1 %v7506_v2  ;;  %6982 = vmatpush3.bf16.msra.mxu1 %v7507_v63  ;;  %v4838_v63 = vrot.slane %v4735_v0, 6  ;;  %v6251_v2 = vrot.slane %v4736_v22, 10  ;;  %v4850_v24 = vsel %vm8253_vm9, %v6252_v8, %v4849_v55  ;;  %v4295_v0 = vrot.slane %v8564_v60, 5  ;;  %v4196_v60 = vld [vmem:[#allocation2 + $0x48] sm:$0xe] }
 0x1d6   : > { %6983 = vmatprep.subr.bf16.mxu1 %v7510_v23  ;;  %v4836_v29 = vsel %vm8253_vm9, %v6250_v31, %v4835_v36  ;;  %v6188_v22 = vrot.slane %v4193_v45, 9  ;;  %v6189_v42 = vrot.slane %v4196_v60, 9  ;;  %v4323_v8 = vrot.slane %v8601_v33, 5  ;;  %v4211_v45 = vld [vmem:[#allocation2 + $0x84] sm:$0xe] }
 0x1d7   : > { %v4843_v20 = vsel %vm8253_vm9, %v6251_v2, %v4842_v37  ;;  %v7523_v37 = vld [vmem:[#allocation2 + $0xe4] sm:$0xff]   ;;  %v8708_v60 = vld [vmem:[#allocation2 + $0xac] sm:$0xf] }
 0x1d8   : > { %v6283_v61 = vcombine.low %v4843_v20, %v4846_v35  ;;  %v4296_v55 = vsel %vm7764_vm3, %v6188_v22, %v4295_v0  ;;  %v4204_v2 = vld [vmem:[#allocation2 + $0x68] sm:$0x1]  ;;  %v4325_v33 = vrot.slane %v4323_v8, 4 }
 0x1d9   : > { %7046 = vmatmul.mubr.bf16.gmra.mrb[68].mxu0 %v6278_v21  ;;  %6984 = vmatpush3.bf16.msra.mxu1 %v7510_v23  ;;  %v4839_v23 = vsel %vm8253_vm9, %v4837_v39, %v4838_v63  ;;  %v4852_v21 = vrot.slane %v4739_v12, 6  ;;  %v4297_v39 = vrot.slane %v4295_v0, 4  ;;  %v4303_v12 = vsel %vm7764_vm3, %v6189_v42, %v4302_v28 }
 0x1da   : > { %7049 = vmatprep.mubr.bf16.mxu0 %v6279_v47  ;;  %6985 = vmatprep.subr.bf16.mxu1 %v7513_v3  ;;  %v6282_v48 = vcombine.low %v4836_v29, %v4839_v23  ;;  %v7549_v47 = vld [vmem:[%s9213_s4 + $0x200] sm:$0xff]   ;;  %v4201_v23 = vld [vmem:[#allocation2 + $0x5c] sm:$0x1]  ;;  %v4344_v28 = vrot.slane %v8623_v59, 5  ;;  %v4214_v59 = vld [vmem:[#allocation2 + $0x90] sm:$0xe] }
 0x1db   : > { %v4853_v6 = vsel %vm8253_vm9, %v4851_v1, %v4852_v21  ;;  %v4312_v20 = vrot.slane %v4201_v23, 5  ;;  %v4319_v1 = vrot.slane %v4204_v2, 5  ;;  %v4202_v21 = vld [vmem:[#allocation2 + $0x60] sm:$0xe]  ;;  %v4358_v23 = vrot.slane %v8708_v60, 5 }
 0x1dc   : > { %6954 = vmatmul.mubr.bf16.gmra.mrb[8].mxu1 %v7508_v13  ;;  %v6284_v27 = vcombine.low %v4850_v24, %v4853_v6  ;;  %v7518_v13 = vld [vmem:[#allocation2 + $0xc0] sm:$0xff]   ;;  %v6191_v6 = vrot.slane %v4202_v21, 9  ;;  %v4207_v24 = vld [vmem:[#allocation2 + $0x74] sm:$0x1] }
 0x1dd   : > { %6957 = vmatprep.mubr.bf16.mxu1 %v7509_v18  ;;  %6986 = vmatpush3.bf16.msra.mxu1 %v7513_v3  ;;  %v7514_v3 = vld [vmem:[#allocation2 + $0x9c] sm:$0xff]   ;;  %v7520_v18 = vld [vmem:[#allocation2 + $0xcc] sm:$0xff]   ;;  %v4326_v19 = vrot.slane %v4207_v24, 5  ;;  %v4228_v24 = vld [vmem:[#allocation2 + $0xc8] sm:$0x1] }
 0x1de   : > { %6987 = vmatprep.subr.bf16.mxu1 %v7516_v7 }
 0x1df   : > { %v4327_v0 = vsel %vm7764_vm3, %v4325_v33, %v4326_v19  ;;  %v4226_v33 = vld [vmem:[#allocation2 + $0xc0] sm:$0xe] }
 0x1e1   : > { %7050 = vmatmul.mubr.bf16.gmra.mrb[72].mxu0 %v6280_v43  ;;  %6988 = vmatpush3.bf16.msra.mxu1 %v7516_v7  ;;  %v4288_v7 = vrot.slane %v8549_v57, 5  ;;  %v4195_v43 = vld [vmem:[#allocation2 + $0x44] sm:$0x1] }
 0x1e2   : > { %7053 = vmatprep.mubr.bf16.mxu0 %v6281_v44  ;;  %6989 = vmatprep.subr.bf16.mxu1 %v7519_v32  ;;  %v4298_v63 = vrot.slane %v4195_v43, 5  ;;  %v4213_v43 = vld [vmem:[#allocation2 + $0x8c] sm:$0x1] }
 0x1e3   : > { %v4290_v36 = vrot.slane %v4288_v7, 4  ;;  %v4289_v57 = vsel %vm7764_vm3, %v6187_v26, %v4288_v7 }
 0x1e4   : > { %6958 = vmatmul.mubr.bf16.gmra.mrb[12].mxu1 %v7511_v30  ;;  %v4299_v30 = vsel %vm7764_vm3, %v4297_v39, %v4298_v63  ;;  %v4340_v63 = vrot.slane %v4213_v43, 5  ;;  %v4231_v43 = vld [vmem:[#allocation2 + $0xd4] sm:$0x1] }
 0x1e5   : > { %6961 = vmatprep.mubr.bf16.mxu1 %v7512_v38  ;;  %6990 = vmatpush3.bf16.msra.mxu1 %v7519_v32  ;;  %v4292_v40 = vsel %vm7764_vm3, %v4290_v36, %v4291_v5  ;;  %v4198_v32 = vld [vmem:[#allocation2 + $0x50] sm:$0x1]  ;;  %v4316_v38 = vrot.slane %v8582_v11, 5  ;;  %v6220_v35 = vcombine.low %v4296_v55, %v4299_v30  ;;  %v7550_v11 = vld [vmem:[%s9213_s4 + $0x208] sm:$0xff]   ;;  %v4351_v30 = vrot.slane %v8641_v16, 5 }
 0x1e6   : > { %6991 = vmatprep.subr.bf16.mxu1 %v7522_v15  ;;  %v6219_v44 = vcombine.low %v4289_v57, %v4292_v40  ;;  %v4305_v25 = vrot.slane %v4198_v32, 5 }
 0x1e7   : > { %v4317_v7 = vsel %vm7764_vm3, %v6191_v6, %v4316_v38 }
 0x1e8   : > { %v4306_v31 = vsel %vm7764_vm3, %v4304_v56, %v4305_v25  ;;  %v4346_v56 = vrot.slane %v4344_v28, 4 }
 0x1e9   : > { %7054 = vmatmul.mubr.bf16.gmra.mrb[76].mxu0 %v6282_v48  ;;  %6992 = vmatpush3.bf16.msra.mxu1 %v7522_v15  ;;  %v4309_v15 = vrot.slane %v8580_v14, 5  ;;  %v6221_v29 = vcombine.low %v4303_v12, %v4306_v31  ;;  %v4199_v14 = vld [vmem:[#allocation2 + $0x54] sm:$0xe]  ;;  %v4219_v31 = vld [vmem:[#allocation2 + $0xa4] sm:$0x1] }
 0x1ea   : > { %7057 = vmatprep.mubr.bf16.mxu0 %v6283_v61  ;;  %7121 = vmatprep.subr.bf16.mxu1 %v7549_v47  ;;  %v4318_v61 = vrot.slane %v4316_v38, 4  ;;  %v6190_v9 = vrot.slane %v4199_v14, 9  ;;  %v4222_v38 = vld [vmem:[#allocation2 + $0xb0] sm:$0x1]  ;;  %v4354_v12 = vrot.slane %v4219_v31, 5 }
 0x1eb   : > { %v4311_v48 = vrot.slane %v4309_v15, 4  ;;  %v8723_v14 = vld [vmem:[#allocation2 + $0xb8] sm:$0xf] }
 0x1ec   : > { %6962 = vmatmul.mubr.bf16.gmra.mrb[16].mxu1 %v7514_v3 }
 0x1ed   : > { %6965 = vmatprep.mubr.bf16.mxu1 %v7515_v62  ;;  %v4313_v3 = vsel %vm7764_vm3, %v4311_v48, %v4312_v20  ;;  %v4320_v62 = vsel %vm7764_vm3, %v4318_v61, %v4319_v1  ;;  %v4360_v48 = vrot.slane %v4358_v23, 4  ;;  %v4361_v20 = vrot.slane %v4222_v38, 5  ;;  %v4220_v61 = vld [vmem:[#allocation2 + $0xa8] sm:$0xe]  ;;  %v8725_v1 = vld [vmem:[#allocation2 + $0xc4] sm:$0xf] }
 0x1ee   : > { %v4372_v6 = vrot.slane %v8725_v1, 5 }
 0x1f0   : > { %v4374_v19 = vrot.slane %v4372_v6, 4 }
 0x1f1   : > { %7058 = vmatmul.mubr.bf16.gmra.mrb[80].mxu0 %v6284_v27  ;;  %v4310_v27 = vsel %vm7764_vm3, %v6190_v9, %v4309_v15  ;;  %v6195_v15 = vrot.slane %v4214_v59, 9  ;;  %v6197_v9 = vrot.slane %v4220_v61, 9 }
 0x1f3   : > { %v4345_v2 = vsel %vm7764_vm3, %v6195_v15, %v4344_v28  ;;  %v4235_v15 = vld [vmem:[#allocation2 + $0xe4] sm:$0xe] }
 0x1f4   : > { %6966 = vmatmul.mubr.bf16.gmra.mrb[20].mxu1 %v7517_v58  ;;  %v4210_v58 = vld [vmem:[#allocation2 + $0x80] sm:$0x1] }
 0x1f5   : > { %6969 = vmatprep.mubr.bf16.mxu1 %v7518_v13  ;;  %v6222_v13 = vcombine.low %v4310_v27, %v4313_v3  ;;  %v4333_v5 = vrot.slane %v4210_v58, 5  ;;  %v4362_v3 = vsel %vm7764_vm3, %v4360_v48, %v4361_v20  ;;  %v4223_v58 = vld [vmem:[#allocation2 + $0xb4] sm:$0xe] }
 0x1fc   : > { %6970 = vmatmul.mubr.bf16.gmra.mrb[24].mxu1 %v7520_v18  ;;  %v4205_v18 = vld [vmem:[#allocation2 + $0x6c] sm:$0xe] }
 0x1fd   : > { %6973 = vmatprep.mubr.bf16.mxu1 %v7521_v17  ;;  %v6223_v17 = vcombine.low %v4317_v7, %v4320_v62  ;;  %v6192_v41 = vrot.slane %v4205_v18, 9  ;;  %v4375_v18 = vrot.slane %v4228_v24, 5 }
 0x1ff   : > { %v4324_v32 = vsel %vm7764_vm3, %v6192_v41, %v4323_v8  ;;  %v4225_v8 = vld [vmem:[#allocation2 + $0xbc] sm:$0x1]  ;;  %v6199_v41 = vrot.slane %v4226_v33, 9  ;;  %v7525_v33 = vld [vmem:[%s9216_s7 + $0x8] sm:$0xff]  }
 0x200   : > { %v6224_v57 = vcombine.low %v4324_v32, %v4327_v0  ;;  %v4368_v7 = vrot.slane %v4225_v8, 5  ;;  %v4870_v8 = vrot.slane %v8725_v1, 6  ;;  %v7524_v1 = vld [vmem:[%s9216_s7] sm:$0xff]  }
 0x201   : > { %v4373_v32 = vsel %vm7764_vm3, %v6199_v41, %v4372_v6  ;;  %v4745_v6 = vld [vmem:[#allocation2 + $0xc8] sm:$0x3]  ;;  %7073 = vmatprep.subr.bf16.mxu0 %v7524_v1 }
 0x202   : > { %7074 = vmatpush3.bf16.msra.mxu0 %v7524_v1 }
 0x203   : > { %7075 = vmatprep.subr.bf16.mxu0 %v7525_v33 }
 0x204   : > { %6974 = vmatmul.mubr.bf16.gmra.mrb[28].mxu1 %v7523_v37  ;;  %v4337_v37 = vrot.slane %v8621_v51, 5 }
 0x205   : > { %6993 = vmatprep.mubr.bf16.mxu1 %v6219_v44 }
 0x206   : > { %v4339_v39 = vrot.slane %v4337_v37, 4  ;;  %7076 = vmatpush3.bf16.msra.mxu0 %v7525_v33 }
 0x208   : > { %v4341_v22 = vsel %vm7764_vm3, %v4339_v39, %v4340_v63  ;;  %v8754_v39 = vld [vmem:[#allocation2 + $0xe8] sm:$0xf] }
 0x209   : > { %v4393_v59 = vrot.slane %v8754_v39, 5 }
 0x20c   : > { %6994 = vmatmul.mubr.bf16.vlgmr.msra.gmra.mrb[0].mxu1 %v6220_v35  ;;  %v4353_v35 = vrot.slane %v4351_v30, 4 }
 0x20d   : > { %7129 = vmatpush3.bf16.msra.mxu1 %v7549_v47  ;;  %6997 = vmatprep.mubr.bf16.mxu1 %v6221_v29  ;;  %v4330_v47 = vrot.slane %v8603_v46, 5  ;;  %v4208_v46 = vld [vmem:[#allocation2 + $0x78] sm:$0xe]  ;;  %v4217_v29 = vld [vmem:[#allocation2 + $0x9c] sm:$0xe] }
 0x20e   : > { %7122 = vmatprep.subr.bf16.mxu1 %v7550_v11  ;;  %v6193_v26 = vrot.slane %v4208_v46, 9  ;;  %v4355_v21 = vsel %vm7764_vm3, %v4353_v35, %v4354_v12  ;;  %v4741_v35 = vld [vmem:[#allocation2 + $0xb0] sm:$0x3] }
 0x20f   : > { %v4332_v36 = vrot.slane %v4330_v47, 4  ;;  %v4859_v48 = vrot.slane %v4741_v35, 6 }
 0x210   : > { %v4331_v44 = vsel %vm7764_vm3, %v6193_v26, %v4330_v47  ;;  %v4359_v47 = vsel %vm7764_vm3, %v6197_v9, %v4358_v23  ;;  %v4234_v26 = vld [vmem:[#allocation2 + $0xe0] sm:$0x1] }
 0x211   : > { %7130 = vmatpush3.bf16.msra.mxu1 %v7550_v11  ;;  %v4334_v40 = vsel %vm7764_vm3, %v4332_v36, %v4333_v5  ;;  %v4365_v11 = vrot.slane %v8723_v14, 5  ;;  %v6229_v27 = vcombine.low %v4359_v47, %v4362_v3  ;;  %v8742_v36 = vld [vmem:[#allocation2 + $0xd0] sm:$0xf]  ;;  %v6198_v5 = vrot.slane %v4223_v58, 9  ;;  %v4743_v3 = vld [vmem:[#allocation2 + $0xbc] sm:$0x3] }
 0x212   : > { %7123 = vmatprep.subr.bf16.mxu1 %v8339_v52  ;;  %v6225_v51 = vcombine.low %v4331_v44, %v4334_v40  ;;  %v4379_v0 = vrot.slane %v8742_v36, 5  ;;  %v4376_v40 = vsel %vm7764_vm3, %v4374_v19, %v4375_v18  ;;  %v4742_v47 = vld [vmem:[#allocation2 + $0xb4] sm:$0xc]  ;;  %v4866_v10 = vrot.slane %v4743_v3, 6 }
 0x213   : > { %v4366_v28 = vsel %vm7764_vm3, %v6198_v5, %v4365_v11  ;;  %v6231_v63 = vcombine.low %v4373_v32, %v4376_v40  ;;  %v4872_v58 = vrot.slane %v4870_v8, 4  ;;  %v4877_v5 = vrot.slane %v8742_v36, 6  ;;  %v7526_v36 = vld [vmem:[%s9216_s7 + $0x10] sm:$0xff]  }
 0x214   : > { %6998 = vmatmul.mubr.bf16.gmra.mrb[4].mxu1 %v6222_v13  ;;  %v4367_v13 = vrot.slane %v4365_v11, 4  ;;  %7077 = vmatprep.subr.bf16.mxu0 %v7526_v36 }
 0x215   : > { %7001 = vmatprep.mubr.bf16.mxu1 %v6223_v17  ;;  %7131 = vmatpush3.bf16.msra.mxu1 %v8339_v52  ;;  %v4216_v52 = vld [vmem:[#allocation2 + $0x98] sm:$0x1]  ;;  %v8740_v17 = vld [vmem:[#allocation2 + $0xdc] sm:$0xf] }
 0x216   : > { %7124 = vmatprep.subr.bf16.mxu1 %v8368_v4  ;;  %v4347_v25 = vrot.slane %v4216_v52, 5  ;;  %v4369_v46 = vsel %vm7764_vm3, %v4367_v13, %v4368_v7  ;;  %v6254_v13 = vrot.slane %v4742_v47, 10  ;;  %v4884_v7 = vrot.slane %v8740_v17, 6  ;;  %7078 = vmatpush3.bf16.msra.mxu0 %v7526_v36 }
 0x217   : > { %v6230_v52 = vcombine.low %v4366_v28, %v4369_v46  ;;  %v4749_v46 = vld [vmem:[#allocation2 + $0xe0] sm:$0x3] }
 0x218   : > { %v4348_v42 = vsel %vm7764_vm3, %v4346_v56, %v4347_v25  ;;  %v4381_v56 = vrot.slane %v4379_v0, 4  ;;  %v4382_v25 = vrot.slane %v4231_v43, 5  ;;  %v4886_v43 = vrot.slane %v4884_v7, 4 }
 0x219   : > { %7132 = vmatpush3.bf16.msra.mxu1 %v8368_v4  ;;  %v6194_v4 = vrot.slane %v4211_v45, 9  ;;  %v6227_v16 = vcombine.low %v4345_v2, %v4348_v42  ;;  %v4229_v45 = vld [vmem:[#allocation2 + $0xcc] sm:$0xe]  ;;  %v4237_v42 = vld [vmem:[#allocation2 + $0xec] sm:$0x1]  ;;  %v4395_v2 = vrot.slane %v4393_v59, 4 }
 0x21a   : > { %7125 = vmatprep.subr.bf16.mxu1 %v8388_v34  ;;  %v4383_v31 = vsel %vm7764_vm3, %v4381_v56, %v4382_v25  ;;  %v4887_v28 = vrot.slane %v4749_v46, 6  ;;  %v4750_v25 = vld [vmem:[#allocation2 + $0xe4] sm:$0xc] }
 0x21c   : > { %7002 = vmatmul.mubr.bf16.gmra.mrb[8].mxu1 %v6224_v57  ;;  %v4888_v56 = vsel %vm8253_vm9, %v4886_v43, %v4887_v28 }
 0x21d   : > { %7005 = vmatprep.mubr.bf16.mxu1 %v6225_v51  ;;  %7133 = vmatpush3.bf16.msra.mxu1 %v8388_v34  ;;  %v4338_v34 = vsel %vm7764_vm3, %v6194_v4, %v4337_v37  ;;  %v4232_v37 = vld [vmem:[#allocation2 + $0xd8] sm:$0xe]  ;;  %v4389_v51 = vrot.slane %v4234_v26, 5  ;;  %v6200_v4 = vrot.slane %v4229_v45, 9 }
 0x21e   : > { %7126 = vmatprep.subr.bf16.mxu1 %v8430_v53  ;;  %v6226_v55 = vcombine.low %v4338_v34, %v4341_v22  ;;  %v6201_v57 = vrot.slane %v4232_v37, 9  ;;  %v4856_v34 = vrot.slane %v8708_v60, 6 }
 0x21f   : > { %v4380_v23 = vsel %vm7764_vm3, %v6200_v4, %v4379_v0  ;;  %v7527_v4 = vld [vmem:[%s9216_s7 + $0x18] sm:$0xff]  }
 0x220   : > { %v6232_v12 = vcombine.low %v4380_v23, %v4383_v31  ;;  %7079 = vmatprep.subr.bf16.mxu0 %v7527_v4 }
 0x221   : > { %7134 = vmatpush3.bf16.msra.mxu1 %v8430_v53  ;;  %v6196_v53 = vrot.slane %v4217_v29, 9  ;;  %v4858_v29 = vrot.slane %v4856_v34, 4  ;;  %7080 = vmatpush3.bf16.msra.mxu0 %v7527_v4 }
 0x222   : > { %7127 = vmatprep.subr.bf16.mxu1 %v8463_v54 }
 0x223   : > { %v4352_v62 = vsel %vm7764_vm3, %v6196_v53, %v4351_v30  ;;  %v4740_v53 = vld [vmem:[#allocation2 + $0xa8] sm:$0xc]  ;;  %v4860_v9 = vsel %vm8253_vm9, %v4858_v29, %v4859_v48  ;;  %v7528_v29 = vld [vmem:[%s9216_s7 + $0x20] sm:$0xff]  }
 0x224   : > { %7006 = vmatmul.mubr.bf16.gmra.mrb[12].mxu1 %v6226_v55  ;;  %v6202_v55 = vrot.slane %v4235_v15, 9  ;;  %v6253_v11 = vrot.slane %v4740_v53, 10  ;;  %v6258_v15 = vrot.slane %v4750_v25, 10  ;;  %7081 = vmatprep.subr.bf16.mxu0 %v7528_v29  ;;  %v7530_v53 = vld [vmem:[%s9216_s7 + $0x30] sm:$0xff]  }
 0x225   : > { %7009 = vmatprep.mubr.bf16.mxu1 %v6227_v16  ;;  %7135 = vmatpush3.bf16.msra.mxu1 %v8463_v54  ;;  %v6228_v54 = vcombine.low %v4352_v62, %v4355_v21  ;;  %v4396_v16 = vrot.slane %v4237_v42, 5  ;;  %v4863_v21 = vrot.slane %v8723_v14, 6  ;;  %v4873_v14 = vrot.slane %v4745_v6, 6 }
 0x226   : > { %7128 = vmatprep.subr.bf16.mxu1 %v8492_v50  ;;  %v4394_v20 = vsel %vm7764_vm3, %v6202_v55, %v4393_v59  ;;  %v4857_v62 = vsel %vm8253_vm9, %v6253_v11, %v4856_v34  ;;  %v4751_v59 = vld [vmem:[#allocation2 + $0xec] sm:$0x3]  ;;  %7082 = vmatpush3.bf16.msra.mxu0 %v7528_v29 }
 0x227   : > { %v4397_v61 = vsel %vm7764_vm3, %v4395_v2, %v4396_v16  ;;  %v4865_v24 = vrot.slane %v4863_v21, 4  ;;  %v4874_v41 = vsel %vm8253_vm9, %v4872_v58, %v4873_v14  ;;  %v4864_v0 = vsel %vm8253_vm9, %v6254_v13, %v4863_v21 }
 0x228   : > { %v6234_v60 = vcombine.low %v4394_v20, %v4397_v61  ;;  %v4894_v31 = vrot.slane %v4751_v59, 6  ;;  %v7529_v20 = vld [vmem:[%s9216_s7 + $0x28] sm:$0xff]  }
 0x229   : > { %7136 = vmatpush3.bf16.msra.mxu1 %v8492_v50  ;;  %v4386_v50 = vrot.slane %v8740_v17, 5  ;;  %v4867_v19 = vsel %vm8253_vm9, %v4865_v24, %v4866_v10  ;;  %v4747_v17 = vld [vmem:[#allocation2 + $0xd4] sm:$0x3]  ;;  %7083 = vmatprep.subr.bf16.mxu0 %v7529_v20 }
 0x22a   : > { %v6286_v26 = vcombine.low %v4864_v0, %v4867_v19  ;;  %7084 = vmatpush3.bf16.msra.mxu0 %v7529_v20  ;;  %v8922_v20 = vld [vmem:[%s9215_s6] ss:$0 sm:$0xff] }
 0x22b   : > { %v4388_v44 = vrot.slane %v4386_v50, 4  ;;  %v4387_v22 = vsel %vm7764_vm3, %v6201_v57, %v4386_v50  ;;  %v4748_v50 = vld [vmem:[#allocation2 + $0xd8] sm:$0xc]  ;;  %v4879_v57 = vrot.slane %v4877_v5, 4  ;;  %7085 = vmatprep.subr.bf16.mxu0 %v7530_v53 }
 0x22c   : > { %7010 = vmatmul.mubr.bf16.gmra.mrb[16].mxu1 %v6228_v54  ;;  %v6285_v54 = vcombine.low %v4857_v62, %v4860_v9  ;;  %v6257_v40 = vrot.slane %v4748_v50, 10 }
 0x22d   : > { %7013 = vmatprep.mubr.bf16.mxu1 %v6229_v27  ;;  %v4390_v30 = vsel %vm7764_vm3, %v4388_v44, %v4389_v51  ;;  %v4744_v27 = vld [vmem:[#allocation2 + $0xc0] sm:$0xc]  ;;  %v4880_v44 = vrot.slane %v4747_v17, 6  ;;  %v4891_v51 = vrot.slane %v8754_v39, 6 }
 0x22e   : > { %v6233_v38 = vcombine.low %v4387_v22, %v4390_v30  ;;  %v6255_v18 = vrot.slane %v4744_v27, 10  ;;  %v4885_v45 = vsel %vm8253_vm9, %v6257_v40, %v4884_v7  ;;  %7086 = vmatpush3.bf16.msra.mxu0 %v7530_v53 }
 0x22f   : > { %v4881_v22 = vsel %vm8253_vm9, %v4879_v57, %v4880_v44  ;;  %v6289_v30 = vcombine.low %v4885_v45, %v4888_v56  ;;  %v4893_v42 = vrot.slane %v4891_v51, 4  ;;  %v4892_v34 = vsel %vm8253_vm9, %v6258_v15, %v4891_v51 }
 0x230   : > { %v4871_v37 = vsel %vm8253_vm9, %v6255_v18, %v4870_v8 }
 0x231   : > { %v6287_v32 = vcombine.low %v4871_v37, %v4874_v41 }
 0x234   : > { %7014 = vmatmul.mubr.bf16.gmra.mrb[20].mxu1 %v6230_v52  ;;  %v4746_v52 = vld [vmem:[#allocation2 + $0xcc] sm:$0xc] }
 0x235   : > { %7017 = vmatprep.mubr.bf16.mxu1 %v6231_v63  ;;  %v6256_v63 = vrot.slane %v4746_v52, 10 }
 0x237   : > { %v4878_v39 = vsel %vm8253_vm9, %v6256_v63, %v4877_v5 }
 0x238   : > { %v6288_v23 = vcombine.low %v4878_v39, %v4881_v22 }
 0x23c   : > { %7018 = vmatmul.mubr.bf16.gmra.mrb[24].mxu1 %v6232_v12 }
 0x23d   : > { %7021 = vmatprep.mubr.bf16.mxu1 %v6233_v38  ;;  %v4895_v38 = vsel %vm8253_vm9, %v4893_v42, %v4894_v31  ;;  %v8915_v31 = vld [vmem:[%s9214_s5] ss:$0 sm:$0xff] }
 0x23e   : > { %v6290_v55 = vcombine.low %v4892_v34, %v4895_v38 }
 0x244   : > { %7022 = vmatmul.mubr.bf16.gmra.mrb[28].mxu1 %v6234_v60  ;;  %v7531_v60 = vld [vmem:[%s9216_s7 + $0x38] sm:$0xff]  }
 0x245   : > { %7061 = vmatprep.mubr.bf16.mxu1 %v6285_v54  ;;  %7087 = vmatprep.subr.bf16.mxu0 %v7531_v60 }
 0x246   : > { %7088 = vmatpush3.bf16.msra.mxu0 %v7531_v60 }
 0x24c   : > { %7062 = vmatmul.mubr.bf16.vlgmr.msra.gmra.mrb[20].mxu1 %v6286_v26 }
 0x24d   : > { %7065 = vmatprep.mubr.bf16.mxu1 %v6287_v32 }
 0x254   : > { %7066 = vmatmul.mubr.bf16.gmra.mrb[24].mxu1 %v6288_v23 }
 0x255   : > { %7069 = vmatprep.mubr.bf16.mxu1 %v6289_v30 }
 0x25c   : > { %7070 = vmatmul.mubr.bf16.gmra.mrb[28].mxu1 %v6290_v55 }
 0x264   : > { %v8811_v2 = vpop.f32.mrb[32].mxu0 }
 0x265   : > { %v8813_v16 = vpop.f32.mrb[33].mxu0 }
 0x266   : > { %v8815_v35 = vpop.f32.mrb[34].mxu0 }
 0x267   : > { %v8817_v12 = vpop.f32.mrb[35].mxu0 }
 0x26c   : > { %v8822_v48 = vpop.f32.mrb[36].mxu0 }
 0x26d   : > { %v8824_v49 = vpop.f32.mrb[37].mxu0 }
 0x26e   : > { %v8829_v61 = vpop.f32.mrb[38].mxu0 }
 0x26f   : > { %v8834_v21 = vpop.f32.mrb[39].mxu0 }
 0x274   : > { %v8839_v11 = vpop.f32.mrb[40].mxu0 }
 0x275   : > { %v8841_v9 = vpop.f32.mrb[41].mxu0 }
 0x276   : > { %v8843_v3 = vpop.f32.mrb[42].mxu0 }
 0x277   : > { %v8845_v8 = vpop.f32.mrb[43].mxu0 }
 0x27c   : > { %v8847_v6 = vpop.f32.mrb[44].mxu0 }
 0x27d   : > { %v8849_v62 = vpop.f32.mrb[45].mxu0 }
 0x27e   : > { %v8851_v24 = vpop.f32.mrb[46].mxu0 }
 0x27f   : > { %v8853_v54 = vpop.f32.mrb[47].mxu0 }
 0x284   : > { %v8855_v47 = vpop.f32.mrb[48].mxu0 }
 0x285   : > { %v8857_v10 = vpop.f32.mrb[49].mxu0 }
 0x286   : > { %v8859_v27 = vpop.f32.mrb[50].mxu0 }
 0x287   : > { %v8861_v58 = vpop.f32.mrb[51].mxu0 }
 0x28c   : > { %v8863_v14 = vpop.f32.mrb[52].mxu0 }
 0x28d   : > { %v8865_v13 = vpop.f32.mrb[53].mxu0 }
 0x28e   : > { %v8867_v7 = vpop.f32.mrb[54].mxu0 }
 0x28f   : > { %v8869_v1 = vpop.f32.mrb[55].mxu0 }
 0x294   : > { %v8871_v33 = vpop.f32.mrb[56].mxu0 }
 0x295   : > { %v8873_v19 = vpop.f32.mrb[57].mxu0 }
 0x296   : > { %v8875_v18 = vpop.f32.mrb[58].mxu0 }
 0x297   : > { %v8877_v5 = vpop.f32.mrb[59].mxu0 }
 0x29c   : > { %v8879_v50 = vpop.f32.mrb[60].mxu0 }
 0x29d   : > { %v8881_v46 = vpop.f32.mrb[61].mxu0 }
 0x29e   : > { %9226 = vst [vmem:[#allocation3_spill] sm:$0xff] %v8881_v46  ;;  %v8883_v41 = vpop.f32.mrb[62].mxu0 }
 0x29f   : > { %9227 = vst [vmem:[#allocation4_spill] sm:$0xff] %v8883_v41  ;;  %v8885_v17 = vpop.f32.mrb[63].mxu0 }
 0x2a0   : > { %9228 = vst [vmem:[#allocation5_spill] sm:$0xff] %v8885_v17 }
 0x2a4   : > { %v7043_v0 = vpop.f32.mrb[64].mxu0 }
 0x2a5   : > { %v5059_v37 = vpop.f32.mrb[65].mxu0 }
 0x2a6   : > { %v7044_v26 = vpop.f32.mrb[66].mxu0 }
 0x2a7   : > { %v5062_v40 = vpop.f32.mrb[67].mxu0 }
 0x2ac   : > { %v7047_v43 = vpop.f32.mrb[68].mxu0 }
 0x2ad   : > { %v5075_v28 = vpop.f32.mrb[69].mxu0 }
 0x2ae   : > { %v7048_v36 = vpop.f32.mrb[70].mxu0 }
 0x2af   : > { %v5078_v32 = vpop.f32.mrb[71].mxu0 }
 0x2b4   : > { %v8887_v52 = vpop.f32.mrb[72].mxu0 }
 0x2b5   : > { %v8889_v57 = vpop.f32.mrb[73].mxu0 }
 0x2b6   : > { %v8891_v44 = vpop.f32.mrb[74].mxu0 }
 0x2b7   : > { %v8893_v51 = vpop.f32.mrb[75].mxu0 }
 0x2bc   : > { %v8895_v63 = vpop.f32.mrb[76].mxu0 }
 0x2bd   : > { %v8897_v45 = vpop.f32.mrb[77].mxu0 }
 0x2be   : > { %v8899_v56 = vpop.f32.mrb[78].mxu0 }
 0x2bf   : > { %v8901_v25 = vpop.f32.mrb[79].mxu0 }
 0x2c4   : > { %v8903_v59 = vpop.f32.mrb[80].mxu0 }
 0x2c5   : > { %v8905_v4 = vpop.f32.mrb[81].mxu0 }
 0x2c6   : > { %v8907_v22 = vpop.f32.mrb[82].mxu0 }
 0x2c7   : > { %v8909_v39 = vpop.f32.mrb[83].mxu0 }
 0x2df   : > { %v6995_v30 = vpop.f32.mrb[0].mxu1 }
 0x2e0   : > { %v7137_v15 = vadd.f32 %v6995_v30, %v8811_v2  ;;  %v4561_v42 = vpop.f32.mrb[1].mxu1 }
 0x2e1   : > { %v7139_v23 = vadd.f32 %v4561_v42, %v8813_v16  ;;  %v6996_v34 = vpop.f32.mrb[2].mxu1 }
 0x2e2   : > { %v7138_v38 = vadd.f32 %v7137_v15, %v7043_v0  ;;  %v7141_v55 = vadd.f32 %v6996_v34, %v8815_v35  ;;  %v4564_v29 = vpop.f32.mrb[3].mxu1 }
 0x2e3   : > { %v7140_v53 = vadd.f32 %v7139_v23, %v5059_v37  ;;  %v7143_v2 = vadd.f32 %v4564_v29, %v8817_v12 }
 0x2e4   : > { %v5227_v60 = vmul.f32 %v7138_v38, %v8915_v31  ;;  %v7142_v30 = vadd.f32 %v7141_v55, %v7044_v26 }
 0x2e5   : > { %v5225_v17 = vmul.f32 %v7140_v53, %v8915_v31  ;;  %v7144_v41 = vadd.f32 %v7143_v2, %v5062_v40 }
 0x2e6   : > { %v5266_v16 = vadd.f32 %v8922_v20, %v5227_v60  ;;  %v5228_v0 = vmul.f32 %v7142_v30, %v8915_v31 }
 0x2e7   : > { %v5226_v35 = vmul.f32 %v7144_v41, %v8915_v31  ;;  %v6999_v15 = vpop.f32.mrb[4].mxu1  ;;  %v5264_v42 = vadd.f32 %v8922_v20, %v5225_v17 }
 0x2e8   : > { %v5267_v34 = vadd.f32 %v8922_v20, %v5228_v0  ;;  %v7145_v37 = vadd.f32 %v6999_v15, %v8822_v48  ;;  %v4577_v12 = vpop.f32.mrb[5].mxu1  ;;  %v5298_v40 = vmax.f32 %v5266_v16, 0.0 }
 0x2e9   : > { %v7147_v23 = vadd.f32 %v4577_v12, %v8824_v49  ;;  %v7000_v26 = vpop.f32.mrb[6].mxu1  ;;  %v5265_v38 = vadd.f32 %v8922_v20, %v5226_v35  ;;  %v5296_v17 = vmax.f32 %v5264_v42, 0.0 }
 0x2ea   : > { %v5299_v55 = vmax.f32 %v5267_v34, 0.0  ;;  %v7146_v29 = vadd.f32 %v7145_v37, %v7047_v43  ;;  %v7149_v53 = vadd.f32 %v7000_v26, %v8829_v61  ;;  %v4580_v2 = vpop.f32.mrb[7].mxu1 }
 0x2eb   : > { %v7148_v41 = vadd.f32 %v7147_v23, %v5075_v28  ;;  %v7151_v60 = vadd.f32 %v4580_v2, %v8834_v21  ;;  %v5297_v30 = vmax.f32 %v5265_v38, 0.0 }
 0x2ec   : > { %v5329_v0 = vpack.c.bf16 %v5299_v55, %v5298_v40  ;;  %v5231_v48 = vmul.f32 %v7146_v29, %v8915_v31  ;;  %v7150_v15 = vadd.f32 %v7149_v53, %v7048_v36 }
 0x2ed   : > { %v5229_v49 = vmul.f32 %v7148_v41, %v8915_v31  ;;  %v7152_v12 = vadd.f32 %v7151_v60, %v5078_v32  ;;  %v5328_v46 = vpack.c.bf16 %v5297_v30, %v5296_v17 }
 0x2ee   : > { %v5232_v16 = vmul.f32 %v7150_v15, %v8915_v31  ;;  %v5270_v43 = vadd.f32 %v8922_v20, %v5231_v48 }
 0x2ef   : > { %v5230_v61 = vmul.f32 %v7152_v12, %v8915_v31  ;;  %v7003_v35 = vpop.f32.mrb[8].mxu1  ;;  %7089 = vmatprep.mubr.bf16.mxu0 %v5328_v46  ;;  %v5268_v21 = vadd.f32 %v8922_v20, %v5229_v49 }
 0x2f0   : > { %v7153_v28 = vadd.f32 %v7003_v35, %v8839_v11  ;;  %v4593_v42 = vpop.f32.mrb[9].mxu1  ;;  %7090 = vmatmul.mubr.bf16.vlgmr.msra.gmra.mrb[84].mxu0 %v5329_v0  ;;  %v5271_v36 = vadd.f32 %v8922_v20, %v5232_v16  ;;  %v5302_v40 = vmax.f32 %v5270_v43, 0.0 }
 0x2f1   : > { %v7155_v34 = vadd.f32 %v4593_v42, %v8841_v9  ;;  %v7004_v32 = vpop.f32.mrb[10].mxu1  ;;  %v5269_v37 = vadd.f32 %v8922_v20, %v5230_v61  ;;  %v5300_v29 = vmax.f32 %v5268_v21, 0.0 }
 0x2f2   : > { %v7154_v23 = vadd.f32 %v7153_v28, %v8887_v52  ;;  %v7157_v26 = vadd.f32 %v7004_v32, %v8843_v3  ;;  %v4596_v38 = vpop.f32.mrb[11].mxu1  ;;  %v5303_v46 = vmax.f32 %v5271_v36, 0.0 }
 0x2f3   : > { %v7156_v55 = vadd.f32 %v7155_v34, %v8889_v57  ;;  %v7159_v11 = vadd.f32 %v4596_v38, %v8845_v8  ;;  %v5301_v53 = vmax.f32 %v5269_v37, 0.0 }
 0x2f4   : > { %v5235_v2 = vmul.f32 %v7154_v23, %v8915_v31  ;;  %v7158_v9 = vadd.f32 %v7157_v26, %v8891_v44  ;;  %v5331_v41 = vpack.c.bf16 %v5303_v46, %v5302_v40 }
 0x2f5   : > { %v5233_v60 = vmul.f32 %v7156_v55, %v8915_v31  ;;  %v7160_v52 = vadd.f32 %v7159_v11, %v8893_v51  ;;  %v5330_v17 = vpack.c.bf16 %v5301_v53, %v5300_v29 }
 0x2f6   : > { %v5236_v3 = vmul.f32 %v7158_v9, %v8915_v31  ;;  %v5274_v30 = vadd.f32 %v8922_v20, %v5235_v2 }
 0x2f7   : > { %v5234_v57 = vmul.f32 %v7160_v52, %v8915_v31  ;;  %v7007_v0 = vpop.f32.mrb[12].mxu1  ;;  %7093 = vmatprep.mubr.bf16.mxu0 %v5330_v17  ;;  %v5272_v8 = vadd.f32 %v8922_v20, %v5233_v60 }
 0x2f8   : > { %v7161_v48 = vadd.f32 %v7007_v0, %v8847_v6  ;;  %v4609_v15 = vpop.f32.mrb[13].mxu1  ;;  %7094 = vmatmul.mubr.bf16.gmra.mrb[88].mxu0 %v5331_v41  ;;  %v5275_v44 = vadd.f32 %v8922_v20, %v5236_v3  ;;  %v5306_v35 = vmax.f32 %v5274_v30, 0.0 }
 0x2f9   : > { %v7163_v49 = vadd.f32 %v4609_v15, %v8849_v62  ;;  %v7008_v51 = vpop.f32.mrb[14].mxu1  ;;  %v5273_v12 = vadd.f32 %v8922_v20, %v5234_v57  ;;  %v5304_v42 = vmax.f32 %v5272_v8, 0.0 }
 0x2fa   : > { %v7162_v16 = vadd.f32 %v7161_v48, %v8895_v63  ;;  %v7165_v43 = vadd.f32 %v7008_v51, %v8851_v24  ;;  %v4612_v61 = vpop.f32.mrb[15].mxu1  ;;  %v5307_v21 = vmax.f32 %v5275_v44, 0.0 }
 0x2fb   : > { %v7164_v28 = vadd.f32 %v7163_v49, %v8897_v45  ;;  %v7167_v6 = vadd.f32 %v4612_v61, %v8853_v54  ;;  %v5305_v36 = vmax.f32 %v5273_v12, 0.0 }
 0x2fc   : > { %v5239_v34 = vmul.f32 %v7162_v16, %v8915_v31  ;;  %v7166_v62 = vadd.f32 %v7165_v43, %v8899_v56  ;;  %v5333_v32 = vpack.c.bf16 %v5307_v21, %v5306_v35 }
 0x2fd   : > { %v5237_v37 = vmul.f32 %v7164_v28, %v8915_v31  ;;  %v7168_v63 = vadd.f32 %v7167_v6, %v8901_v25  ;;  %v5332_v23 = vpack.c.bf16 %v5305_v36, %v5304_v42 }
 0x2fe   : > { %v5240_v24 = vmul.f32 %v7166_v62, %v8915_v31  ;;  %v5278_v26 = vadd.f32 %v8922_v20, %v5239_v34 }
 0x2ff   : > { %v5238_v45 = vmul.f32 %v7168_v63, %v8915_v31  ;;  %v7011_v38 = vpop.f32.mrb[16].mxu1  ;;  %7097 = vmatprep.mubr.bf16.mxu0 %v5332_v23  ;;  %v5276_v54 = vadd.f32 %v8922_v20, %v5237_v37 }
 0x300   : > { %v7169_v40 = vadd.f32 %v7011_v38, %v8855_v47  ;;  %v4625_v46 = vpop.f32.mrb[17].mxu1  ;;  %7098 = vmatmul.mubr.bf16.gmra.mrb[92].mxu0 %v5333_v32  ;;  %v5279_v56 = vadd.f32 %v8922_v20, %v5240_v24  ;;  %v5310_v9 = vmax.f32 %v5278_v26, 0.0 }
 0x301   : > { %v7171_v55 = vadd.f32 %v4625_v46, %v8857_v10  ;;  %v7012_v25 = vpop.f32.mrb[18].mxu1  ;;  %v5277_v11 = vadd.f32 %v8922_v20, %v5238_v45  ;;  %v5308_v52 = vmax.f32 %v5276_v54, 0.0 }
 0x302   : > { %v7170_v29 = vadd.f32 %v7169_v40, %v8903_v59  ;;  %v7173_v53 = vadd.f32 %v7012_v25, %v8859_v27  ;;  %v4628_v2 = vpop.f32.mrb[19].mxu1  ;;  %v5311_v41 = vmax.f32 %v5279_v56, 0.0 }
 0x303   : > { %v7172_v60 = vadd.f32 %v7171_v55, %v8905_v4  ;;  %v7175_v47 = vadd.f32 %v4628_v2, %v8861_v58  ;;  %v5309_v17 = vmax.f32 %v5277_v11, 0.0 }
 0x304   : > { %v5243_v3 = vmul.f32 %v7170_v29, %v8915_v31  ;;  %v7174_v10 = vadd.f32 %v7173_v53, %v8907_v22  ;;  %v5335_v30 = vpack.c.bf16 %v5311_v41, %v5310_v9 }
 0x305   : > { %v5241_v57 = vmul.f32 %v7172_v60, %v8915_v31  ;;  %v7176_v59 = vadd.f32 %v7175_v47, %v8909_v39  ;;  %v5334_v0 = vpack.c.bf16 %v5309_v17, %v5308_v52 }
 0x306   : > { %v5244_v27 = vmul.f32 %v7174_v10, %v8915_v31  ;;  %v5282_v8 = vadd.f32 %v8922_v20, %v5243_v3 }
 0x307   : > { %v5242_v4 = vmul.f32 %v7176_v59, %v8915_v31  ;;  %7101 = vmatprep.mubr.bf16.mxu0 %v5334_v0  ;;  %v5280_v58 = vadd.f32 %v8922_v20, %v5241_v57 }
 0x308   : > { %7102 = vmatmul.mubr.bf16.gmra.mrb[96].mxu0 %v5335_v30  ;;  %v5283_v48 = vadd.f32 %v8922_v20, %v5244_v27  ;;  %v5314_v15 = vmax.f32 %v5282_v8, 0.0  ;;  %v9229_v30 = vld [vmem:[#allocation3_spill] sm:$0xff]  ;;  %v9230_v27 = vld [vmem:[#allocation4_spill] sm:$0xff] }
 0x309   : > { %v5281_v22 = vadd.f32 %v8922_v20, %v5242_v4  ;;  %v5312_v49 = vmax.f32 %v5280_v58, 0.0 }
 0x30a   : > { %v5315_v44 = vmax.f32 %v5283_v48, 0.0 }
 0x30b   : > { %v5313_v51 = vmax.f32 %v5281_v22, 0.0  ;;  %v9231_v22 = vld [vmem:[#allocation5_spill] sm:$0xff] }
 0x30c   : > { %v5337_v39 = vpack.c.bf16 %v5315_v44, %v5314_v15 }
 0x30d   : > { %v5336_v12 = vpack.c.bf16 %v5313_v51, %v5312_v49 }
 0x30f   : > { %7105 = vmatprep.mubr.bf16.mxu0 %v5336_v12 }
 0x310   : > { %7106 = vmatmul.mubr.bf16.gmra.mrb[100].mxu0 %v5337_v39 }
 0x31f   : > { %v7063_v16 = vpop.f32.mrb[20].mxu1 }
 0x320   : > { %v7177_v43 = vadd.f32 %v7063_v16, %v8863_v14  ;;  %v5139_v61 = vpop.f32.mrb[21].mxu1 }
 0x321   : > { %v7178_v35 = vadd.f32 %v5139_v61, %v8865_v13  ;;  %v7064_v21 = vpop.f32.mrb[22].mxu1 }
 0x322   : > { %v5247_v28 = vmul.f32 %v7177_v43, %v8915_v31  ;;  %v7179_v6 = vadd.f32 %v7064_v21, %v8867_v7  ;;  %v5142_v42 = vpop.f32.mrb[23].mxu1 }
 0x323   : > { %v5245_v36 = vmul.f32 %v7178_v35, %v8915_v31  ;;  %v7180_v34 = vadd.f32 %v5142_v42, %v8869_v1  ;;  %v9032_v42 = vld [vmem:[%s9217_s8] ss:$0 sm:$0xff] }
 0x324   : > { %v5286_v62 = vadd.f32 %v8922_v20, %v5247_v28  ;;  %v5248_v32 = vmul.f32 %v7179_v6, %v8915_v31 }
 0x325   : > { %v5284_v37 = vadd.f32 %v8922_v20, %v5245_v36  ;;  %v5246_v14 = vmul.f32 %v7180_v34, %v8915_v31 }
 0x326   : > { %v5287_v13 = vadd.f32 %v8922_v20, %v5248_v32  ;;  %v5318_v24 = vmax.f32 %v5286_v62, 0.0 }
 0x327   : > { %v5285_v63 = vadd.f32 %v8922_v20, %v5246_v14  ;;  %v7067_v23 = vpop.f32.mrb[24].mxu1  ;;  %v5316_v38 = vmax.f32 %v5284_v37, 0.0 }
 0x328   : > { %v5319_v7 = vmax.f32 %v5287_v13, 0.0  ;;  %v7181_v26 = vadd.f32 %v7067_v23, %v8871_v33  ;;  %v5155_v45 = vpop.f32.mrb[25].mxu1 }
 0x329   : > { %v5317_v1 = vmax.f32 %v5285_v63, 0.0  ;;  %v7182_v54 = vadd.f32 %v5155_v45, %v8873_v19  ;;  %v7068_v40 = vpop.f32.mrb[26].mxu1 }
 0x32a   : > { %v5251_v46 = vmul.f32 %v7181_v26, %v8915_v31  ;;  %v7183_v56 = vadd.f32 %v7068_v40, %v8875_v18  ;;  %v5158_v55 = vpop.f32.mrb[27].mxu1  ;;  %v5339_v25 = vpack.c.bf16 %v5319_v7, %v5318_v24  ;;  %v7552_v40 = vld [vmem:[%s7675_s26] sm:$0xff] }
 0x32b   : > { %v5249_v11 = vmul.f32 %v7182_v54, %v8915_v31  ;;  %v7184_v29 = vadd.f32 %v5158_v55, %v8877_v5  ;;  %v5338_v53 = vpack.c.bf16 %v5317_v1, %v5316_v38  ;;  %v7551_v38 = vld [vmem:[%s7675_s26 + $0x10] sm:$0xff] }
 0x32c   : > { %v5290_v2 = vadd.f32 %v8922_v20, %v5251_v46  ;;  %v5252_v33 = vmul.f32 %v7183_v56, %v8915_v31 }
 0x32d   : > { %v5288_v9 = vadd.f32 %v8922_v20, %v5249_v11  ;;  %v5250_v19 = vmul.f32 %v7184_v29, %v8915_v31  ;;  %7109 = vmatprep.mubr.bf16.mxu0 %v5338_v53 }
 0x32e   : > { %v5291_v41 = vadd.f32 %v8922_v20, %v5252_v33  ;;  %7110 = vmatmul.mubr.bf16.gmra.mrb[104].mxu0 %v5339_v25  ;;  %v5322_v47 = vmax.f32 %v5290_v2, 0.0  ;;  %v7553_v25 = vld [vmem:[%s7675_s26 + $0x18] sm:$0xff]  ;;  %v7554_v2 = vld [vmem:[%s7675_s26 + $0x8] sm:$0xff] }
 0x32f   : > { %v5289_v18 = vadd.f32 %v8922_v20, %v5250_v19  ;;  %v7071_v60 = vpop.f32.mrb[28].mxu1  ;;  %v5320_v3 = vmax.f32 %v5288_v9, 0.0 }
 0x330   : > { %v5323_v52 = vmax.f32 %v5291_v41, 0.0  ;;  %v7185_v5 = vadd.f32 %v7071_v60, %v8879_v50  ;;  %v5171_v17 = vpop.f32.mrb[29].mxu1 }
 0x331   : > { %v5321_v10 = vmax.f32 %v5289_v18, 0.0  ;;  %v7186_v57 = vadd.f32 %v5171_v17, %v9229_v30  ;;  %v7072_v59 = vpop.f32.mrb[30].mxu1  ;;  %v7555_v30 = vld [vmem:[%s7675_s26 + $0x30] sm:$0xff] }
 0x332   : > { %v5255_v0 = vmul.f32 %v7185_v5, %v8915_v31  ;;  %v7187_v8 = vadd.f32 %v7072_v59, %v9230_v27  ;;  %v5174_v4 = vpop.f32.mrb[31].mxu1  ;;  %v5341_v58 = vpack.c.bf16 %v5323_v52, %v5322_v47 }
 0x333   : > { %v5253_v48 = vmul.f32 %v7186_v57, %v8915_v31  ;;  %v7188_v15 = vadd.f32 %v5174_v4, %v9231_v22  ;;  %v5340_v44 = vpack.c.bf16 %v5321_v10, %v5320_v3 }
 0x334   : > { %v5294_v49 = vadd.f32 %v8922_v20, %v5255_v0  ;;  %v5256_v50 = vmul.f32 %v7187_v8, %v8915_v31  ;;  %v7556_v0 = vld [vmem:[%s7675_s26 + $0x20] sm:$0xff] }
 0x335   : > { %v5292_v51 = vadd.f32 %v8922_v20, %v5253_v48  ;;  %v5254_v39 = vmul.f32 %v7188_v15, %v8915_v31  ;;  %7113 = vmatprep.mubr.bf16.mxu0 %v5340_v44  ;;  %v7558_v44 = vld [vmem:[%s7675_s26 + $0x28] sm:$0xff] }
 0x336   : > { %v5295_v12 = vadd.f32 %v8922_v20, %v5256_v50  ;;  %7114 = vmatmul.mubr.bf16.gmra.mrb[108].mxu0 %v5341_v58  ;;  %v5326_v43 = vmax.f32 %v5294_v49, 0.0  ;;  %v7557_v58 = vld [vmem:[%s7675_s26 + $0x38] sm:$0xff] }
 0x337   : > { %v5293_v16 = vadd.f32 %v8922_v20, %v5254_v39  ;;  %v5324_v35 = vmax.f32 %v5292_v51, 0.0  ;;  %v9037_v20 = vld [vmem:[%s9218_s9] ss:$0 sm:$0xff] }
 0x338   : > { %v5327_v61 = vmax.f32 %v5295_v12, 0.0 }
 0x339   : > { %v5325_v21 = vmax.f32 %v5293_v16, 0.0 }
 0x33a   : > { %v5343_v28 = vpack.c.bf16 %v5327_v61, %v5326_v43 }
 0x33b   : > { %v5342_v6 = vpack.c.bf16 %v5325_v21, %v5324_v35 }
 0x33d   : > { %7117 = vmatprep.mubr.bf16.mxu0 %v5342_v6 }
 0x33e   : > { %7118 = vmatmul.mubr.bf16.gmra.mrb[112].mxu0 %v5343_v28 }
 0x3c3   : > { %v7091_v31 = vpop.f32.mrb[84].mxu0 }
 0x3c4   : > { %v5578_v36 = vmul.f32 %v7091_v31, %v9032_v42  ;;  %v5442_v34 = vpop.f32.mrb[85].mxu0  ;;  %v7559_v31 = vld [vmem:[%s7675_s26 + $0x50] sm:$0xff] }
 0x3c5   : > { %v5576_v62 = vmul.f32 %v9032_v42, %v5442_v34  ;;  %v7092_v32 = vpop.f32.mrb[86].mxu0 }
 0x3c6   : > { %v5617_v37 = vadd.f32 %v9037_v20, %v5578_v36  ;;  %v5579_v14 = vmul.f32 %v7092_v32, %v9032_v42  ;;  %v5445_v13 = vpop.f32.mrb[87].mxu0 }
 0x3c7   : > { %v5615_v63 = vadd.f32 %v9037_v20, %v5576_v62  ;;  %v5577_v23 = vmul.f32 %v9032_v42, %v5445_v13  ;;  %v7560_v62 = vld [vmem:[%s7675_s26 + $0x40] sm:$0xff]  ;;  %v7561_v13 = vld [vmem:[%s7675_s26 + $0x58] sm:$0xff] }
 0x3c8   : > { %v5649_v24 = vmax.f32 %v5617_v37, 0.0  ;;  %v5618_v7 = vadd.f32 %v9037_v20, %v5579_v14 }
 0x3c9   : > { %v5647_v26 = vmax.f32 %v5615_v63, 0.0  ;;  %v5616_v45 = vadd.f32 %v9037_v20, %v5577_v23 }
 0x3ca   : > { %v5681_v1 = vadd.f32 %v7551_v38, %v5649_v24  ;;  %v5650_v54 = vmax.f32 %v5618_v7, 0.0  ;;  %v7562_v7 = vld [vmem:[%s7675_s26 + $0x48] sm:$0xff] }
 0x3cb   : > { %v5679_v46 = vadd.f32 %v7552_v40, %v5647_v26  ;;  %v5648_v56 = vmax.f32 %v5616_v45, 0.0  ;;  %v7095_v55 = vpop.f32.mrb[88].mxu0 }
 0x3cc   : > { %5713 = vst.msk [vmem:[%s9051_s27 + $0x10] sm:$0xff] %vm471_vm0, %v5681_v1  ;;  %v5682_v11 = vadd.f32 %v7553_v25, %v5650_v54  ;;  %v5582_v29 = vmul.f32 %v7095_v55, %v9032_v42  ;;  %v5458_v53 = vpop.f32.mrb[89].mxu0 }
 0x3cd   : > { %5711 = vst.msk [vmem:[%s9051_s27] sm:$0xff] %vm471_vm0, %v5679_v46  ;;  %v5680_v33 = vadd.f32 %v7554_v2, %v5648_v56  ;;  %v5580_v9 = vmul.f32 %v9032_v42, %v5458_v53  ;;  %v7096_v19 = vpop.f32.mrb[90].mxu0  ;;  %v7563_v53 = vld [vmem:[%s7675_s26 + $0x70] sm:$0xff] }
 0x3ce   : > { %5714 = vst.msk [vmem:[%s9051_s27 + $0x18] sm:$0xff] %vm471_vm0, %v5682_v11  ;;  %v5621_v41 = vadd.f32 %v9037_v20, %v5582_v29  ;;  %v5583_v18 = vmul.f32 %v7096_v19, %v9032_v42  ;;  %v5461_v60 = vpop.f32.mrb[91].mxu0 }
 0x3cf   : > { %5712 = vst.msk [vmem:[%s9051_s27 + $0x8] sm:$0xff] %vm471_vm0, %v5680_v33  ;;  %v5619_v47 = vadd.f32 %v9037_v20, %v5580_v9  ;;  %v5581_v52 = vmul.f32 %v9032_v42, %v5461_v60  ;;  %v7564_v9 = vld [vmem:[%s7675_s26 + $0x60] sm:$0xff]  ;;  %v7565_v60 = vld [vmem:[%s7675_s26 + $0x78] sm:$0xff] }
 0x3d0   : > { %v5653_v5 = vmax.f32 %v5621_v41, 0.0  ;;  %v5622_v17 = vadd.f32 %v9037_v20, %v5583_v18 }
 0x3d1   : > { %v5651_v3 = vmax.f32 %v5619_v47, 0.0  ;;  %v5620_v10 = vadd.f32 %v9037_v20, %v5581_v52 }
 0x3d2   : > { %v5685_v57 = vadd.f32 %v7555_v30, %v5653_v5  ;;  %v5654_v59 = vmax.f32 %v5622_v17, 0.0  ;;  %v7566_v17 = vld [vmem:[%s7675_s26 + $0x68] sm:$0xff] }
 0x3d3   : > { %v5683_v27 = vadd.f32 %v7556_v0, %v5651_v3  ;;  %v5652_v8 = vmax.f32 %v5620_v10, 0.0  ;;  %v7099_v4 = vpop.f32.mrb[92].mxu0 }
 0x3d4   : > { %5717 = vst.msk [vmem:[%s9051_s27 + $0x30] sm:$0xff] %vm471_vm0, %v5685_v57  ;;  %v5686_v48 = vadd.f32 %v7557_v58, %v5654_v59  ;;  %v5586_v22 = vmul.f32 %v7099_v4, %v9032_v42  ;;  %v5474_v15 = vpop.f32.mrb[93].mxu0 }
 0x3d5   : > { %5715 = vst.msk [vmem:[%s9051_s27 + $0x20] sm:$0xff] %vm471_vm0, %v5683_v27  ;;  %v5684_v49 = vadd.f32 %v7558_v44, %v5652_v8  ;;  %v5584_v50 = vmul.f32 %v9032_v42, %v5474_v15  ;;  %v7100_v51 = vpop.f32.mrb[94].mxu0  ;;  %v7567_v15 = vld [vmem:[%s7675_s26 + $0x90] sm:$0xff] }
 0x3d6   : > { %5718 = vst.msk [vmem:[%s9051_s27 + $0x38] sm:$0xff] %vm471_vm0, %v5686_v48  ;;  %v5625_v39 = vadd.f32 %v9037_v20, %v5586_v22  ;;  %v5587_v12 = vmul.f32 %v7100_v51, %v9032_v42  ;;  %v5477_v16 = vpop.f32.mrb[95].mxu0 }
 0x3d7   : > { %5716 = vst.msk [vmem:[%s9051_s27 + $0x28] sm:$0xff] %vm471_vm0, %v5684_v49  ;;  %v5623_v43 = vadd.f32 %v9037_v20, %v5584_v50  ;;  %v5585_v61 = vmul.f32 %v9032_v42, %v5477_v16  ;;  %v7568_v50 = vld [vmem:[%s7675_s26 + $0x80] sm:$0xff] }
 0x3d8   : > { %v5657_v35 = vmax.f32 %v5625_v39, 0.0  ;;  %v5626_v21 = vadd.f32 %v9037_v20, %v5587_v12  ;;  %v7569_v12 = vld [vmem:[%s7675_s26 + $0x98] sm:$0xff] }
 0x3d9   : > { %v5655_v28 = vmax.f32 %v5623_v43, 0.0  ;;  %v5624_v6 = vadd.f32 %v9037_v20, %v5585_v61  ;;  %v7570_v43 = vld [vmem:[%s7675_s26 + $0x88] sm:$0xff] }
 0x3da   : > { %v5689_v36 = vadd.f32 %v7559_v31, %v5657_v35  ;;  %v5658_v34 = vmax.f32 %v5626_v21, 0.0 }
 0x3db   : > { %v5687_v32 = vadd.f32 %v7560_v62, %v5655_v28  ;;  %v5656_v37 = vmax.f32 %v5624_v6, 0.0  ;;  %v7103_v14 = vpop.f32.mrb[96].mxu0 }
 0x3dc   : > { %5721 = vst.msk [vmem:[%s9051_s27 + $0x50] sm:$0xff] %vm471_vm0, %v5689_v36  ;;  %v5690_v63 = vadd.f32 %v7561_v13, %v5658_v34  ;;  %v5590_v23 = vmul.f32 %v7103_v14, %v9032_v42  ;;  %v5490_v24 = vpop.f32.mrb[97].mxu0 }
 0x3dd   : > { %5719 = vst.msk [vmem:[%s9051_s27 + $0x40] sm:$0xff] %vm471_vm0, %v5687_v32  ;;  %v5688_v26 = vadd.f32 %v7562_v7, %v5656_v37  ;;  %v5588_v45 = vmul.f32 %v9032_v42, %v5490_v24  ;;  %v7104_v38 = vpop.f32.mrb[98].mxu0  ;;  %v7571_v24 = vld [vmem:[%s7675_s26 + $0xb0] sm:$0xff] }
 0x3de   : > { %5722 = vst.msk [vmem:[%s9051_s27 + $0x58] sm:$0xff] %vm471_vm0, %v5690_v63  ;;  %v5629_v1 = vadd.f32 %v9037_v20, %v5590_v23  ;;  %v5591_v54 = vmul.f32 %v7104_v38, %v9032_v42  ;;  %v5493_v40 = vpop.f32.mrb[99].mxu0 }
 0x3df   : > { %5720 = vst.msk [vmem:[%s9051_s27 + $0x48] sm:$0xff] %vm471_vm0, %v5688_v26  ;;  %v5627_v46 = vadd.f32 %v9037_v20, %v5588_v45  ;;  %v5589_v56 = vmul.f32 %v9032_v42, %v5493_v40  ;;  %v7572_v45 = vld [vmem:[%s7675_s26 + $0xa0] sm:$0xff]  ;;  %v7573_v40 = vld [vmem:[%s7675_s26 + $0xb8] sm:$0xff] }
 0x3e0   : > { %v5661_v55 = vmax.f32 %v5629_v1, 0.0  ;;  %v5630_v25 = vadd.f32 %v9037_v20, %v5591_v54 }
 0x3e1   : > { %v5659_v11 = vmax.f32 %v5627_v46, 0.0  ;;  %v5628_v29 = vadd.f32 %v9037_v20, %v5589_v56 }
 0x3e2   : > { %v5693_v2 = vadd.f32 %v7563_v53, %v5661_v55  ;;  %v5662_v33 = vmax.f32 %v5630_v25, 0.0  ;;  %v7574_v25 = vld [vmem:[%s7675_s26 + $0xa8] sm:$0xff] }
 0x3e3   : > { %v5691_v19 = vadd.f32 %v7564_v9, %v5659_v11  ;;  %v5660_v41 = vmax.f32 %v5628_v29, 0.0  ;;  %v7107_v18 = vpop.f32.mrb[100].mxu0 }
 0x3e4   : > { %5725 = vst.msk [vmem:[%s9051_s27 + $0x70] sm:$0xff] %vm471_vm0, %v5693_v2  ;;  %v5694_v47 = vadd.f32 %v7565_v60, %v5662_v33  ;;  %v5594_v52 = vmul.f32 %v7107_v18, %v9032_v42  ;;  %v5506_v5 = vpop.f32.mrb[101].mxu0 }
 0x3e5   : > { %5723 = vst.msk [vmem:[%s9051_s27 + $0x60] sm:$0xff] %vm471_vm0, %v5691_v19  ;;  %v5692_v3 = vadd.f32 %v7566_v17, %v5660_v41  ;;  %v5592_v10 = vmul.f32 %v9032_v42, %v5506_v5  ;;  %v7108_v30 = vpop.f32.mrb[102].mxu0  ;;  %v7575_v5 = vld [vmem:[%s7675_s26 + $0xd0] sm:$0xff] }
 0x3e6   : > { %5726 = vst.msk [vmem:[%s9051_s27 + $0x78] sm:$0xff] %vm471_vm0, %v5694_v47  ;;  %v5633_v57 = vadd.f32 %v9037_v20, %v5594_v52  ;;  %v5595_v59 = vmul.f32 %v7108_v30, %v9032_v42  ;;  %v5509_v0 = vpop.f32.mrb[103].mxu0 }
 0x3e7   : > { %5724 = vst.msk [vmem:[%s9051_s27 + $0x68] sm:$0xff] %vm471_vm0, %v5692_v3  ;;  %v5631_v27 = vadd.f32 %v9037_v20, %v5592_v10  ;;  %v5593_v8 = vmul.f32 %v9032_v42, %v5509_v0  ;;  %v7576_v10 = vld [vmem:[%s7675_s26 + $0xc0] sm:$0xff]  ;;  %v7577_v0 = vld [vmem:[%s7675_s26 + $0xd8] sm:$0xff] }
 0x3e8   : > { %v5665_v4 = vmax.f32 %v5633_v57, 0.0  ;;  %v5634_v58 = vadd.f32 %v9037_v20, %v5595_v59 }
 0x3e9   : > { %v5663_v48 = vmax.f32 %v5631_v27, 0.0  ;;  %v5632_v22 = vadd.f32 %v9037_v20, %v5593_v8 }
 0x3ea   : > { %v5697_v44 = vadd.f32 %v7567_v15, %v5665_v4  ;;  %v5666_v49 = vmax.f32 %v5634_v58, 0.0  ;;  %v7578_v58 = vld [vmem:[%s7675_s26 + $0xc8] sm:$0xff] }
 0x3eb   : > { %v5695_v51 = vadd.f32 %v7568_v50, %v5663_v48  ;;  %v5664_v39 = vmax.f32 %v5632_v22, 0.0 }
 0x3ec   : > { %5729 = vst.msk [vmem:[%s9051_s27 + $0x90] sm:$0xff] %vm471_vm0, %v5697_v44  ;;  %v5698_v16 = vadd.f32 %v7569_v12, %v5666_v49 }
 0x3ed   : > { %5727 = vst.msk [vmem:[%s9051_s27 + $0x80] sm:$0xff] %vm471_vm0, %v5695_v51  ;;  %v5696_v61 = vadd.f32 %v7570_v43, %v5664_v39 }
 0x3ee   : > { %5730 = vst.msk [vmem:[%s9051_s27 + $0x98] sm:$0xff] %vm471_vm0, %v5698_v16 }
 0x3ef   : > { %5728 = vst.msk [vmem:[%s9051_s27 + $0x88] sm:$0xff] %vm471_vm0, %v5696_v61 }
 0x401   : > { %v7111_v35 = vpop.f32.mrb[104].mxu0 }
 0x402   : > { %v5598_v21 = vmul.f32 %v7111_v35, %v9032_v42  ;;  %v5522_v28 = vpop.f32.mrb[105].mxu0  ;;  %v7579_v35 = vld [vmem:[%s7675_s26 + $0xf0] sm:$0xff] }
 0x403   : > { %v5596_v6 = vmul.f32 %v9032_v42, %v5522_v28  ;;  %v7112_v31 = vpop.f32.mrb[106].mxu0 }
 0x404   : > { %v5637_v36 = vadd.f32 %v9037_v20, %v5598_v21  ;;  %v5599_v34 = vmul.f32 %v7112_v31, %v9032_v42  ;;  %v5525_v62 = vpop.f32.mrb[107].mxu0 }
 0x405   : > { %v5635_v32 = vadd.f32 %v9037_v20, %v5596_v6  ;;  %v5597_v37 = vmul.f32 %v9032_v42, %v5525_v62  ;;  %v7580_v6 = vld [vmem:[%s7675_s26 + $0xe0] sm:$0xff] }
 0x406   : > { %v5669_v14 = vmax.f32 %v5637_v36, 0.0  ;;  %v5638_v13 = vadd.f32 %v9037_v20, %v5599_v34  ;;  %v7581_v34 = vld [vmem:[%s7675_s26 + $0xf8] sm:$0xff] }
 0x407   : > { %v5667_v63 = vmax.f32 %v5635_v32, 0.0  ;;  %v5636_v23 = vadd.f32 %v9037_v20, %v5597_v37 }
 0x408   : > { %v5701_v7 = vadd.f32 %v7571_v24, %v5669_v14  ;;  %v5670_v26 = vmax.f32 %v5638_v13, 0.0 }
 0x409   : > { %v5699_v38 = vadd.f32 %v7572_v45, %v5667_v63  ;;  %v5668_v1 = vmax.f32 %v5636_v23, 0.0  ;;  %v7115_v54 = vpop.f32.mrb[108].mxu0 }
 0x40a   : > { %5733 = vst.msk [vmem:[%s9051_s27 + $0xb0] sm:$0xff] %vm471_vm0, %v5701_v7  ;;  %v5702_v46 = vadd.f32 %v7573_v40, %v5670_v26  ;;  %v5602_v56 = vmul.f32 %v7115_v54, %v9032_v42  ;;  %v5538_v55 = vpop.f32.mrb[109].mxu0 }
 0x40b   : > { %5731 = vst.msk [vmem:[%s9051_s27 + $0xa0] sm:$0xff] %vm471_vm0, %v5699_v38  ;;  %v5700_v11 = vadd.f32 %v7574_v25, %v5668_v1  ;;  %v5600_v29 = vmul.f32 %v9032_v42, %v5538_v55  ;;  %v7116_v53 = vpop.f32.mrb[110].mxu0 }
 0x40c   : > { %5734 = vst.msk [vmem:[%s9051_s27 + $0xb8] sm:$0xff] %vm471_vm0, %v5702_v46  ;;  %v5641_v2 = vadd.f32 %v9037_v20, %v5602_v56  ;;  %v5603_v33 = vmul.f32 %v7116_v53, %v9032_v42  ;;  %v5541_v9 = vpop.f32.mrb[111].mxu0 }
 0x40d   : > { %5732 = vst.msk [vmem:[%s9051_s27 + $0xa8] sm:$0xff] %vm471_vm0, %v5700_v11  ;;  %v5639_v19 = vadd.f32 %v9037_v20, %v5600_v29  ;;  %v5601_v41 = vmul.f32 %v9032_v42, %v5541_v9 }
 0x40e   : > { %v5673_v18 = vmax.f32 %v5641_v2, 0.0  ;;  %v5642_v60 = vadd.f32 %v9037_v20, %v5603_v33 }
 0x40f   : > { %v5671_v47 = vmax.f32 %v5639_v19, 0.0  ;;  %v5640_v52 = vadd.f32 %v9037_v20, %v5601_v41 }
 0x410   : > { %v5705_v17 = vadd.f32 %v7575_v5, %v5673_v18  ;;  %v5674_v3 = vmax.f32 %v5642_v60, 0.0 }
 0x411   : > { %v5703_v30 = vadd.f32 %v7576_v10, %v5671_v47  ;;  %v5672_v57 = vmax.f32 %v5640_v52, 0.0  ;;  %v7119_v59 = vpop.f32.mrb[112].mxu0 }
 0x412   : > { %5737 = vst.msk [vmem:[%s9051_s27 + $0xd0] sm:$0xff] %vm471_vm0, %v5705_v17  ;;  %v5706_v27 = vadd.f32 %v7577_v0, %v5674_v3  ;;  %v5606_v8 = vmul.f32 %v7119_v59, %v9032_v42  ;;  %v5554_v4 = vpop.f32.mrb[113].mxu0 }
 0x413   : > { %5735 = vst.msk [vmem:[%s9051_s27 + $0xc0] sm:$0xff] %vm471_vm0, %v5703_v30  ;;  %v5704_v48 = vadd.f32 %v7578_v58, %v5672_v57  ;;  %v5604_v22 = vmul.f32 %v9032_v42, %v5554_v4  ;;  %v7120_v15 = vpop.f32.mrb[114].mxu0 }
 0x414   : > { %5738 = vst.msk [vmem:[%s9051_s27 + $0xd8] sm:$0xff] %vm471_vm0, %v5706_v27  ;;  %v5645_v44 = vadd.f32 %v9037_v20, %v5606_v8  ;;  %v5607_v49 = vmul.f32 %v7120_v15, %v9032_v42  ;;  %v5557_v50 = vpop.f32.mrb[115].mxu0 }
 0x415   : > { %5736 = vst.msk [vmem:[%s9051_s27 + $0xc8] sm:$0xff] %vm471_vm0, %v5704_v48  ;;  %v5643_v51 = vadd.f32 %v9037_v20, %v5604_v22  ;;  %v5605_v39 = vmul.f32 %v9032_v42, %v5557_v50  ;;  %v7582_v42 = vld [vmem:[%s7675_s26 + $0xe8] sm:$0xff] }
 0x416   : > { %v5677_v12 = vmax.f32 %v5645_v44, 0.0  ;;  %v5646_v16 = vadd.f32 %v9037_v20, %v5607_v49 }
 0x417   : > { %v5675_v43 = vmax.f32 %v5643_v51, 0.0  ;;  %v5644_v61 = vadd.f32 %v9037_v20, %v5605_v39 }
 0x418   : > { %v5709_v21 = vadd.f32 %v7579_v35, %v5677_v12  ;;  %v5678_v28 = vmax.f32 %v5646_v16, 0.0 }
 0x419   : > { %v5707_v31 = vadd.f32 %v7580_v6, %v5675_v43  ;;  %v5676_v36 = vmax.f32 %v5644_v61, 0.0 }
 0x41a   : > { %5741 = vst.msk [vmem:[%s9051_s27 + $0xf0] sm:$0xff] %vm471_vm0, %v5709_v21  ;;  %v5710_v62 = vadd.f32 %v7581_v34, %v5678_v28 }
 0x41b   : > { %5739 = vst.msk [vmem:[%s9051_s27 + $0xe0] sm:$0xff] %vm471_vm0, %v5707_v31  ;;  %v5708_v32 = vadd.f32 %v7582_v42, %v5676_v36 }
 0x41c   : > { %5742 = vst.msk [vmem:[%s9051_s27 + $0xf8] sm:$0xff] %vm471_vm0, %v5710_v62 }
 0x41d   : > { %5740 = vst.msk [vmem:[%s9051_s27 + $0xe8] sm:$0xff] %vm471_vm0, %v5708_v32 }
 0x41e PF: > { %s20_s13 = sadd.s32 1, %s7589_s13  }
 0x41f   : > { %p17_p4 = scmp.ge.s32.totalorder %s20_s13, 4  }
 0x421   :  { %19 = sbr.rel (!%p17_p4) target bundleno = 1 (0x1), region = 101 }

</bundles_post_ra>
